<compile_context>
chip_gen: v5e
topology: v5e:2x2
jax: 0.10.0
libtpu: 0.0.40
codegen_flags: <defaults>
</compile_context>

<pallas_src>
import functools

import jax
import jax.numpy as jnp
from jax import lax
from jax.experimental import pallas as pl
from jax.experimental.pallas import tpu as pltpu


# ----------------------------- activations -----------------------------------
def _gelu_exact(x):
    # torch.nn.GELU() default: exact erf-based GELU.
    return 0.5 * x * (1.0 + lax.erf(x * (2.0 ** -0.5)))


def _gelu_tanh(x):
    # tanh-approximation fallback (only if lax.erf has no Mosaic lowering).
    c = 0.7978845608028654  # sqrt(2/pi)
    return 0.5 * x * (1.0 + jnp.tanh(c * (x + 0.044715 * x * x * x)))


_ERF_OK = None


def _erf_supported():
    """Explicitly probe whether lax.erf lowers through Mosaic (isolated kernel)."""
    global _ERF_OK
    if _ERF_OK is None:
        def probe(x_ref, o_ref):
            o_ref[...] = lax.erf(x_ref[...])
        try:
            z = pl.pallas_call(
                probe, out_shape=jax.ShapeDtypeStruct((8, 128), jnp.float32)
            )(jnp.zeros((8, 128), jnp.float32))
            jax.block_until_ready(z)
            _ERF_OK = True
        except Exception:
            _ERF_OK = False
    return _ERF_OK


# ------------------------------- kernel ---------------------------------------
def _conv3x3_from_pad(pad_ref, w_ref, b_ref, H, W, Cout):
    """3x3 conv over a zero-padded, pre-activated map held in VMEM scratch.

    Expressed as 9 accumulated (HW, Cin) x (Cin, Cout) MXU matmuls over shifted
    static windows (no im2col materialization).  bf16 operands, f32 accumulate.
    """
    HW = H * W
    Cin = pad_ref.shape[-1]
    acc = jnp.zeros((HW, Cout), jnp.float32) + b_ref[...]
    for dy in range(3):
        for dx in range(3):
            win = pad_ref[dy:dy + H, dx:dx + W, :].reshape(HW, Cin)
            acc = acc + jnp.dot(win.astype(jnp.bfloat16), w_ref[dy * 3 + dx],
                                preferred_element_type=jnp.float32)
    return acc


def _upblock_kernel(*refs, has_attn, act):
    if has_attn:
        (x_ref, w1_ref, b1_ref, w2_ref, b2_ref, ws_ref, bs_ref,
         wq_ref, wk_ref, wv_ref, bq_ref, bk_ref, bv_ref, wo_ref, bo_ref,
         o_ref, pad1_ref, pad2_ref) = refs
    else:
        (x_ref, w1_ref, b1_ref, w2_ref, b2_ref, ws_ref, bs_ref,
         o_ref, pad1_ref, pad2_ref) = refs

    _, H, W, Cin = x_ref.shape
    Cout = b1_ref.shape[-1]
    HW = H * W
    f32 = jnp.float32
    bf16 = jnp.bfloat16

    xs = x_ref[0]                                                  # (H, W, Cin)

    # ---- ResidualBlock: h = conv1(gelu(x)) -----------------------------------
    # GELU applied once to the un-expanded activation; conv zero-padding is
    # applied to the activated map (matches conv1(act(x)) exactly).
    a1 = act(xs)
    pad1_ref[...] = jnp.zeros_like(pad1_ref)
    pad1_ref[1:H + 1, 1:W + 1, :] = a1
    h1 = _conv3x3_from_pad(pad1_ref, w1_ref, b1_ref, H, W, Cout)   # (HW, Cout)

    # ---- h = conv2(gelu(h)) --------------------------------------------------
    a2 = act(h1).reshape(H, W, Cout)
    pad2_ref[...] = jnp.zeros_like(pad2_ref)
    pad2_ref[1:H + 1, 1:W + 1, :] = a2
    h2 = _conv3x3_from_pad(pad2_ref, w2_ref, b2_ref, H, W, Cout)   # (HW, Cout)

    # ---- out = h + shortcut(x) (1x1 conv of the ORIGINAL, un-activated x) ----
    x_flat = xs.reshape(HW, Cin)
    sc = jnp.dot(x_flat.astype(bf16), ws_ref[...],
                 preferred_element_type=f32) + bs_ref[...]
    out = h2 + sc                                                  # (HW, Cout)

    # ---- AttentionBlock (single head, d_k = Cout) ----------------------------
    if has_attn:
        scale = float(Cout) ** -0.5
        xb = out.astype(bf16)
        q = jnp.dot(xb, wq_ref[...], preferred_element_type=f32) + bq_ref[...]
        k = jnp.dot(xb, wk_ref[...], preferred_element_type=f32) + bk_ref[...]
        v = jnp.dot(xb, wv_ref[...], preferred_element_type=f32) + bv_ref[...]
        attn = jnp.einsum('qd,kd->qk', q.astype(bf16), k.astype(bf16),
                          preferred_element_type=f32) * scale      # (HW, HW)
        # NB: the reference softmaxes dim=1 of 'bijh', i.e. the QUERY axis
        # (axis 0 of this (i, j) matrix).  Reproduced verbatim.
        m = jnp.max(attn, axis=0, keepdims=True)
        e = jnp.exp(attn - m)
        s = jnp.sum(e, axis=0, keepdims=True)
        p = e * pl.reciprocal(s, approx=True)
        res = jnp.dot(p.astype(bf16), v.astype(bf16),
                      preferred_element_type=f32)                  # (HW, Cout)
        out = (jnp.dot(res.astype(bf16), wo_ref[...],
                       preferred_element_type=f32) + bo_ref[...] + out)
        # TODO(synk): tile the (HW, HW) logits with an online softmax over query
        # blocks before scaling to HW >~ 2-3k (full block exceeds v7x 64 MiB VMEM).
        # TODO(synk): AttentionBlock.norm (GroupNorm) is built in __init__ but
        # never called by the reference forward, so it is intentionally omitted.

    # ---- lane-dense store: (Cout, HW) with HW on the lane axis ---------------
    # Transpose via an identity matmul on the MXU (same dot_general pattern as
    # the attention logits) instead of a standalone relayout transpose.
    rows = lax.broadcasted_iota(jnp.int32, (Cout, Cout), 0)
    cols = lax.broadcasted_iota(jnp.int32, (Cout, Cout), 1)
    eye = (rows == cols).astype(f32)
    out_t = jnp.einsum('ck,hk->ch', eye, out, preferred_element_type=f32)
    o_ref[0] = out_t.astype(o_ref.dtype)


# --------------------------- pallas_call wrapper --------------------------------
def _upblock_pallas(x_nhwc, params, has_attn, exact_gelu):
    B, H, W, Cin = x_nhwc.shape
    Cout = params["b1"].shape[-1]
    HW = H * W
    act = _gelu_exact if exact_gelu else _gelu_tanh
    kern = functools.partial(_upblock_kernel, has_attn=has_attn, act=act)
    bf16 = jnp.bfloat16

    def resident(shape):
        # grid-invariant (weight) block: same block index every grid step
        if len(shape) == 2:
            return pl.BlockSpec(shape, lambda b: (0, 0))
        return pl.BlockSpec(shape, lambda b: (0, 0, 0))

    in_specs = [
        pl.BlockSpec((1, H, W, Cin), lambda b: (b, 0, 0, 0)),
        resident((9, Cin, Cout)), resident((1, Cout)),
        resident((9, Cout, Cout)), resident((1, Cout)),
        resident((Cin, Cout)), resident((1, Cout)),
    ]
    args = [
        x_nhwc,
        params["w1"].reshape(9, Cin, Cout).astype(bf16), params["b1"],
        params["w2"].reshape(9, Cout, Cout).astype(bf16), params["b2"],
        params["ws"].astype(bf16), params["bs"],
    ]
    if has_attn:
        in_specs += [resident((Cout, Cout)), resident((Cout, Cout)),
                     resident((Cout, Cout)),
                     resident((1, Cout)), resident((1, Cout)), resident((1, Cout)),
                     resident((Cout, Cout)), resident((1, Cout))]
        args += [params["wq"].astype(bf16), params["wk"].astype(bf16),
                 params["wv"].astype(bf16),
                 params["bq"], params["bk"], params["bv"],
                 params["wo"].astype(bf16), params["bo"]]

    out = pl.pallas_call(
        kern,
        out_shape=jax.ShapeDtypeStruct((B, Cout, HW), jnp.float32),
        grid_spec=pltpu.PrefetchScalarGridSpec(
            num_scalar_prefetch=0,
            grid=(B,),
            in_specs=in_specs,
            out_specs=pl.BlockSpec((1, Cout, HW), lambda b: (b, 0, 0)),
            scratch_shapes=[
                pltpu.VMEM((H + 2, W + 2, Cin), jnp.float32),   # padded gelu(x)
                pltpu.VMEM((H + 2, W + 2, Cout), jnp.float32),  # padded gelu(h1)
            ],
        ),
        compiler_params=pltpu.CompilerParams(
            dimension_semantics=("parallel",),   # v7x: one batch element per TC
        ),
    )(*args)
    return out   # (B, Cout, H*W), channels-first, HW lane-dense


# ------------------------------- params & forward --------------------------------
def init_upblock_params(key, in_channels, out_channels, has_attn):
    """Deterministic synthetic parameters matching the PyTorch module's shapes."""
    c_in = in_channels + out_channels                   # UpBlock input channels
    co = out_channels
    ks = jax.random.split(key, 14)
    s = 0.1
    p = {
        # conv1: 3x3, c_in -> co  (HWIO)
        "w1": jax.random.normal(ks[0], (3, 3, c_in, co), jnp.float32) * s,
        "b1": jax.random.normal(ks[1], (1, co), jnp.float32) * s,
        # conv2: 3x3, co -> co
        "w2": jax.random.normal(ks[2], (3, 3, co, co), jnp.float32) * s,
        "b2": jax.random.normal(ks[3], (1, co), jnp.float32) * s,
        # shortcut 1x1: c_in -> co
        "ws": jax.random.normal(ks[4], (c_in, co), jnp.float32) * s,
        "bs": jax.random.normal(ks[5], (1, co), jnp.float32) * s,
    }
    if has_attn:
        # AttentionBlock(co): n_heads=1, d_k=co.  projection Linear(co, 3*co)
        # split into q/k/v weights; output Linear(co, co).
        p.update({
            "wq": jax.random.normal(ks[6], (co, co), jnp.float32) * s,
            "wk": jax.random.normal(ks[7], (co, co), jnp.float32) * s,
            "wv": jax.random.normal(ks[8], (co, co), jnp.float32) * s,
            "bq": jax.random.normal(ks[9], (1, co), jnp.float32) * s,
            "bk": jax.random.normal(ks[10], (1, co), jnp.float32) * s,
            "bv": jax.random.normal(ks[11], (1, co), jnp.float32) * s,
            "wo": jax.random.normal(ks[12], (co, co), jnp.float32) * s,
            "bo": jax.random.normal(ks[13], (1, co), jnp.float32) * s,
        })
    return p


@functools.partial(jax.jit, static_argnames=("has_attn", "exact_gelu"))
def _upblock_forward_jit(params, x_nchw, has_attn, exact_gelu):
    x = jnp.transpose(x_nchw, (0, 2, 3, 1)).astype(jnp.float32)    # NHWC
    B, H, W, _ = x.shape
    Cout = params["b1"].shape[-1]
    out = _upblock_pallas(x, params, has_attn, exact_gelu)         # (B, Cout, HW)
    return out.reshape(B, Cout, H, W)                              # NCHW directly


def upblock_forward(params, x_nchw, has_attn, exact_gelu=None):
    """UpBlock.forward.  x_nchw: (B, in_channels+out_channels, H, W) -> (B, out, H, W)."""
    if exact_gelu is None:
        exact_gelu = _erf_supported()
    return _upblock_forward_jit(params, x_nchw, has_attn=has_attn,
                                exact_gelu=exact_gelu)


# --------------------------------- main ----------------------------------------
if __name__ == "__main__":
    key = jax.random.PRNGKey(0)
    in_channels, out_channels = 8, 4
    B, H, W = 2, 16, 16

    kx, kp = jax.random.split(key)
    # UpBlock's ResidualBlock expects in_channels + out_channels input channels
    # (the skip-concatenated U-Net feature map).
    x = jax.random.normal(kx, (B, in_channels + out_channels, H, W), jnp.float32)
    params = init_upblock_params(kp, in_channels, out_channels, has_attn=True)

    y0 = upblock_forward(params, x, has_attn=False)
    y1 = upblock_forward(params, x, has_attn=True)
    jax.block_until_ready((y0, y1))

    assert y0.shape == (B, out_channels, H, W)
    assert y1.shape == (B, out_channels, H, W)
    assert bool(jnp.all(jnp.isfinite(y0))) and bool(jnp.all(jnp.isfinite(y1)))
    print("KERNEL_OK")
</pallas_src>

<mosaic_0001>
module attributes {stable_mosaic.version = 11 : i64} {
  func.func @probe(%arg0: memref<8x128xf32, #tpu.memory_space<vmem>>, %arg1: memref<8x128xf32, #tpu.memory_space<vmem>>) attributes {dimension_semantics = [], scalar_prefetch = 0 : i64, scratch_operands = 0 : i64, tpu.core_type = #tpu.core_type<tc>} {
    %c0 = arith.constant 0 : index
    %c0_0 = arith.constant 0 : index
    %0 = vector.load %arg0[%c0, %c0_0] : memref<8x128xf32, #tpu.memory_space<vmem>>, vector<8x128xf32>
    %1 = math.erf %0 : vector<8x128xf32>
    %c0_1 = arith.constant 0 : index
    %c0_2 = arith.constant 0 : index
    %2 = vector.load %arg1[%c0_1, %c0_2] : memref<8x128xf32, #tpu.memory_space<vmem>>, vector<8x128xf32>
    tpu.vector_store %arg1[%c0_1, %c0_2], %1 {strides = array<i32>} : memref<8x128xf32, #tpu.memory_space<vmem>>, vector<8x128xf32>,
    return
  }
}

module attributes {stable_mosaic.version = 11 : i64} {
  func.func @_upblock_kernel(%arg0: i32, %arg1: memref<1x16x16x12xf32, #tpu.memory_space<vmem>>, %arg2: memref<9x12x4xbf16, #tpu.memory_space<vmem>>, %arg3: memref<1x4xf32, #tpu.memory_space<vmem>>, %arg4: memref<9x4x4xbf16, #tpu.memory_space<vmem>>, %arg5: memref<1x4xf32, #tpu.memory_space<vmem>>, %arg6: memref<12x4xbf16, #tpu.memory_space<vmem>>, %arg7: memref<1x4xf32, #tpu.memory_space<vmem>>, %arg8: memref<1x4x256xf32, #tpu.memory_space<vmem>>, %arg9: memref<18x18x12xf32, #tpu.memory_space<vmem>>, %arg10: memref<18x18x4xf32, #tpu.memory_space<vmem>>) attributes {dimension_semantics = [#tpu.dimension_semantics<parallel>], iteration_bounds = array<i64: 2>, scalar_prefetch = 0 : i64, scratch_operands = 2 : i64, tpu.core_type = #tpu.core_type<tc>, window_params = [{transform_indices = @transform_0, window_bounds = array<i64: 1, 16, 16, 12>}, {pipeline_mode = #tpu.pipeline_mode<synchronous>, transform_indices = @transform_1, window_bounds = array<i64: 9, 12, 4>}, {pipeline_mode = #tpu.pipeline_mode<synchronous>, transform_indices = @transform_2, window_bounds = array<i64: 1, 4>}, {pipeline_mode = #tpu.pipeline_mode<synchronous>, transform_indices = @transform_3, window_bounds = array<i64: 9, 4, 4>}, {pipeline_mode = #tpu.pipeline_mode<synchronous>, transform_indices = @transform_4, window_bounds = array<i64: 1, 4>}, {pipeline_mode = #tpu.pipeline_mode<synchronous>, transform_indices = @transform_5, window_bounds = array<i64: 12, 4>}, {pipeline_mode = #tpu.pipeline_mode<synchronous>, transform_indices = @transform_6, window_bounds = array<i64: 1, 4>}, {transform_indices = @transform_7, window_bounds = array<i64: 1, 4, 256>}]} {
    %c0 = arith.constant 0 : index
    %c0_0 = arith.constant 0 : index
    %c0_1 = arith.constant 0 : index
    %c0_2 = arith.constant 0 : index
    %0 = vector.load %arg1[%c0, %c0_0, %c0_1, %c0_2] : memref<1x16x16x12xf32, #tpu.memory_space<vmem>>, vector<1x16x16x12xf32>
    %1 = vector.shape_cast %0 : vector<1x16x16x12xf32> to vector<16x16x12xf32>
    %cst = arith.constant 5.000000e-01 : f32
    %2 = vector.broadcast %cst : f32 to vector<16x16x12xf32>
    %3 = arith.mulf %2, %1 : vector<16x16x12xf32>
    %cst_3 = arith.constant 4.471500e-02 : f32
    %4 = vector.broadcast %cst_3 : f32 to vector<16x16x12xf32>
    %5 = arith.mulf %4, %1 : vector<16x16x12xf32>
    %6 = arith.mulf %5, %1 : vector<16x16x12xf32>
    %7 = arith.mulf %6, %1 : vector<16x16x12xf32>
    %8 = arith.addf %1, %7 : vector<16x16x12xf32>
    %cst_4 = arith.constant 0.797884583 : f32
    %9 = vector.broadcast %cst_4 : f32 to vector<16x16x12xf32>
    %10 = arith.mulf %9, %8 : vector<16x16x12xf32>
    %11 = math.tanh %10 : vector<16x16x12xf32>
    %cst_5 = arith.constant 1.000000e+00 : f32
    %12 = vector.broadcast %cst_5 : f32 to vector<16x16x12xf32>
    %13 = arith.addf %12, %11 : vector<16x16x12xf32>
    %14 = arith.mulf %3, %13 : vector<16x16x12xf32>
    %cst_6 = arith.constant 0.000000e+00 : f32
    %15 = vector.broadcast %cst_6 : f32 to vector<18x18x12xf32>
    %c0_7 = arith.constant 0 : index
    %c0_8 = arith.constant 0 : index
    %c0_9 = arith.constant 0 : index
    %16 = vector.load %arg9[%c0_7, %c0_8, %c0_9] : memref<18x18x12xf32, #tpu.memory_space<vmem>>, vector<18x18x12xf32>
    tpu.vector_store %arg9[%c0_7, %c0_8, %c0_9], %15 {strides = array<i32>} : memref<18x18x12xf32, #tpu.memory_space<vmem>>, vector<18x18x12xf32>,
    %c1 = arith.constant 1 : index
    %c1_10 = arith.constant 1 : index
    %c0_11 = arith.constant 0 : index
    %17 = vector.load %arg9[%c1, %c1_10, %c0_11] : memref<18x18x12xf32, #tpu.memory_space<vmem>>, vector<16x16x12xf32>
    tpu.vector_store %arg9[%c1, %c1_10, %c0_11], %14 {strides = array<i32>} : memref<18x18x12xf32, #tpu.memory_space<vmem>>, vector<16x16x12xf32>,
    %cst_12 = arith.constant 0.000000e+00 : f32
    %18 = vector.broadcast %cst_12 : f32 to vector<256x4xf32>
    %c0_13 = arith.constant 0 : index
    %c0_14 = arith.constant 0 : index
    %19 = vector.load %arg3[%c0_13, %c0_14] : memref<1x4xf32, #tpu.memory_space<vmem>>, vector<1x4xf32>
    %20 = vector.broadcast %19 : vector<1x4xf32> to vector<256x4xf32>
    %21 = arith.addf %18, %20 : vector<256x4xf32>
    %c0_15 = arith.constant 0 : index
    %c0_16 = arith.constant 0 : index
    %c0_17 = arith.constant 0 : index
    %22 = vector.load %arg9[%c0_15, %c0_16, %c0_17] : memref<18x18x12xf32, #tpu.memory_space<vmem>>, vector<16x16x12xf32>
    %23 = vector.shape_cast %22 : vector<16x16x12xf32> to vector<256x12xf32>
    %24 = arith.truncf %23 : vector<256x12xf32> to vector<256x12xbf16>
    %c0_18 = arith.constant 0 : index
    %c0_19 = arith.constant 0 : index
    %c0_20 = arith.constant 0 : index
    %25 = vector.load %arg2[%c0_18, %c0_19, %c0_20] : memref<9x12x4xbf16, #tpu.memory_space<vmem>>, vector<1x12x4xbf16>
    %26 = vector.shape_cast %25 : vector<1x12x4xbf16> to vector<12x4xbf16>
    %cst_21 = arith.constant dense<0.000000e+00> : vector<256x4xf32>
    %27 = tpu.matmul %24, %26, %cst_21 {dimension_numbers = #tpu.dot_dimension_numbers<[1], [0], [0], [1], [0, 0, 1, 1], [], []>} : vector<256x12xbf16>, vector<12x4xbf16>, vector<256x4xf32> -> vector<256x4xf32>
    %28 = arith.addf %21, %27 : vector<256x4xf32>
    %c0_22 = arith.constant 0 : index
    %c1_23 = arith.constant 1 : index
    %c0_24 = arith.constant 0 : index
    %29 = vector.load %arg9[%c0_22, %c1_23, %c0_24] : memref<18x18x12xf32, #tpu.memory_space<vmem>>, vector<16x16x12xf32>
    %30 = vector.shape_cast %29 : vector<16x16x12xf32> to vector<256x12xf32>
    %31 = arith.truncf %30 : vector<256x12xf32> to vector<256x12xbf16>
    %c1_25 = arith.constant 1 : index
    %c0_26 = arith.constant 0 : index
    %c0_27 = arith.constant 0 : index
    %32 = vector.load %arg2[%c1_25, %c0_26, %c0_27] : memref<9x12x4xbf16, #tpu.memory_space<vmem>>, vector<1x12x4xbf16>
    %33 = vector.shape_cast %32 : vector<1x12x4xbf16> to vector<12x4xbf16>
    %cst_28 = arith.constant dense<0.000000e+00> : vector<256x4xf32>
    %34 = tpu.matmul %31, %33, %cst_28 {dimension_numbers = #tpu.dot_dimension_numbers<[1], [0], [0], [1], [0, 0, 1, 1], [], []>} : vector<256x12xbf16>, vector<12x4xbf16>, vector<256x4xf32> -> vector<256x4xf32>
    %35 = arith.addf %28, %34 : vector<256x4xf32>
    %c0_29 = arith.constant 0 : index
    %c2 = arith.constant 2 : index
    %c0_30 = arith.constant 0 : index
    %36 = vector.load %arg9[%c0_29, %c2, %c0_30] : memref<18x18x12xf32, #tpu.memory_space<vmem>>, vector<16x16x12xf32>
    %37 = vector.shape_cast %36 : vector<16x16x12xf32> to vector<256x12xf32>
    %38 = arith.truncf %37 : vector<256x12xf32> to vector<256x12xbf16>
    %c2_31 = arith.constant 2 : index
    %c0_32 = arith.constant 0 : index
    %c0_33 = arith.constant 0 : index
    %39 = vector.load %arg2[%c2_31, %c0_32, %c0_33] : memref<9x12x4xbf16, #tpu.memory_space<vmem>>, vector<1x12x4xbf16>
    %40 = vector.shape_cast %39 : vector<1x12x4xbf16> to vector<12x4xbf16>
    %cst_34 = arith.constant dense<0.000000e+00> : vector<256x4xf32>
    %41 = tpu.matmul %38, %40, %cst_34 {dimension_numbers = #tpu.dot_dimension_numbers<[1], [0], [0], [1], [0, 0, 1, 1], [], []>} : vector<256x12xbf16>, vector<12x4xbf16>, vector<256x4xf32> -> vector<256x4xf32>
    %42 = arith.addf %35, %41 : vector<256x4xf32>
    %c1_35 = arith.constant 1 : index
    %c0_36 = arith.constant 0 : index
    %c0_37 = arith.constant 0 : index
    %43 = vector.load %arg9[%c1_35, %c0_36, %c0_37] : memref<18x18x12xf32, #tpu.memory_space<vmem>>, vector<16x16x12xf32>
    %44 = vector.shape_cast %43 : vector<16x16x12xf32> to vector<256x12xf32>
    %45 = arith.truncf %44 : vector<256x12xf32> to vector<256x12xbf16>
    %c3 = arith.constant 3 : index
    %c0_38 = arith.constant 0 : index
    %c0_39 = arith.constant 0 : index
    %46 = vector.load %arg2[%c3, %c0_38, %c0_39] : memref<9x12x4xbf16, #tpu.memory_space<vmem>>, vector<1x12x4xbf16>
    %47 = vector.shape_cast %46 : vector<1x12x4xbf16> to vector<12x4xbf16>
    %cst_40 = arith.constant dense<0.000000e+00> : vector<256x4xf32>
    %48 = tpu.matmul %45, %47, %cst_40 {dimension_numbers = #tpu.dot_dimension_numbers<[1], [0], [0], [1], [0, 0, 1, 1], [], []>} : vector<256x12xbf16>, vector<12x4xbf16>, vector<256x4xf32> -> vector<256x4xf32>
    %49 = arith.addf %42, %48 : vector<256x4xf32>
    %c1_41 = arith.constant 1 : index
    %c1_42 = arith.constant 1 : index
    %c0_43 = arith.constant 0 : index
    %50 = vector.load %arg9[%c1_41, %c1_42, %c0_43] : memref<18x18x12xf32, #tpu.memory_space<vmem>>, vector<16x16x12xf32>
    %51 = vector.shape_cast %50 : vector<16x16x12xf32> to vector<256x12xf32>
    %52 = arith.truncf %51 : vector<256x12xf32> to vector<256x12xbf16>
    %c4 = arith.constant 4 : index
    %c0_44 = arith.constant 0 : index
    %c0_45 = arith.constant 0 : index
    %53 = vector.load %arg2[%c4, %c0_44, %c0_45] : memref<9x12x4xbf16, #tpu.memory_space<vmem>>, vector<1x12x4xbf16>
    %54 = vector.shape_cast %53 : vector<1x12x4xbf16> to vector<12x4xbf16>
    %cst_46 = arith.constant dense<0.000000e+00> : vector<256x4xf32>
    %55 = tpu.matmul %52, %54, %cst_46 {dimension_numbers = #tpu.dot_dimension_numbers<[1], [0], [0], [1], [0, 0, 1, 1], [], []>} : vector<256x12xbf16>, vector<12x4xbf16>, vector<256x4xf32> -> vector<256x4xf32>
    %56 = arith.addf %49, %55 : vector<256x4xf32>
    %c1_47 = arith.constant 1 : index
    %c2_48 = arith.constant 2 : index
    %c0_49 = arith.constant 0 : index
    %57 = vector.load %arg9[%c1_47, %c2_48, %c0_49] : memref<18x18x12xf32, #tpu.memory_space<vmem>>, vector<16x16x12xf32>
    %58 = vector.shape_cast %57 : vector<16x16x12xf32> to vector<256x12xf32>
    %59 = arith.truncf %58 : vector<256x12xf32> to vector<256x12xbf16>
    %c5 = arith.constant 5 : index
    %c0_50 = arith.constant 0 : index
    %c0_51 = arith.constant 0 : index
    %60 = vector.load %arg2[%c5, %c0_50, %c0_51] : memref<9x12x4xbf16, #tpu.memory_space<vmem>>, vector<1x12x4xbf16>
    %61 = vector.shape_cast %60 : vector<1x12x4xbf16> to vector<12x4xbf16>
    %cst_52 = arith.constant dense<0.000000e+00> : vector<256x4xf32>
    %62 = tpu.matmul %59, %61, %cst_52 {dimension_numbers = #tpu.dot_dimension_numbers<[1], [0], [0], [1], [0, 0, 1, 1], [], []>} : vector<256x12xbf16>, vector<12x4xbf16>, vector<256x4xf32> -> vector<256x4xf32>
    %63 = arith.addf %56, %62 : vector<256x4xf32>
    %c2_53 = arith.constant 2 : index
    %c0_54 = arith.constant 0 : index
    %c0_55 = arith.constant 0 : index
    %64 = vector.load %arg9[%c2_53, %c0_54, %c0_55] : memref<18x18x12xf32, #tpu.memory_space<vmem>>, vector<16x16x12xf32>
    %65 = vector.shape_cast %64 : vector<16x16x12xf32> to vector<256x12xf32>
    %66 = arith.truncf %65 : vector<256x12xf32> to vector<256x12xbf16>
    %c6 = arith.constant 6 : index
    %c0_56 = arith.constant 0 : index
    %c0_57 = arith.constant 0 : index
    %67 = vector.load %arg2[%c6, %c0_56, %c0_57] : memref<9x12x4xbf16, #tpu.memory_space<vmem>>, vector<1x12x4xbf16>
    %68 = vector.shape_cast %67 : vector<1x12x4xbf16> to vector<12x4xbf16>
    %cst_58 = arith.constant dense<0.000000e+00> : vector<256x4xf32>
    %69 = tpu.matmul %66, %68, %cst_58 {dimension_numbers = #tpu.dot_dimension_numbers<[1], [0], [0], [1], [0, 0, 1, 1], [], []>} : vector<256x12xbf16>, vector<12x4xbf16>, vector<256x4xf32> -> vector<256x4xf32>
    %70 = arith.addf %63, %69 : vector<256x4xf32>
    %c2_59 = arith.constant 2 : index
    %c1_60 = arith.constant 1 : index
    %c0_61 = arith.constant 0 : index
    %71 = vector.load %arg9[%c2_59, %c1_60, %c0_61] : memref<18x18x12xf32, #tpu.memory_space<vmem>>, vector<16x16x12xf32>
    %72 = vector.shape_cast %71 : vector<16x16x12xf32> to vector<256x12xf32>
    %73 = arith.truncf %72 : vector<256x12xf32> to vector<256x12xbf16>
    %c7 = arith.constant 7 : index
    %c0_62 = arith.constant 0 : index
    %c0_63 = arith.constant 0 : index
    %74 = vector.load %arg2[%c7, %c0_62, %c0_63] : memref<9x12x4xbf16, #tpu.memory_space<vmem>>, vector<1x12x4xbf16>
    %75 = vector.shape_cast %74 : vector<1x12x4xbf16> to vector<12x4xbf16>
    %cst_64 = arith.constant dense<0.000000e+00> : vector<256x4xf32>
    %76 = tpu.matmul %73, %75, %cst_64 {dimension_numbers = #tpu.dot_dimension_numbers<[1], [0], [0], [1], [0, 0, 1, 1], [], []>} : vector<256x12xbf16>, vector<12x4xbf16>, vector<256x4xf32> -> vector<256x4xf32>
    %77 = arith.addf %70, %76 : vector<256x4xf32>
    %c2_65 = arith.constant 2 : index
    %c2_66 = arith.constant 2 : index
    %c0_67 = arith.constant 0 : index
    %78 = vector.load %arg9[%c2_65, %c2_66, %c0_67] : memref<18x18x12xf32, #tpu.memory_space<vmem>>, vector<16x16x12xf32>
    %79 = vector.shape_cast %78 : vector<16x16x12xf32> to vector<256x12xf32>
    %80 = arith.truncf %79 : vector<256x12xf32> to vector<256x12xbf16>
    %c8 = arith.constant 8 : index
    %c0_68 = arith.constant 0 : index
    %c0_69 = arith.constant 0 : index
    %81 = vector.load %arg2[%c8, %c0_68, %c0_69] : memref<9x12x4xbf16, #tpu.memory_space<vmem>>, vector<1x12x4xbf16>
    %82 = vector.shape_cast %81 : vector<1x12x4xbf16> to vector<12x4xbf16>
    %cst_70 = arith.constant dense<0.000000e+00> : vector<256x4xf32>
    %83 = tpu.matmul %80, %82, %cst_70 {dimension_numbers = #tpu.dot_dimension_numbers<[1], [0], [0], [1], [0, 0, 1, 1], [], []>} : vector<256x12xbf16>, vector<12x4xbf16>, vector<256x4xf32> -> vector<256x4xf32>
    %84 = arith.addf %77, %83 : vector<256x4xf32>
    %cst_71 = arith.constant 5.000000e-01 : f32
    %85 = vector.broadcast %cst_71 : f32 to vector<256x4xf32>
    %86 = arith.mulf %85, %84 : vector<256x4xf32>
    %cst_72 = arith.constant 4.471500e-02 : f32
    %87 = vector.broadcast %cst_72 : f32 to vector<256x4xf32>
    %88 = arith.mulf %87, %84 : vector<256x4xf32>
    %89 = arith.mulf %88, %84 : vector<256x4xf32>
    %90 = arith.mulf %89, %84 : vector<256x4xf32>
    %91 = arith.addf %84, %90 : vector<256x4xf32>
    %cst_73 = arith.constant 0.797884583 : f32
    %92 = vector.broadcast %cst_73 : f32 to vector<256x4xf32>
    %93 = arith.mulf %92, %91 : vector<256x4xf32>
    %94 = math.tanh %93 : vector<256x4xf32>
    %cst_74 = arith.constant 1.000000e+00 : f32
    %95 = vector.broadcast %cst_74 : f32 to vector<256x4xf32>
    %96 = arith.addf %95, %94 : vector<256x4xf32>
    %97 = arith.mulf %86, %96 : vector<256x4xf32>
    %98 = vector.shape_cast %97 : vector<256x4xf32> to vector<16x16x4xf32>
    %cst_75 = arith.constant 0.000000e+00 : f32
    %99 = vector.broadcast %cst_75 : f32 to vector<18x18x4xf32>
    %c0_76 = arith.constant 0 : index
    %c0_77 = arith.constant 0 : index
    %c0_78 = arith.constant 0 : index
    %100 = vector.load %arg10[%c0_76, %c0_77, %c0_78] : memref<18x18x4xf32, #tpu.memory_space<vmem>>, vector<18x18x4xf32>
    tpu.vector_store %arg10[%c0_76, %c0_77, %c0_78], %99 {strides = array<i32>} : memref<18x18x4xf32, #tpu.memory_space<vmem>>, vector<18x18x4xf32>,
    %c1_79 = arith.constant 1 : index
    %c1_80 = arith.constant 1 : index
    %c0_81 = arith.constant 0 : index
    %101 = vector.load %arg10[%c1_79, %c1_80, %c0_81] : memref<18x18x4xf32, #tpu.memory_space<vmem>>, vector<16x16x4xf32>
    tpu.vector_store %arg10[%c1_79, %c1_80, %c0_81], %98 {strides = array<i32>} : memref<18x18x4xf32, #tpu.memory_space<vmem>>, vector<16x16x4xf32>,
    %cst_82 = arith.constant 0.000000e+00 : f32
    %102 = vector.broadcast %cst_82 : f32 to vector<256x4xf32>
    %c0_83 = arith.constant 0 : index
    %c0_84 = arith.constant 0 : index
    %103 = vector.load %arg5[%c0_83, %c0_84] : memref<1x4xf32, #tpu.memory_space<vmem>>, vector<1x4xf32>
    %104 = vector.broadcast %103 : vector<1x4xf32> to vector<256x4xf32>
    %105 = arith.addf %102, %104 : vector<256x4xf32>
    %c0_85 = arith.constant 0 : index
    %c0_86 = arith.constant 0 : index
    %c0_87 = arith.constant 0 : index
    %106 = vector.load %arg10[%c0_85, %c0_86, %c0_87] : memref<18x18x4xf32, #tpu.memory_space<vmem>>, vector<16x16x4xf32>
    %107 = vector.shape_cast %106 : vector<16x16x4xf32> to vector<256x4xf32>
    %108 = arith.truncf %107 : vector<256x4xf32> to vector<256x4xbf16>
    %c0_88 = arith.constant 0 : index
    %c0_89 = arith.constant 0 : index
    %c0_90 = arith.constant 0 : index
    %109 = vector.load %arg4[%c0_88, %c0_89, %c0_90] : memref<9x4x4xbf16, #tpu.memory_space<vmem>>, vector<1x4x4xbf16>
    %110 = vector.shape_cast %109 : vector<1x4x4xbf16> to vector<4x4xbf16>
    %cst_91 = arith.constant dense<0.000000e+00> : vector<256x4xf32>
    %111 = tpu.matmul %108, %110, %cst_91 {dimension_numbers = #tpu.dot_dimension_numbers<[1], [0], [0], [1], [0, 0, 1, 1], [], []>} : vector<256x4xbf16>, vector<4x4xbf16>, vector<256x4xf32> -> vector<256x4xf32>
    %112 = arith.addf %105, %111 : vector<256x4xf32>
    %c0_92 = arith.constant 0 : index
    %c1_93 = arith.constant 1 : index
    %c0_94 = arith.constant 0 : index
    %113 = vector.load %arg10[%c0_92, %c1_93, %c0_94] : memref<18x18x4xf32, #tpu.memory_space<vmem>>, vector<16x16x4xf32>
    %114 = vector.shape_cast %113 : vector<16x16x4xf32> to vector<256x4xf32>
    %115 = arith.truncf %114 : vector<256x4xf32> to vector<256x4xbf16>
    %c1_95 = arith.constant 1 : index
    %c0_96 = arith.constant 0 : index
    %c0_97 = arith.constant 0 : index
    %116 = vector.load %arg4[%c1_95, %c0_96, %c0_97] : memref<9x4x4xbf16, #tpu.memory_space<vmem>>, vector<1x4x4xbf16>
    %117 = vector.shape_cast %116 : vector<1x4x4xbf16> to vector<4x4xbf16>
    %cst_98 = arith.constant dense<0.000000e+00> : vector<256x4xf32>
    %118 = tpu.matmul %115, %117, %cst_98 {dimension_numbers = #tpu.dot_dimension_numbers<[1], [0], [0], [1], [0, 0, 1, 1], [], []>} : vector<256x4xbf16>, vector<4x4xbf16>, vector<256x4xf32> -> vector<256x4xf32>
    %119 = arith.addf %112, %118 : vector<256x4xf32>
    %c0_99 = arith.constant 0 : index
    %c2_100 = arith.constant 2 : index
    %c0_101 = arith.constant 0 : index
    %120 = vector.load %arg10[%c0_99, %c2_100, %c0_101] : memref<18x18x4xf32, #tpu.memory_space<vmem>>, vector<16x16x4xf32>
    %121 = vector.shape_cast %120 : vector<16x16x4xf32> to vector<256x4xf32>
    %122 = arith.truncf %121 : vector<256x4xf32> to vector<256x4xbf16>
    %c2_102 = arith.constant 2 : index
    %c0_103 = arith.constant 0 : index
    %c0_104 = arith.constant 0 : index
    %123 = vector.load %arg4[%c2_102, %c0_103, %c0_104] : memref<9x4x4xbf16, #tpu.memory_space<vmem>>, vector<1x4x4xbf16>
    %124 = vector.shape_cast %123 : vector<1x4x4xbf16> to vector<4x4xbf16>
    %cst_105 = arith.constant dense<0.000000e+00> : vector<256x4xf32>
    %125 = tpu.matmul %122, %124, %cst_105 {dimension_numbers = #tpu.dot_dimension_numbers<[1], [0], [0], [1], [0, 0, 1, 1], [], []>} : vector<256x4xbf16>, vector<4x4xbf16>, vector<256x4xf32> -> vector<256x4xf32>
    %126 = arith.addf %119, %125 : vector<256x4xf32>
    %c1_106 = arith.constant 1 : index
    %c0_107 = arith.constant 0 : index
    %c0_108 = arith.constant 0 : index
    %127 = vector.load %arg10[%c1_106, %c0_107, %c0_108] : memref<18x18x4xf32, #tpu.memory_space<vmem>>, vector<16x16x4xf32>
    %128 = vector.shape_cast %127 : vector<16x16x4xf32> to vector<256x4xf32>
    %129 = arith.truncf %128 : vector<256x4xf32> to vector<256x4xbf16>
    %c3_109 = arith.constant 3 : index
    %c0_110 = arith.constant 0 : index
    %c0_111 = arith.constant 0 : index
    %130 = vector.load %arg4[%c3_109, %c0_110, %c0_111] : memref<9x4x4xbf16, #tpu.memory_space<vmem>>, vector<1x4x4xbf16>
    %131 = vector.shape_cast %130 : vector<1x4x4xbf16> to vector<4x4xbf16>
    %cst_112 = arith.constant dense<0.000000e+00> : vector<256x4xf32>
    %132 = tpu.matmul %129, %131, %cst_112 {dimension_numbers = #tpu.dot_dimension_numbers<[1], [0], [0], [1], [0, 0, 1, 1], [], []>} : vector<256x4xbf16>, vector<4x4xbf16>, vector<256x4xf32> -> vector<256x4xf32>
    %133 = arith.addf %126, %132 : vector<256x4xf32>
    %c1_113 = arith.constant 1 : index
    %c1_114 = arith.constant 1 : index
    %c0_115 = arith.constant 0 : index
    %134 = vector.load %arg10[%c1_113, %c1_114, %c0_115] : memref<18x18x4xf32, #tpu.memory_space<vmem>>, vector<16x16x4xf32>
    %135 = vector.shape_cast %134 : vector<16x16x4xf32> to vector<256x4xf32>
    %136 = arith.truncf %135 : vector<256x4xf32> to vector<256x4xbf16>
    %c4_116 = arith.constant 4 : index
    %c0_117 = arith.constant 0 : index
    %c0_118 = arith.constant 0 : index
    %137 = vector.load %arg4[%c4_116, %c0_117, %c0_118] : memref<9x4x4xbf16, #tpu.memory_space<vmem>>, vector<1x4x4xbf16>
    %138 = vector.shape_cast %137 : vector<1x4x4xbf16> to vector<4x4xbf16>
    %cst_119 = arith.constant dense<0.000000e+00> : vector<256x4xf32>
    %139 = tpu.matmul %136, %138, %cst_119 {dimension_numbers = #tpu.dot_dimension_numbers<[1], [0], [0], [1], [0, 0, 1, 1], [], []>} : vector<256x4xbf16>, vector<4x4xbf16>, vector<256x4xf32> -> vector<256x4xf32>
    %140 = arith.addf %133, %139 : vector<256x4xf32>
    %c1_120 = arith.constant 1 : index
    %c2_121 = arith.constant 2 : index
    %c0_122 = arith.constant 0 : index
    %141 = vector.load %arg10[%c1_120, %c2_121, %c0_122] : memref<18x18x4xf32, #tpu.memory_space<vmem>>, vector<16x16x4xf32>
    %142 = vector.shape_cast %141 : vector<16x16x4xf32> to vector<256x4xf32>
    %143 = arith.truncf %142 : vector<256x4xf32> to vector<256x4xbf16>
    %c5_123 = arith.constant 5 : index
    %c0_124 = arith.constant 0 : index
    %c0_125 = arith.constant 0 : index
    %144 = vector.load %arg4[%c5_123, %c0_124, %c0_125] : memref<9x4x4xbf16, #tpu.memory_space<vmem>>, vector<1x4x4xbf16>
    %145 = vector.shape_cast %144 : vector<1x4x4xbf16> to vector<4x4xbf16>
    %cst_126 = arith.constant dense<0.000000e+00> : vector<256x4xf32>
    %146 = tpu.matmul %143, %145, %cst_126 {dimension_numbers = #tpu.dot_dimension_numbers<[1], [0], [0], [1], [0, 0, 1, 1], [], []>} : vector<256x4xbf16>, vector<4x4xbf16>, vector<256x4xf32> -> vector<256x4xf32>
    %147 = arith.addf %140, %146 : vector<256x4xf32>
    %c2_127 = arith.constant 2 : index
    %c0_128 = arith.constant 0 : index
    %c0_129 = arith.constant 0 : index
    %148 = vector.load %arg10[%c2_127, %c0_128, %c0_129] : memref<18x18x4xf32, #tpu.memory_space<vmem>>, vector<16x16x4xf32>
    %149 = vector.shape_cast %148 : vector<16x16x4xf32> to vector<256x4xf32>
    %150 = arith.truncf %149 : vector<256x4xf32> to vector<256x4xbf16>
    %c6_130 = arith.constant 6 : index
    %c0_131 = arith.constant 0 : index
    %c0_132 = arith.constant 0 : index
    %151 = vector.load %arg4[%c6_130, %c0_131, %c0_132] : memref<9x4x4xbf16, #tpu.memory_space<vmem>>, vector<1x4x4xbf16>
    %152 = vector.shape_cast %151 : vector<1x4x4xbf16> to vector<4x4xbf16>
    %cst_133 = arith.constant dense<0.000000e+00> : vector<256x4xf32>
    %153 = tpu.matmul %150, %152, %cst_133 {dimension_numbers = #tpu.dot_dimension_numbers<[1], [0], [0], [1], [0, 0, 1, 1], [], []>} : vector<256x4xbf16>, vector<4x4xbf16>, vector<256x4xf32> -> vector<256x4xf32>
    %154 = arith.addf %147, %153 : vector<256x4xf32>
    %c2_134 = arith.constant 2 : index
    %c1_135 = arith.constant 1 : index
    %c0_136 = arith.constant 0 : index
    %155 = vector.load %arg10[%c2_134, %c1_135, %c0_136] : memref<18x18x4xf32, #tpu.memory_space<vmem>>, vector<16x16x4xf32>
    %156 = vector.shape_cast %155 : vector<16x16x4xf32> to vector<256x4xf32>
    %157 = arith.truncf %156 : vector<256x4xf32> to vector<256x4xbf16>
    %c7_137 = arith.constant 7 : index
    %c0_138 = arith.constant 0 : index
    %c0_139 = arith.constant 0 : index
    %158 = vector.load %arg4[%c7_137, %c0_138, %c0_139] : memref<9x4x4xbf16, #tpu.memory_space<vmem>>, vector<1x4x4xbf16>
    %159 = vector.shape_cast %158 : vector<1x4x4xbf16> to vector<4x4xbf16>
    %cst_140 = arith.constant dense<0.000000e+00> : vector<256x4xf32>
    %160 = tpu.matmul %157, %159, %cst_140 {dimension_numbers = #tpu.dot_dimension_numbers<[1], [0], [0], [1], [0, 0, 1, 1], [], []>} : vector<256x4xbf16>, vector<4x4xbf16>, vector<256x4xf32> -> vector<256x4xf32>
    %161 = arith.addf %154, %160 : vector<256x4xf32>
    %c2_141 = arith.constant 2 : index
    %c2_142 = arith.constant 2 : index
    %c0_143 = arith.constant 0 : index
    %162 = vector.load %arg10[%c2_141, %c2_142, %c0_143] : memref<18x18x4xf32, #tpu.memory_space<vmem>>, vector<16x16x4xf32>
    %163 = vector.shape_cast %162 : vector<16x16x4xf32> to vector<256x4xf32>
    %164 = arith.truncf %163 : vector<256x4xf32> to vector<256x4xbf16>
    %c8_144 = arith.constant 8 : index
    %c0_145 = arith.constant 0 : index
    %c0_146 = arith.constant 0 : index
    %165 = vector.load %arg4[%c8_144, %c0_145, %c0_146] : memref<9x4x4xbf16, #tpu.memory_space<vmem>>, vector<1x4x4xbf16>
    %166 = vector.shape_cast %165 : vector<1x4x4xbf16> to vector<4x4xbf16>
    %cst_147 = arith.constant dense<0.000000e+00> : vector<256x4xf32>
    %167 = tpu.matmul %164, %166, %cst_147 {dimension_numbers = #tpu.dot_dimension_numbers<[1], [0], [0], [1], [0, 0, 1, 1], [], []>} : vector<256x4xbf16>, vector<4x4xbf16>, vector<256x4xf32> -> vector<256x4xf32>
    %168 = arith.addf %161, %167 : vector<256x4xf32>
    %169 = vector.shape_cast %1 : vector<16x16x12xf32> to vector<256x12xf32>
    %170 = arith.truncf %169 : vector<256x12xf32> to vector<256x12xbf16>
    %c0_148 = arith.constant 0 : index
    %c0_149 = arith.constant 0 : index
    %171 = vector.load %arg6[%c0_148, %c0_149] : memref<12x4xbf16, #tpu.memory_space<vmem>>, vector<12x4xbf16>
    %cst_150 = arith.constant dense<0.000000e+00> : vector<256x4xf32>
    %172 = tpu.matmul %170, %171, %cst_150 {dimension_numbers = #tpu.dot_dimension_numbers<[1], [0], [0], [1], [0, 0, 1, 1], [], []>} : vector<256x12xbf16>, vector<12x4xbf16>, vector<256x4xf32> -> vector<256x4xf32>
    %c0_151 = arith.constant 0 : index
    %c0_152 = arith.constant 0 : index
    %173 = vector.load %arg7[%c0_151, %c0_152] : memref<1x4xf32, #tpu.memory_space<vmem>>, vector<1x4xf32>
    %174 = vector.broadcast %173 : vector<1x4xf32> to vector<256x4xf32>
    %175 = arith.addf %172, %174 : vector<256x4xf32>
    %176 = arith.addf %168, %175 : vector<256x4xf32>
    %177 = tpu.iota {dimensions = array<i32: 0>} : vector<4x4xi32>
    %178 = tpu.iota {dimensions = array<i32: 1>} : vector<4x4xi32>
    %179 = arith.cmpi eq, %177, %178 : vector<4x4xi32>
    %180 = arith.extui %179 : vector<4x4xi1> to vector<4x4xi32>
    %181 = arith.sitofp %180 : vector<4x4xi32> to vector<4x4xf32>
    "tpu.trace_start"() <{level = 10 : i32, message = "ck,hk->ch"}> : () -> ()
    %cst_153 = arith.constant dense<0.000000e+00> : vector<4x256xf32>
    %182 = tpu.matmul %181, %176, %cst_153 {dimension_numbers = #tpu.dot_dimension_numbers<[1], [1], [0], [0], [0, 0, 1, 0], [], []>} : vector<4x4xf32>, vector<256x4xf32>, vector<4x256xf32> -> vector<4x256xf32>
    "tpu.trace_stop"() : () -> ()
    %c0_154 = arith.constant 0 : index
    %c0_155 = arith.constant 0 : index
    %c0_156 = arith.constant 0 : index
    %183 = vector.load %arg8[%c0_154, %c0_155, %c0_156] : memref<1x4x256xf32, #tpu.memory_space<vmem>>, vector<1x4x256xf32>
    %184 = vector.shape_cast %183 : vector<1x4x256xf32> to vector<4x256xf32>
    %185 = vector.shape_cast %182 : vector<4x256xf32> to vector<1x4x256xf32>
    tpu.vector_store %arg8[%c0_154, %c0_155, %c0_156], %185 {strides = array<i32>} : memref<1x4x256xf32, #tpu.memory_space<vmem>>, vector<1x4x256xf32>,
    return
  }
  func.func @transform_0(%arg0: i32) -> (i32, i32, i32, i32) {
    %c0_i32 = arith.constant 0 : i32
    %c0_i32_0 = arith.constant 0 : i32
    %c0_i32_1 = arith.constant 0 : i32
    %c0_i32_2 = arith.constant 0 : i32
    return %arg0, %c0_i32, %c0_i32_0, %c0_i32_1 : i32, i32, i32, i32
  }
  func.func @transform_1(%arg0: i32) -> (i32, i32, i32) {
    %c0_i32 = arith.constant 0 : i32
    %c0_i32_0 = arith.constant 0 : i32
    %c0_i32_1 = arith.constant 0 : i32
    %c0_i32_2 = arith.constant 0 : i32
    return %c0_i32, %c0_i32_0, %c0_i32_1 : i32, i32, i32
  }
  func.func @transform_2(%arg0: i32) -> (i32, i32) {
    %c0_i32 = arith.constant 0 : i32
    %c0_i32_0 = arith.constant 0 : i32
    %c0_i32_1 = arith.constant 0 : i32
    return %c0_i32, %c0_i32_0 : i32, i32
  }
  func.func @transform_3(%arg0: i32) -> (i32, i32, i32) {
    %c0_i32 = arith.constant 0 : i32
    %c0_i32_0 = arith.constant 0 : i32
    %c0_i32_1 = arith.constant 0 : i32
    %c0_i32_2 = arith.constant 0 : i32
    return %c0_i32, %c0_i32_0, %c0_i32_1 : i32, i32, i32
  }
  func.func @transform_4(%arg0: i32) -> (i32, i32) {
    %c0_i32 = arith.constant 0 : i32
    %c0_i32_0 = arith.constant 0 : i32
    %c0_i32_1 = arith.constant 0 : i32
    return %c0_i32, %c0_i32_0 : i32, i32
  }
  func.func @transform_5(%arg0: i32) -> (i32, i32) {
    %c0_i32 = arith.constant 0 : i32
    %c0_i32_0 = arith.constant 0 : i32
    %c0_i32_1 = arith.constant 0 : i32
    return %c0_i32, %c0_i32_0 : i32, i32
  }
  func.func @transform_6(%arg0: i32) -> (i32, i32) {
    %c0_i32 = arith.constant 0 : i32
    %c0_i32_0 = arith.constant 0 : i32
    %c0_i32_1 = arith.constant 0 : i32
    return %c0_i32, %c0_i32_0 : i32, i32
  }
  func.func @transform_7(%arg0: i32) -> (i32, i32, i32) {
    %c0_i32 = arith.constant 0 : i32
    %c0_i32_0 = arith.constant 0 : i32
    %c0_i32_1 = arith.constant 0 : i32
    return %arg0, %c0_i32, %c0_i32_0 : i32, i32, i32
  }
}

</mosaic_0001>

<bundles_post_ra>
// kernel: tpu_custom_call.1
= control target key start
LH: loop header
LB: loop body
LE: loop exit
PB: predicated region body
PF: predicated region fallthrough
CT: control target
= control target key end

     0   :  { %6 = vsyncpa [#allocation3], 0  ;;  %s157_s0 = inlined_call_operand.hbm [shape: f32[8,128], index: 0, kind: input, shape index: {}]   ;;  %s158_s1 = inlined_call_operand.hbm [shape: f32[8,128], index: 1, kind: output, shape index: {}]  }
   0x1   :  { %7 = vsyncpa [#allocation4], 0  ;;  %s13_s8 = sshll.u32 %s157_s0, 4  ;;  %s139_s9 = smov [#allocation2]   ;;  %s14_s8 = int_to_ptr.hbm [resolvable:$true] %s13_s8 }
   0x2   :  { %s15_s10 = sshll.u32 %s139_s9, 4  ;;  %s16_s10 = int_to_ptr.vmem [resolvable:$true] %s15_s10 }
   0x3   :  { %18 = dma.hbm_to_vmem [thread:$0]  %s14_s8, 128, %s16_s10, [#allocation3]  }
   0x4   :  { %135 = dma.done.wait [#allocation3], 128  }
   0x5   :  { %136 = vsyncadd [#allocation3], 4294967168  ;;  %v23_v0 = vld [vmem:[#allocation2] sm:$0xff]  ;;  %s140_s0 = smov [#allocation5]   ;;  %s72_s14 = sshll.u32 %s158_s1, 4  ;;  %s73_s14 = int_to_ptr.hbm [resolvable:$true] %s72_s14 }
   0x6   :  { %v24_v1 = vmul.f32 %v23_v0, %v23_v0  ;;  %s70_s11 = sshll.u32 %s140_s0, 4  ;;  %s71_s11 = int_to_ptr.vmem [resolvable:$true] %s70_s11 }
   0x8   :  { %v25_v2 = vmin.f32 %v24_v1, 16.0 }
   0xa   :  { %v26_v3 = vmul.f32 2.1237322e-06, %v25_v2  ;;  %v37_v4 = vmul.f32 3.8918573e-05, %v25_v2 }
   0xc   :  { %v27_v5 = vadd.f32 0.00028619796, %v26_v3  ;;  %v38_v6 = vadd.f32 0.001143296, %v37_v4 }
   0xe   :  { %v28_v7 = vmul.f32 %v27_v5, %v25_v2  ;;  %v39_v8 = vmul.f32 %v38_v6, %v25_v2 }
  0x10   :  { %v29_v9 = vadd.f32 0.0036580483, %v28_v7  ;;  %v40_v10 = vadd.f32 0.014752088, %v39_v8 }
  0x12   :  { %v30_v11 = vmul.f32 %v29_v9, %v25_v2  ;;  %v41_v12 = vmul.f32 %v40_v10, %v25_v2 }
  0x14   :  { %v42_v13 = vadd.f32 0.112945676, %v41_v12  ;;  %v31_v14 = vadd.f32 0.05243302, %v30_v11 }
  0x16   :  { %v43_v15 = vmul.f32 %v42_v13, %v25_v2  ;;  %v32_v17 = vmul.f32 %v31_v14, %v25_v2 }
  0x18   :  { %v44_v16 = vadd.f32 0.4994258, %v43_v15  ;;  %v33_v20 = vadd.f32 0.18741608, %v32_v17 }
  0x1a   :  { %v45_v18 = vmul.f32 %v44_v16, %v25_v2  ;;  %v34_v21 = vmul.f32 %v33_v20, %v25_v2 }
  0x1c   :  { %v46_v19 = vadd.f32 1.0, %v45_v18  ;;  %v35_v24 = vadd.f32 1.1283791, %v34_v21 }
  0x1e   :  { %85 = vrcp.f32 %v46_v19  ;;  %v58_v25 = vand.u32 2147483648, %v46_v19  ;;  %vm52_vm0 = vweird.f32 %v46_v19  ;;  %v56_v27 = vand.u32 2147483647, %v46_v19 }
  0x1f   :  { %v36_v30 = vmul.f32 %v35_v24, %v23_v0 }
  0x20   :  { %v59_v29 = vor.u32 1.1754944e-38, %v58_v25  ;;  %vm57_vm3 = vcmp.eq.f32.partialorder %v56_v27, 8.507059e+37 }
  0x24   :  { %v86_v22 = vpop.eup %85 }
  0x25   :  { %v48_v23 = vmul.f32 %v86_v22, %v46_v19  ;;  %vm53_vm1 = vweird.f32 %v86_v22 }
  0x26   :  { %vm54_vm2 = vmor %vm52_vm0, %vm53_vm1 }
  0x27   :  { %v49_v26 = vsub.f32 1.0, %v48_v23 }
  0x29   :  { %v50_v28 = vmul.f32 %v86_v22, %v49_v26 }
  0x2b   :  { %v51_v31 = vadd.f32 %v86_v22, %v50_v28 }
  0x2d   :  { %v55_v32 = vsel %vm54_vm2, %v86_v22, %v51_v31 }
  0x2e   :  { %v60_v33 = vsel %vm57_vm3, %v59_v29, %v55_v32 }
  0x2f   :  { %v61_v34 = vmul.f32 %v60_v33, %v36_v30 }
  0x31   :  { %v82_v35 = vclamps-f32 %v61_v34, 1.0 }
  0x33   :  { %64 = vst [vmem:[#allocation5] sm:$0xff] %v82_v35 }
  0x34   :  { %75 = dma.vmem_to_hbm [thread:$0]  %s71_s11, 128, %s73_s14, [#allocation4]  }
  0x35   :  { %137 = dma.done.wait [#allocation4], 128  }
  0x36   :  { %138 = vsyncadd [#allocation4], 4294967168 }
  0x37   :  { %80 = vsyncpa [#allocation3], 1 }
  0x38   :  { %81 = vsyncpa [#allocation4], 1 }

// kernel: _upblock_forward_jit.1
= control target key start
LH: loop header
LB: loop body
LE: loop exit
PB: predicated region body
PF: predicated region fallthrough
CT: control target
= control target key end

     0   :  { %s6187_s24 = smov 0   ;;  %s8539_s0 = inlined_call_operand.vmem [shape: f32[2,16,16,12], index: 0, kind: input, shape index: {}]   ;;  %s8540_s1 = inlined_call_operand.vmem [shape: bf16[9,12,4], index: 1, kind: input, shape index: {}]   ;;  %s8541_s2 = inlined_call_operand.vmem [shape: f32[1,4], index: 2, kind: input, shape index: {}]   ;;  %s8542_s3 = inlined_call_operand.vmem [shape: bf16[9,4,4], index: 3, kind: input, shape index: {}]   ;;  %s8543_s4 = inlined_call_operand.vmem [shape: f32[1,4], index: 4, kind: input, shape index: {}]   ;;  %s8544_s5 = inlined_call_operand.vmem [shape: bf16[12,4], index: 5, kind: input, shape index: {}]   ;;  %s8545_s6 = inlined_call_operand.vmem [shape: f32[1,4], index: 6, kind: input, shape index: {}]   ;;  %s8546_s7 = inlined_call_operand.vmem [shape: f32[2,4,256], index: 7, kind: output, shape index: {}]  }
   0x1 LB: > { %s5535_s25 = sadd.s32 4294967295, %s6144_s24   ;;  %p5539_p0 = scmp.ge.s32.totalorder %s6144_s24, 1  ;;  %s6144_s24 = sphi %s6187_s24, %s17_s24  }
   0x2   : > { %p237_p1 = scmp.lt.s32.totalorder %s6144_s24, 3 }
   0x4   : > { %p238_p2 = pnand %p5539_p0, %p237_p1 }
   0x6   : > { %241 = sbr.rel (%p238_p2) target bundleno = 1790 (0x6fe), region = 48 }
   0xb   : > { %vm797_vm0 = vcmask 1045504   ;;  %v5590_v0 = vld [vmem:[%s8540_s1 + $0x10] sm:$0xf]  ;;  %v5953_v1 = vld [vmem:[%s8540_s1 + $0x10] sm:$0x30]  ;;  %vm600_vm1 = vcmask 97280  }
   0xc   : > { %v5591_v2 = vor.u32 %v5953_v1, %v5590_v0  ;;  %v5546_v3 = vld [vmem:[%s8540_s1] sm:$0xf]  ;;  %v5951_v4 = vld [vmem:[%s8540_s1] sm:$0x30]  ;;  %vm603_vm2 = vcmask 91136   ;;  %v8547_v6 = vmov 0.0  }
   0xd   : > { %v5547_v5 = vor.u32 %v5951_v4, %v5546_v3  ;;  %601 = vst.msk [vmem:[#allocation2] sm:$0xff] %vm600_vm1, %v8547_v6  ;;  %v5568_v7 = vld [vmem:[%s8540_s1 + $0x8] sm:$0xf]  ;;  %v5952_v8 = vld [vmem:[%s8540_s1 + $0x8] sm:$0x30]  ;;  %p269_p3 = scmp.lt.s32.totalorder %s5535_s25, 1 }
   0xe   : > { %v6216_v9 = vsel %vm797_vm0, %v5591_v2, 0  ;;  %602 = vst.msk [vmem:[#allocation2 + $0x8] sm:$0xff] %vm600_vm1, %v8547_v6  ;;  %v5569_v10 = vor.u32 %v5952_v8, %v5568_v7  ;;  %vm3226_vm3 = vcmask 1041408   ;;  %vm3035_vm4 = vcmask 31744  }
   0xf   : > { %1264 = vmatpush.bf16.msra.mxu2 %v6216_v9  ;;  %v799_v11 = vsel %vm797_vm0, %v5547_v5, 0  ;;  %604 = vst.msk [vmem:[#allocation2 + $0x10] sm:$0x3] %vm603_vm2, %v8547_v6  ;;  %s8665_s25 = smov (!%p269_p3, %s5535_s25), 1  ;;  %vm3038_vm5 = vcmask 25600   ;;  %vm5476_vm7 = vcmask 1043456  }
  0x10   : > { %808 = vmatpush.bf16.msra.mxu0 %v799_v11  ;;  %605 = vst.msk [vmem:[#allocation2 + $0x18] sm:$0xff] %vm600_vm1, %v8547_v6  ;;  %v1027_v12 = vsel %vm797_vm0, %v5569_v10, 0  ;;  %5961 = vmatpush.bf16.msra.mxu3 %v799_v11  ;;  %s5949_s15 = sshll.u32 %s8665_s25, 8 }
  0x11   : > { %606 = vst.msk [vmem:[#allocation2 + $0x20] sm:$0xff] %vm600_vm1, %v8547_v6  ;;  %1036 = vmatpush.bf16.msra.mxu1 %v1027_v12  ;;  %s6247_s18 = scalar_lea.vmem %s8539_s0, %s5949_s15 }
  0x12   : > { %607 = vst.msk [vmem:[#allocation2 + $0x28] sm:$0x3] %vm603_vm2, %v8547_v6  ;;  %v6259_v22 = vld [vmem:[%s6247_s18] sm:$0xff]  ;;  %v6264_v23 = vld [vmem:[%s6247_s18 + $0x8] sm:$0xff]  ;;  %v6269_v24 = vld [vmem:[%s6247_s18 + $0xd0] sm:$0xff] }
  0x13   : > { %608 = vst.msk [vmem:[#allocation2 + $0x30] sm:$0xff] %vm600_vm1, %v8547_v6  ;;  %v6272_v25 = vld [vmem:[%s6247_s18 + $0xd8] sm:$0xff]  ;;  %v344_v26 = vmul.f32 0.044715, %v6259_v22  ;;  %v345_v27 = vmul.f32 0.044715, %v6264_v23 }
  0x14   : > { %5962 = vmatpush.bf16.msrb.mxu3 %v1027_v12  ;;  %609 = vst.msk [vmem:[#allocation2 + $0x38] sm:$0xff] %vm600_vm1, %v8547_v6  ;;  %v694_v13 = vld [vmem:[#allocation2] sm:$0xff]  ;;  %v370_v28 = vmul.f32 0.044715, %v6269_v24  ;;  %v371_v29 = vmul.f32 0.044715, %v6272_v25 }
  0x15   : > { %v1150_v14 = vld [vmem:[#allocation2 + $0x2] sm:$0xff]  ;;  %610 = vst.msk [vmem:[#allocation2 + $0x40] sm:$0x3] %vm603_vm2, %v8547_v6  ;;  %v6287_v30 = vld [vmem:[%s6247_s18 + $0x10] sm:$0xff]  ;;  %v376_v31 = vmul.f32 %v344_v26, %v6259_v22  ;;  %v6293_v32 = vld [vmem:[%s6247_s18 + $0x18] sm:$0xff]  ;;  %v377_v35 = vmul.f32 %v345_v27, %v6264_v23 }
  0x16   : > { %v695_v15 = vld [vmem:[#allocation2 + $0x8] sm:$0xff]  ;;  %611 = vst.msk [vmem:[#allocation2 + $0x48] sm:$0xff] %vm600_vm1, %v8547_v6  ;;  %v346_v33 = vmul.f32 0.044715, %v6287_v30  ;;  %v6297_v34 = vld [vmem:[%s6247_s18 + $0xe0] sm:$0xff]  ;;  %v402_v37 = vmul.f32 %v370_v28, %v6269_v24  ;;  %v403_v38 = vmul.f32 %v371_v29, %v6272_v25  ;;  %v312_v29 = vmul.f32 0.5, %v6259_v22 }
  0x17   : > { %v922_v16 = vld [vmem:[#allocation2 + $0x1] sm:$0xff]  ;;  %v1151_v17 = vld [vmem:[#allocation2 + $0xa] sm:$0xff]  ;;  %v726_v18 = vpack.c.bf16 %v695_v15, %v694_v13  ;;  %612 = vst.msk [vmem:[#allocation2 + $0x50] sm:$0xff] %vm600_vm1, %v8547_v6  ;;  %v347_v39 = vmul.f32 0.044715, %v6293_v32  ;;  %v408_v42 = vmul.f32 %v376_v31, %v6259_v22  ;;  %v409_v44 = vmul.f32 %v377_v35, %v6264_v23 }
  0x18   : > { %v923_v19 = vld [vmem:[#allocation2 + $0x9] sm:$0xff]  ;;  %v1182_v20 = vpack.c.bf16 %v1151_v17, %v1150_v14  ;;  %613 = vst.msk [vmem:[#allocation2 + $0x58] sm:$0x3] %vm603_vm2, %v8547_v6  ;;  %v378_v40 = vmul.f32 %v346_v33, %v6287_v30  ;;  %v372_v41 = vmul.f32 0.044715, %v6297_v34  ;;  %v434_v45 = vmul.f32 %v402_v37, %v6269_v24  ;;  %v6358_v2 = vld [vmem:[%s6247_s18 + $0x20] sm:$0xff] }
  0x19   : > { %v954_v21 = vpack.c.bf16 %v923_v19, %v922_v16  ;;  %5548 = vmatmul.msk.bf16.vlgmr.msra.gmra.mxu0 %vm600_vm1, %v726_v18  ;;  %614 = vst.msk [vmem:[#allocation2 + $0x60] sm:$0xff] %vm600_vm1, %v8547_v6  ;;  %v6303_v36 = vld [vmem:[%s6247_s18 + $0xe8] sm:$0xff]  ;;  %v435_v46 = vmul.f32 %v403_v38, %v6272_v25  ;;  %v379_v47 = vmul.f32 %v347_v39, %v6293_v32  ;;  %v348_v5 = vmul.f32 0.044715, %v6358_v2 }
  0x1a   : > { %5592 = vmatmul.msk.bf16.vlgmr.msra.gmra.mxu2 %vm600_vm1, %v1182_v20  ;;  %615 = vst.msk [vmem:[#allocation2 + $0x68] sm:$0xff] %vm600_vm1, %v8547_v6  ;;  %v373_v43 = vmul.f32 0.044715, %v6303_v36  ;;  %v410_v48 = vmul.f32 %v378_v40, %v6287_v30  ;;  %v404_v49 = vmul.f32 %v372_v41, %v6297_v34  ;;  %v440_v50 = vadd.f32 %v408_v42, %v6259_v22  ;;  %v6361_v3 = vld [vmem:[%s6247_s18 + $0x28] sm:$0xff] }
  0x1b   : > { %5570 = vmatmul.msk.bf16.vlgmr.msra.gmra.mxu1 %vm600_vm1, %v954_v21  ;;  %616 = vst.msk [vmem:[#allocation2 + $0x70] sm:$0x3] %vm603_vm2, %v8547_v6  ;;  %v441_v52 = vadd.f32 %v409_v44, %v6264_v23  ;;  %v466_v53 = vadd.f32 %v434_v45, %v6269_v24  ;;  %v467_v54 = vadd.f32 %v435_v46, %v6272_v25  ;;  %v349_v7 = vmul.f32 0.044715, %v6361_v3 }
  0x1c   : > { %617 = vst.msk [vmem:[#allocation2 + $0x78] sm:$0xff] %vm600_vm1, %v8547_v6  ;;  %v405_v51 = vmul.f32 %v373_v43, %v6303_v36  ;;  %v411_v55 = vmul.f32 %v379_v47, %v6293_v32  ;;  %v442_v56 = vadd.f32 %v410_v48, %v6287_v30  ;;  %v436_v57 = vmul.f32 %v404_v49, %v6297_v34  ;;  %v286_v48 = vld [vmem:[%s6247_s18 + $0x30] sm:$0xff] }
  0x1d   : > { %618 = vst.msk [vmem:[#allocation2 + $0x80] sm:$0xff] %vm600_vm1, %v8547_v6  ;;  %v472_v58 = vmul.f32 0.7978846, %v440_v50  ;;  %v473_v60 = vmul.f32 0.7978846, %v441_v52  ;;  %v380_v10 = vmul.f32 %v348_v5, %v6358_v2  ;;  %v381_v11 = vmul.f32 %v349_v7, %v6361_v3 }
  0x1e   : > { %619 = vst.msk [vmem:[#allocation2 + $0x88] sm:$0x3] %vm603_vm2, %v8547_v6  ;;  %v437_v59 = vmul.f32 %v405_v51, %v6303_v36  ;;  %v498_v61 = vmul.f32 0.7978846, %v466_v53  ;;  %v499_v62 = vmul.f32 0.7978846, %v467_v54  ;;  %v443_v63 = vadd.f32 %v411_v55, %v6293_v32 }
  0x1f   : > { %620 = vst.msk [vmem:[#allocation2 + $0x90] sm:$0xff] %vm600_vm1, %v8547_v6  ;;  %v474_v0 = vmul.f32 0.7978846, %v442_v56  ;;  %v468_v1 = vadd.f32 %v436_v57, %v6297_v34  ;;  %5976 = vtanh.f32 %v472_v58  ;;  %v412_v14 = vmul.f32 %v380_v10, %v6358_v2 }
  0x20   : > { %621 = vst.msk [vmem:[#allocation2 + $0x98] sm:$0xff] %vm600_vm1, %v8547_v6  ;;  %v469_v4 = vadd.f32 %v437_v59, %v6303_v36  ;;  %5978 = vtanh.f32 %v473_v60  ;;  %v475_v8 = vmul.f32 0.7978846, %v443_v63  ;;  %v413_v15 = vmul.f32 %v381_v11, %v6361_v3 }
  0x21   : > { %622 = vst.msk [vmem:[#allocation2 + $0xa0] sm:$0x3] %vm603_vm2, %v8547_v6  ;;  %5980 = vtanh.f32 %v498_v61  ;;  %v500_v12 = vmul.f32 0.7978846, %v468_v1  ;;  %v444_v17 = vadd.f32 %v412_v14, %v6358_v2  ;;  %v313_v33 = vmul.f32 0.5, %v6264_v23 }
  0x22   : > { %623 = vst.msk [vmem:[#allocation2 + $0xa8] sm:$0xff] %vm600_vm1, %v8547_v6  ;;  %5982 = vtanh.f32 %v499_v62  ;;  %v501_v13 = vmul.f32 0.7978846, %v469_v4  ;;  %v445_v18 = vadd.f32 %v413_v15, %v6361_v3  ;;  %v338_v38 = vmul.f32 0.5, %v6269_v24 }
  0x23   : > { %624 = vst.msk [vmem:[#allocation2 + $0xb0] sm:$0xff] %vm600_vm1, %v8547_v6  ;;  %5984 = vtanh.f32 %v474_v0  ;;  %v476_v21 = vmul.f32 0.7978846, %v444_v17  ;;  %v339_v22 = vmul.f32 0.5, %v6272_v25  ;;  %v314_v23 = vmul.f32 0.5, %v6287_v30  ;;  %v287_v25 = vld [vmem:[%s6247_s18 + $0x38] sm:$0xff] }
  0x24   : > { %625 = vst.msk [vmem:[#allocation2 + $0xb8] sm:$0x3] %vm603_vm2, %v8547_v6  ;;  %5986 = vtanh.f32 %v475_v8  ;;  %v477_v26 = vmul.f32 0.7978846, %v445_v18  ;;  %v315_v45 = vmul.f32 0.5, %v6293_v32  ;;  %v340_v47 = vmul.f32 0.5, %v6297_v34 }
  0x25   : > { %626 = vst.msk [vmem:[#allocation2 + $0xc0] sm:$0xff] %vm600_vm1, %v8547_v6  ;;  %v5977_v16 = vpop.eup %5976  ;;  %5988 = vtanh.f32 %v500_v12  ;;  %v350_v51 = vmul.f32 0.044715, %v286_v48  ;;  %v351_v52 = vmul.f32 0.044715, %v287_v25  ;;  %v341_v32 = vmul.f32 0.5, %v6303_v36 }
  0x26   : > { %627 = vst.msk [vmem:[#allocation2 + $0xc8] sm:$0xff] %vm600_vm1, %v8547_v6  ;;  %v5979_v19 = vpop.eup %5978  ;;  %5990 = vtanh.f32 %v501_v13  ;;  %v536_v31 = vadd.f32 1.0, %v5977_v16  ;;  %v316_v34 = vmul.f32 0.5, %v6358_v2  ;;  %v317_v61 = vmul.f32 0.5, %v6361_v3 }
  0x27   : > { %628 = vst.msk [vmem:[#allocation2 + $0xd0] sm:$0x3] %vm603_vm2, %v8547_v6  ;;  %v5981_v20 = vpop.eup %5980  ;;  %5992 = vtanh.f32 %v476_v21  ;;  %v537_v35 = vadd.f32 1.0, %v5979_v19  ;;  %v382_v58 = vmul.f32 %v350_v51, %v286_v48  ;;  %v383_v59 = vmul.f32 %v351_v52, %v287_v25 }
  0x28   : > { %629 = vst.msk [vmem:[#allocation2 + $0xd8] sm:$0xff] %vm600_vm1, %v8547_v6  ;;  %v5983_v27 = vpop.eup %5982  ;;  %5994 = vtanh.f32 %v477_v26  ;;  %v562_v39 = vadd.f32 1.0, %v5981_v20  ;;  %v568_v44 = vmul.f32 %v536_v31, %v312_v29  ;;  %v318_v26 = vmul.f32 0.5, %v286_v48  ;;  %v289_v31 = vld [vmem:[%s6247_s18 + $0x48] sm:$0xff] }
  0x29   : > { %630 = vst.msk [vmem:[#allocation2 + $0xe0] sm:$0xff] %vm600_vm1, %v8547_v6  ;;  %v5985_v28 = vpop.eup %5984  ;;  %v563_v41 = vadd.f32 1.0, %v5983_v27  ;;  %v569_v24 = vmul.f32 %v537_v35, %v313_v33  ;;  %v414_v0 = vmul.f32 %v382_v58, %v286_v48  ;;  %v415_v1 = vmul.f32 %v383_v59, %v287_v25  ;;  %v288_v27 = vld [vmem:[%s6247_s18 + $0x40] sm:$0xff] }
  0x2a   : > { %631 = vst.msk [vmem:[#allocation2 + $0xe8] sm:$0x3] %vm603_vm2, %v8547_v6  ;;  %v5987_v37 = vpop.eup %5986  ;;  %v538_v42 = vadd.f32 1.0, %v5985_v28  ;;  %v594_v30 = vmul.f32 %v562_v39, %v338_v38  ;;  %v319_v29 = vmul.f32 0.5, %v287_v25  ;;  %v352_v33 = vmul.f32 0.044715, %v288_v27 }
  0x2b   : > { %632 = vst.msk [vmem:[#allocation2 + $0xf0] sm:$0xff] %vm600_vm1, %v8547_v6  ;;  %v5989_v40 = vpop.eup %5988  ;;  %v539_v46 = vadd.f32 1.0, %v5987_v37  ;;  %v595_v54 = vmul.f32 %v563_v41, %v339_v22  ;;  %v446_v4 = vadd.f32 %v414_v0, %v286_v48  ;;  %v447_v5 = vadd.f32 %v415_v1, %v287_v25 }
  0x2c   : > { %633 = vst.msk [vmem:[#allocation2 + $0xf8] sm:$0xff] %vm600_vm1, %v8547_v6  ;;  %v5991_v43 = vpop.eup %5990  ;;  %v564_v50 = vadd.f32 1.0, %v5989_v40  ;;  %v570_v55 = vmul.f32 %v538_v42, %v314_v23  ;;  %v353_v38 = vmul.f32 0.044715, %v289_v31  ;;  %v384_v40 = vmul.f32 %v352_v33, %v288_v27 }
  0x2d   : > { %634 = vst.msk [vmem:[#allocation2 + $0x100] sm:$0x3] %vm603_vm2, %v8547_v6  ;;  %v5993_v49 = vpop.eup %5992  ;;  %v565_v56 = vadd.f32 1.0, %v5991_v43  ;;  %v571_v60 = vmul.f32 %v539_v46, %v315_v45  ;;  %v478_v3 = vmul.f32 0.7978846, %v446_v4  ;;  %v321_v59 = vmul.f32 0.5, %v289_v31 }
  0x2e   : > { %635 = vst.msk [vmem:[#allocation2 + $0x108] sm:$0xff] %vm600_vm1, %v8547_v6  ;;  %v5995_v53 = vpop.eup %5994  ;;  %v540_v57 = vadd.f32 1.0, %v5993_v49  ;;  %v596_v63 = vmul.f32 %v564_v50, %v340_v47  ;;  %v479_v8 = vmul.f32 0.7978846, %v447_v5  ;;  %v385_v41 = vmul.f32 %v353_v38, %v289_v31 }
  0x2f   : > { %636 = vst.msk [vmem:[#allocation2 + $0x110] sm:$0xff] %vm600_vm1, %v8547_v6  ;;  %v541_v62 = vadd.f32 1.0, %v5995_v53  ;;  %v597_v36 = vmul.f32 %v565_v56, %v341_v32  ;;  %5996 = vtanh.f32 %v478_v3  ;;  %v416_v42 = vmul.f32 %v384_v40, %v288_v27  ;;  %v5634_v32 = vld [vmem:[%s8540_s1 + $0x20] sm:$0xf]  ;;  %v5955_v56 = vld [vmem:[%s8540_s1 + $0x20] sm:$0x30] }
  0x30   : > { %637 = vst.msk [vmem:[#allocation2 + $0x118] sm:$0x3] %vm603_vm2, %v8547_v6  ;;  %v572_v2 = vmul.f32 %v540_v57, %v316_v34  ;;  %5998 = vtanh.f32 %v479_v8  ;;  %v320_v34 = vmul.f32 0.5, %v288_v27  ;;  %v5635_v58 = vor.u32 %v5955_v56, %v5634_v32 }
  0x31   : > { %638 = vst.msk [vmem:[#allocation2 + $0x120] sm:$0xff] %vm600_vm1, %v8547_v6  ;;  %v573_v7 = vmul.f32 %v541_v62, %v317_v61  ;;  %v291_v61 = vld [vmem:[%s6247_s18 + $0x58] sm:$0xff] }
  0x32   : > { %639 = vst.msk [vmem:[#allocation2 + $0x128] sm:$0xff] %vm600_vm1, %v8547_v6  ;;  %v355_v1 = vmul.f32 0.044715, %v291_v61 }
  0x33   : > { %640 = vst.msk [vmem:[#allocation2 + $0x130] sm:$0x3] %vm603_vm2, %v8547_v6 }
  0x34   : > { %641 = vst.msk [vmem:[#allocation2 + $0x138] sm:$0xff] %vm600_vm1, %v8547_v6 }
  0x35   : > { %642 = vst.msk [vmem:[#allocation2 + $0x140] sm:$0xff] %vm600_vm1, %v8547_v6  ;;  %v5997_v28 = vpop.eup %5996 }
  0x36   : > { %643 = vst.msk [vmem:[#allocation2 + $0x148] sm:$0x3] %vm603_vm2, %v8547_v6  ;;  %v5999_v35 = vpop.eup %5998  ;;  %v542_v37 = vadd.f32 1.0, %v5997_v28 }
  0x37   : > { %644 = vst.msk [vmem:[#allocation2 + $0x150] sm:$0xff] %vm600_vm1, %v8547_v6  ;;  %v543_v39 = vadd.f32 1.0, %v5999_v35  ;;  %v292_v35 = vld [vmem:[%s6247_s18 + $0x60] sm:$0xff] }
  0x38   : > { %645 = vst.msk [vmem:[#allocation2 + $0x158] sm:$0xff] %vm600_vm1, %v8547_v6  ;;  %v574_v22 = vmul.f32 %v542_v37, %v318_v26  ;;  %v293_v37 = vld [vmem:[%s6247_s18 + $0x68] sm:$0xff] }
  0x39   : > { %646 = vst.msk [vmem:[#allocation2 + $0x160] sm:$0x3] %vm603_vm2, %v8547_v6  ;;  %v575_v23 = vmul.f32 %v543_v39, %v319_v29  ;;  %v356_v39 = vmul.f32 0.044715, %v292_v35  ;;  %v357_v40 = vmul.f32 0.044715, %v293_v37 }
  0x3a   : > { %647 = vst.msk [vmem:[#allocation2 + $0x168] sm:$0xff] %vm600_vm1, %v8547_v6 }
  0x3b   : > { %648 = vst.msk [vmem:[#allocation2 + $0x170] sm:$0xff] %vm600_vm1, %v8547_v6 }
  0x3c   : > { %649 = vst.msk [vmem:[#allocation2 + $0x178] sm:$0x3] %vm603_vm2, %v8547_v6 }
  0x3d   : > { %650 = vst.msk [vmem:[#allocation2 + $0x180] sm:$0xff] %vm600_vm1, %v8547_v6 }
  0x3e   : > { %651 = vst.msk [vmem:[#allocation2 + $0x188] sm:$0xff] %vm600_vm1, %v8547_v6 }
  0x3f   : > { %652 = vst.msk [vmem:[#allocation2 + $0x190] sm:$0x3] %vm603_vm2, %v8547_v6 }
  0x40   : > { %653 = vst.msk [vmem:[#allocation2 + $0x198] sm:$0xff] %vm600_vm1, %v8547_v6 }
  0x41   : > { %654 = vst.msk [vmem:[#allocation2 + $0x1a0] sm:$0xff] %vm600_vm1, %v8547_v6 }
  0x42   : > { %655 = vst.msk [vmem:[#allocation2 + $0x1a8] sm:$0x3] %vm603_vm2, %v8547_v6 }
  0x43   : > { %657 = vst.msk [vmem:[#allocation2 + $0x19] sm:$0xff] %vm600_vm1, %v568_v44  ;;  %v417_v44 = vmul.f32 %v385_v41, %v289_v31  ;;  %v323_v41 = vmul.f32 0.5, %v291_v61 }
  0x44   : > { %658 = vst.msk [vmem:[#allocation2 + $0x21] sm:$0xff] %vm600_vm1, %v569_v24 }
  0x45   : > { %683 = vst.msk [vmem:[#allocation2 + $0x151] sm:$0xff] %vm600_vm1, %v594_v30  ;;  %v449_v25 = vadd.f32 %v417_v44, %v289_v31  ;;  %v389_v44 = vmul.f32 %v357_v40, %v293_v37 }
  0x46   : > { %684 = vst.msk [vmem:[#allocation2 + $0x159] sm:$0xff] %vm600_vm1, %v595_v54 }
  0x47   : > { %659 = vst.msk [vmem:[#allocation2 + $0x31] sm:$0xff] %vm600_vm1, %v570_v55  ;;  %v481_v53 = vmul.f32 0.7978846, %v449_v25 }
  0x48   : > { %660 = vst.msk [vmem:[#allocation2 + $0x39] sm:$0xff] %vm600_vm1, %v571_v60  ;;  %v290_v60 = vld [vmem:[%s6247_s18 + $0x50] sm:$0xff] }
  0x49   : > { %685 = vst.msk [vmem:[#allocation2 + $0x169] sm:$0xff] %vm600_vm1, %v596_v63  ;;  %v354_v0 = vmul.f32 0.044715, %v290_v60  ;;  %v322_v38 = vmul.f32 0.5, %v290_v60 }
  0x4a   : > { %v696_v10 = vld [vmem:[#allocation2 + $0x18] sm:$0xff]  ;;  %686 = vst.msk [vmem:[#allocation2 + $0x171] sm:$0xff] %vm600_vm1, %v597_v36  ;;  %v1711_v36 = vsel %vm797_vm0, %v5635_v58, 0 }
  0x4b   : > { %v924_v11 = vld [vmem:[#allocation2 + $0x19] sm:$0xff]  ;;  %v1153_v14 = vld [vmem:[#allocation2 + $0x22] sm:$0xff]  ;;  %661 = vst.msk [vmem:[#allocation2 + $0x49] sm:$0xff] %vm600_vm1, %v572_v2  ;;  %1720 = vmatpush.bf16.msrb.mxu0 %v1711_v36  ;;  %v386_v5 = vmul.f32 %v354_v0, %v290_v60  ;;  %v294_v36 = vld [vmem:[%s6247_s18 + $0x70] sm:$0xff] }
  0x4c   : > { %v697_v12 = vld [vmem:[#allocation2 + $0x20] sm:$0xff]  ;;  %v722_v16 = vld [vmem:[#allocation2 + $0x150] sm:$0xff]  ;;  %662 = vst.msk [vmem:[#allocation2 + $0x51] sm:$0xff] %vm600_vm1, %v573_v7  ;;  %v387_v7 = vmul.f32 %v355_v1, %v291_v61  ;;  %v5954_v0 = vld [vmem:[%s8540_s1 + $0x18] sm:$0x30]  ;;  %v325_v1 = vmul.f32 0.5, %v293_v37 }
  0x4d   : > { %v1152_v13 = vld [vmem:[#allocation2 + $0x1a] sm:$0xff]  ;;  %v6429_v15 = vpack.c.bf16 %v697_v12, %v696_v10  ;;  %663 = vst.msk [vmem:[#allocation2 + $0x61] sm:$0xff] %vm600_vm1, %v574_v22  ;;  %v418_v10 = vmul.f32 %v386_v5, %v290_v60 }
  0x4e   : > { %v1183_v17 = vpack.c.bf16 %v1153_v14, %v1152_v13  ;;  %v925_v18 = vld [vmem:[#allocation2 + $0x21] sm:$0xff]  ;;  %v723_v19 = vld [vmem:[#allocation2 + $0x158] sm:$0xff]  ;;  %v698_v43 = vld [vmem:[#allocation2 + $0x30] sm:$0xff]  ;;  %664 = vst.msk [vmem:[#allocation2 + $0x69] sm:$0xff] %vm600_vm1, %v575_v23 }
  0x4f   : > { %v955_v20 = vpack.c.bf16 %v925_v18, %v924_v11  ;;  %5549 = vmatmul.msk.bf16.gmra.mxu0 %vm600_vm1, %v6429_v15  ;;  %v740_v21 = vpack.c.bf16 %v723_v19, %v722_v16  ;;  %v699_v24 = vld [vmem:[#allocation2 + $0x38] sm:$0xff]  ;;  %v419_v11 = vmul.f32 %v387_v7, %v291_v61  ;;  %v450_v18 = vadd.f32 %v418_v10, %v290_v60 }
  0x50   : > { %5593 = vmatmul.msk.bf16.gmra.mxu2 %vm600_vm1, %v1183_v17  ;;  %v1154_v45 = vld [vmem:[#allocation2 + $0x32] sm:$0xff]  ;;  %v1155_v46 = vld [vmem:[#allocation2 + $0x3a] sm:$0xff]  ;;  %v724_v49 = vld [vmem:[#allocation2 + $0x168] sm:$0xff]  ;;  %v6442_v51 = vpack.c.bf16 %v699_v24, %v698_v43  ;;  %v388_v43 = vmul.f32 %v356_v39, %v292_v35 }
  0x51   : > { %5571 = vmatmul.msk.bf16.gmra.mxu1 %vm600_vm1, %v955_v20  ;;  %5562 = vmatmul.msk.bf16.vlgmr.msra.gmra.mxu3 %vm600_vm1, %v740_v21  ;;  %v926_v47 = vld [vmem:[#allocation2 + $0x31] sm:$0xff]  ;;  %v927_v48 = vld [vmem:[#allocation2 + $0x39] sm:$0xff]  ;;  %v1184_v52 = vpack.c.bf16 %v1155_v46, %v1154_v45  ;;  %v451_v19 = vadd.f32 %v419_v11, %v291_v61  ;;  %v482_v28 = vmul.f32 0.7978846, %v450_v18 }
  0x52   : > { %5963 = vmatpush.bf16.msra.mxu3 %v6216_v9  ;;  %v448_v9 = vadd.f32 %v416_v42, %v288_v27  ;;  %v725_v30 = vld [vmem:[#allocation2 + $0x170] sm:$0xff]  ;;  %v956_v54 = vpack.c.bf16 %v927_v48, %v926_v47  ;;  %v700_v8 = vld [vmem:[#allocation2 + $0x48] sm:$0xff]  ;;  %v951_v21 = vld [vmem:[#allocation2 + $0x159] sm:$0xff]  ;;  %v420_v46 = vmul.f32 %v388_v43, %v292_v35 }
  0x53   : > { %v741_v55 = vpack.c.bf16 %v725_v30, %v724_v49  ;;  %v701_v12 = vld [vmem:[#allocation2 + $0x50] sm:$0xff]  ;;  %v483_v29 = vmul.f32 0.7978846, %v451_v19  ;;  %v5612_v61 = vld [vmem:[%s8540_s1 + $0x18] sm:$0xf]  ;;  %v297_v43 = vld [vmem:[%s6247_s18 + $0x88] sm:$0xff] }
  0x54   : > { %v480_v50 = vmul.f32 0.7978846, %v448_v9  ;;  %v1156_v13 = vld [vmem:[#allocation2 + $0x4a] sm:$0xff]  ;;  %v1157_v14 = vld [vmem:[#allocation2 + $0x52] sm:$0xff]  ;;  %v6460_v26 = vpack.c.bf16 %v701_v12, %v700_v8  ;;  %v421_v9 = vmul.f32 %v389_v44, %v293_v37  ;;  %v702_v47 = vld [vmem:[#allocation2 + $0x60] sm:$0xff]  ;;  %v5613_v5 = vor.u32 %v5954_v0, %v5612_v61 }
  0x55   : > { %v928_v16 = vld [vmem:[#allocation2 + $0x49] sm:$0xff]  ;;  %v929_v17 = vld [vmem:[#allocation2 + $0x51] sm:$0xff]  ;;  %v1185_v27 = vpack.c.bf16 %v1157_v14, %v1156_v13  ;;  %v326_v44 = vmul.f32 0.5, %v294_v36 }
  0x56   : > { %6000 = vtanh.f32 %v480_v50  ;;  %v950_v20 = vld [vmem:[#allocation2 + $0x151] sm:$0xff]  ;;  %v957_v31 = vpack.c.bf16 %v929_v17, %v928_v16  ;;  %v703_v25 = vld [vmem:[#allocation2 + $0x68] sm:$0xff]  ;;  %v452_v50 = vadd.f32 %v420_v46, %v292_v35  ;;  %v1483_v11 = vsel %vm797_vm0, %v5613_v5, 0 }
  0x57   : > { %6002 = vtanh.f32 %v481_v53  ;;  %v968_v33 = vpack.c.bf16 %v951_v21, %v950_v20  ;;  %v1158_v49 = vld [vmem:[#allocation2 + $0x62] sm:$0xff]  ;;  %v1159_v30 = vld [vmem:[#allocation2 + $0x6a] sm:$0xff] }
  0x58   : > { %6004 = vtanh.f32 %v482_v28  ;;  %v930_v53 = vld [vmem:[#allocation2 + $0x61] sm:$0xff]  ;;  %v953_v32 = vld [vmem:[#allocation2 + $0x171] sm:$0xff]  ;;  %v484_v56 = vmul.f32 0.7978846, %v452_v50  ;;  %v1186_v58 = vpack.c.bf16 %v1159_v30, %v1158_v49 }
  0x59   : > { %6006 = vtanh.f32 %v483_v29 }
  0x5a   : > { %6008 = vtanh.f32 %v484_v56 }
  0x5c   : > { %v6001_v57 = vpop.eup %6000 }
  0x5d   : > { %v6003_v62 = vpop.eup %6002  ;;  %v544_v63 = vadd.f32 1.0, %v6001_v57  ;;  %v6471_v57 = vpack.c.bf16 %v703_v25, %v702_v47 }
  0x5e   : > { %v545_v2 = vadd.f32 1.0, %v6003_v62  ;;  %v6005_v22 = vpop.eup %6004  ;;  %v324_v62 = vmul.f32 0.5, %v292_v35  ;;  %v1178_v35 = vld [vmem:[#allocation2 + $0x152] sm:$0xff] }
  0x5f   : > { %5550 = vmatmul.msk.bf16.gmra.mxu0 %vm600_vm1, %v6442_v51  ;;  %v576_v4 = vmul.f32 %v544_v63, %v320_v34  ;;  %v6007_v23 = vpop.eup %6006  ;;  %v546_v42 = vadd.f32 1.0, %v6005_v22 }
  0x60   : > { %5594 = vmatmul.msk.bf16.gmra.mxu2 %vm600_vm1, %v1184_v52  ;;  %v577_v3 = vmul.f32 %v545_v2, %v321_v59  ;;  %v547_v24 = vadd.f32 1.0, %v6007_v23  ;;  %v453_v52 = vadd.f32 %v421_v9, %v293_v37  ;;  %v6009_v63 = vpop.eup %6008  ;;  %v295_v2 = vld [vmem:[%s6247_s18 + $0x78] sm:$0xff]  ;;  %v6501_v9 = vld [vmem:[%s8541_s2] ss:$0 sm:$0xff] }
  0x61   : > { %5572 = vmatmul.msk.bf16.gmra.mxu1 %vm600_vm1, %v956_v54  ;;  %5563 = vmatmul.msk.bf16.gmra.mxu3 %vm600_vm1, %v741_v55  ;;  %665 = vst.msk [vmem:[#allocation2 + $0x79] sm:$0xff] %vm600_vm1, %v576_v4  ;;  %v578_v45 = vmul.f32 %v546_v42, %v322_v38  ;;  %v931_v54 = vld [vmem:[#allocation2 + $0x69] sm:$0xff]  ;;  %v548_v7 = vadd.f32 1.0, %v6009_v63  ;;  %v359_v8 = vmul.f32 0.044715, %v295_v2  ;;  %v1179_v37 = vld [vmem:[#allocation2 + $0x15a] sm:$0xff] }
  0x62   : > { %666 = vst.msk [vmem:[#allocation2 + $0x81] sm:$0xff] %vm600_vm1, %v577_v3  ;;  %v579_v48 = vmul.f32 %v547_v24, %v323_v41  ;;  %v952_v55 = vld [vmem:[#allocation2 + $0x169] sm:$0xff]  ;;  %v485_v34 = vmul.f32 0.7978846, %v453_v52  ;;  %v958_v59 = vpack.c.bf16 %v931_v54, %v930_v53  ;;  %v358_v3 = vmul.f32 0.044715, %v294_v36 }
  0x63   : > { %667 = vst.msk [vmem:[#allocation2 + $0x91] sm:$0xff] %vm600_vm1, %v578_v45  ;;  %v969_v60 = vpack.c.bf16 %v953_v32, %v952_v55  ;;  %v580_v12 = vmul.f32 %v548_v7, %v324_v62  ;;  %v391_v14 = vmul.f32 %v359_v8, %v295_v2  ;;  %v1196_v23 = vpack.c.bf16 %v1179_v37, %v1178_v35  ;;  %v296_v42 = vld [vmem:[%s6247_s18 + $0x80] sm:$0xff] }
  0x64   : > { %668 = vst.msk [vmem:[#allocation2 + $0x99] sm:$0xff] %vm600_vm1, %v579_v48  ;;  %6010 = vtanh.f32 %v485_v34  ;;  %v390_v13 = vmul.f32 %v358_v3, %v294_v36  ;;  %v360_v24 = vmul.f32 0.044715, %v296_v42  ;;  %v361_v45 = vmul.f32 0.044715, %v297_v43 }
  0x65   : > { %669 = vst.msk [vmem:[#allocation2 + $0xa9] sm:$0xff] %vm600_vm1, %v580_v12  ;;  %v423_v19 = vmul.f32 %v391_v14, %v295_v2  ;;  %v327_v47 = vmul.f32 0.5, %v295_v2  ;;  %v298_v14 = vld [vmem:[%s6247_s18 + $0x90] sm:$0xff] }
  0x66   : > { %v422_v18 = vmul.f32 %v390_v13, %v294_v36  ;;  %v392_v49 = vmul.f32 %v360_v24, %v296_v42  ;;  %v393_v30 = vmul.f32 %v361_v45, %v297_v43 }
  0x68   : > { %v704_v17 = vld [vmem:[#allocation2 + $0x78] sm:$0xff]  ;;  %v424_v54 = vmul.f32 %v392_v49, %v296_v42  ;;  %v425_v55 = vmul.f32 %v393_v30, %v297_v43  ;;  %v300_v30 = vld [vmem:[%s6247_s18 + $0xa0] sm:$0xff] }
  0x69   : > { %v705_v20 = vld [vmem:[#allocation2 + $0x80] sm:$0xff] }
  0x6a   : > { %v6011_v4 = vpop.eup %6010  ;;  %v1160_v21 = vld [vmem:[#allocation2 + $0x7a] sm:$0xff]  ;;  %v6489_v38 = vpack.c.bf16 %v705_v20, %v704_v17  ;;  %v706_v32 = vld [vmem:[#allocation2 + $0x90] sm:$0xff]  ;;  %v456_v62 = vadd.f32 %v424_v54, %v296_v42  ;;  %v457_v63 = vadd.f32 %v425_v55, %v297_v43  ;;  %v328_v20 = vmul.f32 0.5, %v296_v42 }
  0x6b   : > { %v549_v10 = vadd.f32 1.0, %v6011_v4  ;;  %v932_v28 = vld [vmem:[#allocation2 + $0x79] sm:$0xff]  ;;  %v933_v29 = vld [vmem:[#allocation2 + $0x81] sm:$0xff]  ;;  %v934_v0 = vld [vmem:[#allocation2 + $0x91] sm:$0xff] }
  0x6c   : > { %v959_v41 = vpack.c.bf16 %v933_v29, %v932_v28  ;;  %v1181_v4 = vld [vmem:[#allocation2 + $0x172] sm:$0xff]  ;;  %v488_v5 = vmul.f32 0.7978846, %v456_v62  ;;  %v489_v7 = vmul.f32 0.7978846, %v457_v63 }
  0x6d   : > { %v581_v16 = vmul.f32 %v549_v10, %v325_v1  ;;  %v935_v1 = vld [vmem:[#allocation2 + $0x99] sm:$0xff] }
  0x6e   : > { %v960_v10 = vpack.c.bf16 %v935_v1, %v934_v0  ;;  %v299_v17 = vld [vmem:[%s6247_s18 + $0x98] sm:$0xff] }
  0x6f   : > { %5551 = vmatmul.msk.bf16.gmra.mxu0 %vm600_vm1, %v6460_v26  ;;  %670 = vst.msk [vmem:[#allocation2 + $0xb1] sm:$0xff] %vm600_vm1, %v581_v16  ;;  %v363_v28 = vmul.f32 0.044715, %v299_v17 }
  0x70   : > { %5595 = vmatmul.msk.bf16.gmra.mxu2 %vm600_vm1, %v1185_v27  ;;  %v1161_v27 = vld [vmem:[#allocation2 + $0x82] sm:$0xff] }
  0x71   : > { %5573 = vmatmul.msk.bf16.gmra.mxu1 %vm600_vm1, %v957_v31  ;;  %5584 = vmatmul.msk.bf16.vlgmr.msrb.gmra.mxu3 %vm600_vm1, %v968_v33  ;;  %v454_v31 = vadd.f32 %v422_v18, %v294_v36  ;;  %v455_v33 = vadd.f32 %v423_v19, %v295_v2  ;;  %v1187_v39 = vpack.c.bf16 %v1161_v27, %v1160_v21  ;;  %v1180_v2 = vld [vmem:[#allocation2 + $0x16a] sm:$0xff]  ;;  %v362_v18 = vmul.f32 0.044715, %v298_v14 }
  0x72   : > { %1492 = vmatpush.bf16.msrb.mxu3 %v1483_v11  ;;  %v1197_v11 = vpack.c.bf16 %v1181_v4, %v1180_v2  ;;  %v329_v21 = vmul.f32 0.5, %v297_v43  ;;  %v395_v35 = vmul.f32 %v363_v28, %v299_v17  ;;  %v936_v43 = vld [vmem:[#allocation2 + $0xa9] sm:$0xff]  ;;  %v332_v28 = vmul.f32 0.5, %v300_v30 }
  0x73   : > { %v486_v40 = vmul.f32 0.7978846, %v454_v31  ;;  %v487_v22 = vmul.f32 0.7978846, %v455_v33  ;;  %v394_v31 = vmul.f32 %v362_v18, %v298_v14  ;;  %v303_v18 = vld [vmem:[%s6247_s18 + $0xb8] sm:$0xff] }
  0x75   : > { %6012 = vtanh.f32 %v486_v40  ;;  %v708_v40 = vld [vmem:[#allocation2 + $0xa8] sm:$0xff] }
  0x76   : > { %6014 = vtanh.f32 %v487_v22  ;;  %v427_v22 = vmul.f32 %v395_v35, %v299_v17  ;;  %v937_v24 = vld [vmem:[#allocation2 + $0xb1] sm:$0xff] }
  0x77   : > { %6016 = vtanh.f32 %v488_v5  ;;  %v961_v49 = vpack.c.bf16 %v937_v24, %v936_v43 }
  0x78   : > { %6018 = vtanh.f32 %v489_v7  ;;  %v459_v45 = vadd.f32 %v427_v22, %v299_v17 }
  0x7b   : > { %v6013_v46 = vpop.eup %6012 }
  0x7c   : > { %v6015_v48 = vpop.eup %6014  ;;  %v550_v25 = vadd.f32 1.0, %v6013_v46 }
  0x7d   : > { %v551_v50 = vadd.f32 1.0, %v6015_v48  ;;  %v6017_v16 = vpop.eup %6016 }
  0x7e   : > { %v582_v53 = vmul.f32 %v550_v25, %v326_v44  ;;  %v6019_v19 = vpop.eup %6018  ;;  %v552_v27 = vadd.f32 1.0, %v6017_v16  ;;  %v1165_v44 = vld [vmem:[#allocation2 + $0xb2] sm:$0xff]  ;;  %v491_v25 = vmul.f32 0.7978846, %v459_v45 }
  0x7f   : > { %5552 = vmatmul.msk.bf16.gmra.mxu0 %vm600_vm1, %v6471_v57  ;;  %v583_v34 = vmul.f32 %v551_v50, %v327_v47  ;;  %v553_v29 = vadd.f32 1.0, %v6019_v19  ;;  %v301_v50 = vld [vmem:[%s6247_s18 + $0xa8] sm:$0xff] }
  0x80   : > { %5596 = vmatmul.msk.bf16.gmra.mxu2 %vm600_vm1, %v1186_v58  ;;  %v707_v58 = vld [vmem:[#allocation2 + $0x98] sm:$0xff]  ;;  %671 = vst.msk [vmem:[#allocation2 + $0xc1] sm:$0xff] %vm600_vm1, %v582_v53  ;;  %v584_v33 = vmul.f32 %v552_v27, %v328_v20  ;;  %v364_v53 = vmul.f32 0.044715, %v300_v30  ;;  %v365_v54 = vmul.f32 0.044715, %v301_v50 }
  0x81   : > { %5574 = vmatmul.msk.bf16.gmra.mxu1 %vm600_vm1, %v958_v59  ;;  %5585 = vmatmul.msk.bf16.gmra.mxu3 %vm600_vm1, %v969_v60  ;;  %v1162_v59 = vld [vmem:[#allocation2 + $0x92] sm:$0xff]  ;;  %v1163_v60 = vld [vmem:[#allocation2 + $0x9a] sm:$0xff]  ;;  %672 = vst.msk [vmem:[#allocation2 + $0xc9] sm:$0xff] %vm600_vm1, %v583_v34  ;;  %v6506_v3 = vpack.c.bf16 %v707_v58, %v706_v32  ;;  %v585_v37 = vmul.f32 %v553_v29, %v329_v21  ;;  %v330_v32 = vmul.f32 0.5, %v298_v14  ;;  %v367_v21 = vmul.f32 0.044715, %v303_v18 }
  0x82   : > { %v1188_v8 = vpack.c.bf16 %v1163_v60, %v1162_v59  ;;  %673 = vst.msk [vmem:[#allocation2 + $0xd9] sm:$0xff] %vm600_vm1, %v584_v33  ;;  %v396_v59 = vmul.f32 %v364_v53, %v300_v30  ;;  %v397_v60 = vmul.f32 %v365_v54, %v301_v50  ;;  %v333_v29 = vmul.f32 0.5, %v301_v50 }
  0x83   : > { %674 = vst.msk [vmem:[#allocation2 + $0xe1] sm:$0xff] %vm600_vm1, %v585_v37 }
  0x84   : > { %v428_v63 = vmul.f32 %v396_v59, %v300_v30  ;;  %v429_v0 = vmul.f32 %v397_v60, %v301_v50  ;;  %v305_v59 = vld [vmem:[%s6247_s18 + $0xc8] sm:$0xff] }
  0x86   : > { %v460_v4 = vadd.f32 %v428_v63, %v300_v30  ;;  %v461_v5 = vadd.f32 %v429_v0, %v301_v50  ;;  %v369_v63 = vmul.f32 0.044715, %v305_v59 }
  0x87   : > { %v710_v1 = vld [vmem:[#allocation2 + $0xc0] sm:$0xff] }
  0x88   : > { %v1167_v2 = vld [vmem:[#allocation2 + $0xca] sm:$0xff]  ;;  %v938_v7 = vld [vmem:[#allocation2 + $0xc1] sm:$0xff] }
  0x8a   : > { %v1168_v43 = vld [vmem:[#allocation2 + $0xda] sm:$0xff]  ;;  %v1169_v24 = vld [vmem:[#allocation2 + $0xe2] sm:$0xff] }
  0x8b   : > { %v1191_v53 = vpack.c.bf16 %v1169_v24, %v1168_v43 }
  0x8f   : > { %5553 = vmatmul.msk.bf16.gmra.mxu0 %vm600_vm1, %v6489_v38 }
  0x90   : > { %5597 = vmatmul.msk.bf16.gmra.mxu2 %vm600_vm1, %v1187_v39  ;;  %v426_v39 = vmul.f32 %v394_v31, %v298_v14 }
  0x91   : > { %5575 = vmatmul.msk.bf16.gmra.mxu1 %vm600_vm1, %v959_v41  ;;  %5606 = vmatmul.msk.bf16.vlgmr.msra.gmra.mxu3 %vm600_vm1, %v1196_v23  ;;  %v709_v41 = vld [vmem:[#allocation2 + $0xb0] sm:$0xff] }
  0x92   : > { %v1164_v23 = vld [vmem:[#allocation2 + $0xaa] sm:$0xff]  ;;  %v458_v42 = vadd.f32 %v426_v39, %v298_v14  ;;  %v6519_v47 = vpack.c.bf16 %v709_v41, %v708_v40  ;;  %v399_v39 = vmul.f32 %v367_v21, %v303_v18 }
  0x93   : > { %v1189_v48 = vpack.c.bf16 %v1165_v44, %v1164_v23  ;;  %v712_v44 = vld [vmem:[#allocation2 + $0xd8] sm:$0xff] }
  0x94   : > { %v490_v46 = vmul.f32 0.7978846, %v458_v42  ;;  %v713_v42 = vld [vmem:[#allocation2 + $0xe0] sm:$0xff] }
  0x96   : > { %v810_v52 = vpop.f32.mrf.mxu0  ;;  %6020 = vtanh.f32 %v490_v46 }
  0x97   : > { %v890_v56 = vadd.f32 %v6501_v9, %v810_v52  ;;  %6022 = vtanh.f32 %v491_v25  ;;  %v941_v25 = vld [vmem:[#allocation2 + $0xe1] sm:$0xff] }
  0x98   : > { %v1038_v61 = vpop.f32.mrf.mxu1 }
  0x99   : > { %v1118_v36 = vadd.f32 %v1038_v61, %v890_v56  ;;  %v331_v56 = vmul.f32 0.5, %v299_v17  ;;  %v302_v17 = vld [vmem:[%s6247_s18 + $0xb0] sm:$0xff] }
  0x9a   : > { %v366_v20 = vmul.f32 0.044715, %v302_v17 }
  0x9c   : > { %v6021_v52 = vpop.eup %6020  ;;  %v398_v37 = vmul.f32 %v366_v20, %v302_v17 }
  0x9d   : > { %v1266_v12 = vpop.f32.mrf.mxu2  ;;  %v6023_v55 = vpop.eup %6022  ;;  %v554_v34 = vadd.f32 1.0, %v6021_v52  ;;  %v6549_v52 = vpack.c.bf16 %v713_v42, %v712_v44 }
  0x9e   : > { %v6508_v13 = vadd.f32 %v1266_v12, %v1118_v36  ;;  %v555_v58 = vadd.f32 1.0, %v6023_v55  ;;  %v1166_v36 = vld [vmem:[#allocation2 + $0xc2] sm:$0xff]  ;;  %v6541_v33 = vpop.f32.mrf.mxu0  ;;  %v430_v23 = vmul.f32 %v398_v37, %v302_v17 }
  0x9f   : > { %5554 = vmatmul.msk.bf16.gmra.mxu0 %vm600_vm1, %v6506_v3  ;;  %v586_v61 = vmul.f32 %v554_v34, %v330_v32  ;;  %v1190_v14 = vpack.c.bf16 %v1167_v2, %v1166_v36  ;;  %v335_v36 = vmul.f32 0.5, %v303_v18 }
  0xa0   : > { %5598 = vmatmul.msk.bf16.gmra.mxu2 %vm600_vm1, %v1188_v8  ;;  %v587_v62 = vmul.f32 %v555_v58, %v331_v56  ;;  %v939_v8 = vld [vmem:[#allocation2 + $0xc9] sm:$0xff]  ;;  %v6543_v40 = vpop.f32.mrf.mxu1  ;;  %v462_v45 = vadd.f32 %v430_v23, %v302_v17  ;;  %v304_v58 = vld [vmem:[%s6247_s18 + $0xc0] sm:$0xff] }
  0xa1   : > { %5576 = vmatmul.msk.bf16.gmra.mxu1 %vm600_vm1, %v960_v10  ;;  %5607 = vmatmul.msk.bf16.gmra.mxu3 %vm600_vm1, %v1197_v11  ;;  %675 = vst.msk [vmem:[#allocation2 + $0xf1] sm:$0xff] %vm600_vm1, %v586_v61  ;;  %v492_v10 = vmul.f32 0.7978846, %v460_v4  ;;  %v493_v11 = vmul.f32 0.7978846, %v461_v5  ;;  %v962_v16 = vpack.c.bf16 %v939_v8, %v938_v7 }
  0xa2   : > { %676 = vst.msk [vmem:[#allocation2 + $0xf9] sm:$0xff] %vm600_vm1, %v587_v62  ;;  %v494_v30 = vmul.f32 0.7978846, %v462_v45  ;;  %v368_v62 = vmul.f32 0.044715, %v304_v58 }
  0xa3   : > { %6024 = vtanh.f32 %v492_v10  ;;  %v401_v10 = vmul.f32 %v369_v63, %v305_v59 }
  0xa4   : > { %6026 = vtanh.f32 %v493_v11  ;;  %v400_v8 = vmul.f32 %v368_v62, %v304_v58 }
  0xa5   : > { %6028 = vtanh.f32 %v494_v30  ;;  %v433_v20 = vmul.f32 %v401_v10, %v305_v59 }
  0xa9   : > { %v6025_v19 = vpop.eup %6024  ;;  %v943_v37 = vld [vmem:[#allocation2 + $0xf9] sm:$0xff] }
  0xaa   : > { %v6027_v27 = vpop.eup %6026  ;;  %v556_v31 = vadd.f32 1.0, %v6025_v19  ;;  %v432_v19 = vmul.f32 %v400_v8, %v304_v58 }
  0xab   : > { %v557_v35 = vadd.f32 1.0, %v6027_v27  ;;  %v6029_v60 = vpop.eup %6028  ;;  %v714_v27 = vld [vmem:[#allocation2 + $0xf0] sm:$0xff] }
  0xac   : > { %v588_v22 = vmul.f32 %v556_v31, %v332_v28  ;;  %v558_v2 = vadd.f32 1.0, %v6029_v60  ;;  %v1171_v28 = vld [vmem:[#allocation2 + $0xfa] sm:$0xff]  ;;  %v465_v31 = vadd.f32 %v433_v20, %v305_v59 }
  0xad   : > { %v589_v41 = vmul.f32 %v557_v35, %v333_v29  ;;  %v464_v29 = vadd.f32 %v432_v19, %v304_v58  ;;  %v942_v35 = vld [vmem:[#allocation2 + $0xf1] sm:$0xff] }
  0xae   : > { %677 = vst.msk [vmem:[#allocation2 + $0x109] sm:$0xff] %vm600_vm1, %v588_v22  ;;  %v6571_v24 = vpack.c.bf16 %v943_v37, %v942_v35 }
  0xaf   : > { %5555 = vmatmul.msk.bf16.gmra.mxu0 %vm600_vm1, %v6519_v47  ;;  %678 = vst.msk [vmem:[#allocation2 + $0x111] sm:$0xff] %vm600_vm1, %v589_v41  ;;  %v496_v22 = vmul.f32 0.7978846, %v464_v29  ;;  %v497_v41 = vmul.f32 0.7978846, %v465_v31 }
  0xb0   : > { %5599 = vmatmul.msk.bf16.gmra.mxu2 %vm600_vm1, %v1189_v48  ;;  %v940_v48 = vld [vmem:[#allocation2 + $0xd9] sm:$0xff] }
  0xb1   : > { %5577 = vmatmul.msk.bf16.gmra.mxu1 %vm600_vm1, %v961_v49  ;;  %5614 = vmatmul.msk.bf16.vlgmr.msrb.gmra.mxu3 %vm600_vm1, %v6429_v15  ;;  %v711_v15 = vld [vmem:[#allocation2 + $0xc8] sm:$0xff]  ;;  %v6547_v49 = vpop.f32.mrf.mxu2  ;;  %v963_v55 = vpack.c.bf16 %v941_v25, %v940_v48 }
  0xb2   : > { %v6531_v12 = vpack.c.bf16 %v711_v15, %v710_v1  ;;  %v334_v15 = vmul.f32 0.5, %v302_v17  ;;  %v715_v17 = vld [vmem:[#allocation2 + $0xf8] sm:$0xff] }
  0xbf   : > { %5556 = vmatmul.msk.bf16.gmra.mxu0 %vm600_vm1, %v6531_v12 }
  0xc0   : > { %5600 = vmatmul.msk.bf16.gmra.mxu2 %vm600_vm1, %v1190_v14  ;;  %v590_v14 = vmul.f32 %v558_v2, %v334_v15  ;;  %v1172_v2 = vld [vmem:[#allocation2 + $0x10a] sm:$0xff] }
  0xc1   : > { %5578 = vmatmul.msk.bf16.gmra.mxu1 %vm600_vm1, %v962_v16  ;;  %5615 = vmatmul.msk.bf16.gmra.mxu3 %vm600_vm1, %v6442_v51  ;;  %v431_v51 = vmul.f32 %v399_v39, %v303_v18 }
  0xc2   : > { %679 = vst.msk [vmem:[#allocation2 + $0x121] sm:$0xff] %vm600_vm1, %v590_v14 }
  0xc3   : > { %v463_v46 = vadd.f32 %v431_v51, %v303_v18  ;;  %v1170_v18 = vld [vmem:[#allocation2 + $0xf2] sm:$0xff]  ;;  %v6569_v51 = vpack.c.bf16 %v715_v17, %v714_v27 }
  0xc4   : > { %v1192_v44 = vpack.c.bf16 %v1171_v28, %v1170_v18 }
  0xc5   : > { %v495_v50 = vmul.f32 0.7978846, %v463_v46 }
  0xc7   : > { %6030 = vtanh.f32 %v495_v50 }
  0xc8   : > { %6032 = vtanh.f32 %v496_v22 }
  0xc9   : > { %6034 = vtanh.f32 %v497_v41  ;;  %v718_v22 = vld [vmem:[#allocation2 + $0x120] sm:$0xff] }
  0xcc   : > { %v815_v54 = vpop.f32.mrf.mxu0 }
  0xcd   : > { %v892_v32 = vadd.f32 %v6501_v9, %v815_v54  ;;  %v6031_v0 = vpop.eup %6030  ;;  %v336_v54 = vmul.f32 0.5, %v304_v58  ;;  %v944_v58 = vld [vmem:[#allocation2 + $0x109] sm:$0xff] }
  0xce   : > { %v1043_v56 = vpop.f32.mrf.mxu1  ;;  %v559_v7 = vadd.f32 1.0, %v6031_v0  ;;  %v6033_v25 = vpop.eup %6032 }
  0xcf   : > { %v1120_v34 = vadd.f32 %v1043_v56, %v892_v32  ;;  %5557 = vmatmul.msk.bf16.gmra.mxu0 %vm600_vm1, %v6549_v52  ;;  %v6035_v50 = vpop.eup %6034  ;;  %v560_v32 = vadd.f32 1.0, %v6033_v25  ;;  %v5957_v25 = vld [vmem:[%s8540_s1 + $0x30] sm:$0x30] }
  0xd0   : > { %5601 = vmatmul.msk.bf16.gmra.mxu2 %vm600_vm1, %v1191_v53  ;;  %v591_v16 = vmul.f32 %v559_v7, %v335_v36  ;;  %v561_v60 = vadd.f32 1.0, %v6035_v50  ;;  %v716_v36 = vld [vmem:[#allocation2 + $0x108] sm:$0xff] }
  0xd1   : > { %5579 = vmatmul.msk.bf16.gmra.mxu1 %vm600_vm1, %v963_v55  ;;  %5616 = vmatmul.msk.bf16.gmra.mxu3 %vm600_vm1, %v6460_v26  ;;  %v337_v55 = vmul.f32 0.5, %v305_v59  ;;  %v592_v63 = vmul.f32 %v560_v32, %v336_v54  ;;  %v945_v59 = vld [vmem:[#allocation2 + $0x111] sm:$0xff] }
  0xd2   : > { %680 = vst.msk [vmem:[#allocation2 + $0x129] sm:$0xff] %vm600_vm1, %v591_v16  ;;  %v6596_v16 = vpack.c.bf16 %v945_v59, %v944_v58 }
  0xd3   : > { %v1271_v61 = vpop.f32.mrf.mxu2  ;;  %v593_v0 = vmul.f32 %v561_v60, %v337_v55  ;;  %681 = vst.msk [vmem:[#allocation2 + $0x139] sm:$0xff] %vm600_vm1, %v592_v63  ;;  %v5656_v60 = vld [vmem:[%s8540_s1 + $0x28] sm:$0xf] }
  0xd4   : > { %v6560_v1 = vadd.f32 %v1271_v61, %v1120_v34  ;;  %v6562_v4 = vpop.f32.mrf.mxu3  ;;  %v817_v5 = vpop.f32.mrf.mxu0 }
  0xd5   : > { %v893_v26 = vadd.f32 %v6501_v9, %v817_v5  ;;  %v1173_v5 = vld [vmem:[#allocation2 + $0x112] sm:$0xff]  ;;  %682 = vst.msk [vmem:[#allocation2 + $0x141] sm:$0xff] %vm600_vm1, %v593_v0  ;;  %v918_v27 = vadd.f32 %v6501_v9, %v6562_v4 }
  0xd6   : > { %v1045_v11 = vpop.f32.mrf.mxu1 }
  0xd7   : > { %v1121_v21 = vadd.f32 %v1045_v11, %v893_v26  ;;  %v6592_v26 = vpack.c.bf16 %v1173_v5, %v1172_v2 }
  0xd9   : > { %v719_v41 = vld [vmem:[#allocation2 + $0x128] sm:$0xff] }
  0xda   : > { %v6623_v50 = vpack.c.bf16 %v719_v41, %v718_v22 }
  0xdb   : > { %v1273_v39 = vpop.f32.mrf.mxu2 }
  0xdc   : > { %v6567_v23 = vadd.f32 %v1273_v39, %v1121_v21  ;;  %v882_v42 = vpop.f32.mrf.mxu3  ;;  %v820_v43 = vpop.f32.mrf.mxu0 }
  0xdd   : > { %v894_v45 = vadd.f32 %v6501_v9, %v820_v43  ;;  %v1175_v43 = vld [vmem:[#allocation2 + $0x12a] sm:$0xff]  ;;  %v919_v4 = vadd.f32 %v6501_v9, %v882_v42 }
  0xde   : > { %v1048_v46 = vpop.f32.mrf.mxu1 }
  0xdf   : > { %v1122_v48 = vadd.f32 %v1048_v46, %v894_v45  ;;  %5558 = vmatmul.msk.bf16.gmra.mxu0 %vm600_vm1, %v6569_v51  ;;  %v946_v45 = vld [vmem:[#allocation2 + $0x121] sm:$0xff]  ;;  %v947_v46 = vld [vmem:[#allocation2 + $0x129] sm:$0xff] }
  0xe0   : > { %5602 = vmatmul.msk.bf16.gmra.mxu2 %vm600_vm1, %v1192_v44  ;;  %v1174_v44 = vld [vmem:[#allocation2 + $0x122] sm:$0xff] }
  0xe1   : > { %5580 = vmatmul.msk.bf16.gmra.mxu1 %vm600_vm1, %v6571_v24  ;;  %5617 = vmatmul.msk.bf16.gmra.mxu3 %vm600_vm1, %v6471_v57  ;;  %v717_v57 = vld [vmem:[#allocation2 + $0x110] sm:$0xff]  ;;  %v6625_v54 = vpack.c.bf16 %v1175_v43, %v1174_v44 }
  0xe2   : > { %v6590_v10 = vpack.c.bf16 %v717_v57, %v716_v36 }
  0xe3   : > { %v1276_v30 = vpop.f32.mrf.mxu2 }
  0xe4   : > { %v6581_v53 = vadd.f32 %v1276_v30, %v1122_v48  ;;  %v6583_v56 = vpop.f32.mrf.mxu3  ;;  %v822_v34 = vpop.f32.mrf.mxu0  ;;  %v5678_v48 = vld [vmem:[%s8540_s1 + $0x30] sm:$0xf] }
  0xe5   : > { %v895_v61 = vadd.f32 %v6501_v9, %v822_v34  ;;  %v5679_v55 = vor.u32 %v5957_v25, %v5678_v48  ;;  %v6627_v34 = vpack.c.bf16 %v947_v46, %v946_v45  ;;  %v920_v5 = vadd.f32 %v6501_v9, %v6583_v56 }
  0xe6   : > { %v1050_v62 = vpop.f32.mrf.mxu1 }
  0xe7   : > { %v1123_v15 = vadd.f32 %v1050_v62, %v895_v61  ;;  %v5956_v61 = vld [vmem:[%s8540_s1 + $0x28] sm:$0x30] }
  0xe8   : > { %v5657_v36 = vor.u32 %v5956_v61, %v5656_v60 }
  0xea   : > { %v1939_v2 = vsel %vm797_vm0, %v5657_v36, 0  ;;  %v1607_v36 = vld [vmem:[#allocation2 + $0x21] sm:$0xff] }
  0xeb   : > { %v1278_v7 = vpop.f32.mrf.mxu2  ;;  %1948 = vmatpush.bf16.msrb.mxu1 %v1939_v2  ;;  %v2064_v2 = vld [vmem:[#allocation2 + $0x38] sm:$0xff] }
  0xec   : > { %v6588_v8 = vadd.f32 %v1278_v7, %v1123_v15  ;;  %v6594_v11 = vpop.f32.mrf.mxu3  ;;  %v825_v14 = vpop.f32.mrf.mxu0  ;;  %v2168_v15 = vsel %vm797_vm0, %v5679_v55, 0 }
  0xed   : > { %v896_v19 = vadd.f32 %v6501_v9, %v825_v14  ;;  %2177 = vmatpush.bf16.msrb.mxu2 %v2168_v15  ;;  %v921_v56 = vadd.f32 %v6501_v9, %v6594_v11  ;;  %v1606_v15 = vld [vmem:[#allocation2 + $0x19] sm:$0xff] }
  0xee   : > { %v1053_v20 = vpop.f32.mrf.mxu1 }
  0xef   : > { %v1124_v21 = vadd.f32 %v1053_v20, %v896_v19  ;;  %5559 = vmatmul.msk.bf16.gmra.mxu0 %vm600_vm1, %v6590_v10 }
  0xf0   : > { %5603 = vmatmul.msk.bf16.gmra.mxu2 %vm600_vm1, %v6592_v26 }
  0xf1   : > { %5581 = vmatmul.msk.bf16.gmra.mxu1 %vm600_vm1, %v6596_v16  ;;  %5618 = vmatmul.msk.bf16.gmra.mxu3 %vm600_vm1, %v6489_v38 }
  0xf3   : > { %v1281_v17 = vpop.f32.mrf.mxu2 }
  0xf4   : > { %v6609_v18 = vadd.f32 %v1281_v17, %v1124_v21  ;;  %v1108_v28 = vpop.f32.mrf.mxu3  ;;  %v827_v29 = vpop.f32.mrf.mxu0  ;;  %v720_v17 = vld [vmem:[#allocation2 + $0x138] sm:$0xff] }
  0xf5   : > { %v6611_v31 = vadd.f32 %v1108_v28, %v918_v27  ;;  %v897_v35 = vadd.f32 %v6501_v9, %v827_v29  ;;  %v721_v28 = vld [vmem:[#allocation2 + $0x140] sm:$0xff] }
  0xf6   : > { %v1055_v37 = vpop.f32.mrf.mxu1  ;;  %v1176_v29 = vld [vmem:[#allocation2 + $0x13a] sm:$0xff]  ;;  %v6657_v41 = vpack.c.bf16 %v721_v28, %v720_v17 }
  0xf7   : > { %v1125_v39 = vadd.f32 %v1055_v37, %v897_v35  ;;  %v1177_v35 = vld [vmem:[#allocation2 + $0x142] sm:$0xff]  ;;  %v948_v37 = vld [vmem:[#allocation2 + $0x139] sm:$0xff] }
  0xf8   : > { %v6659_v44 = vpack.c.bf16 %v1177_v35, %v1176_v29 }
  0xfa   : > { %8568 = vst [vmem:[#allocation4_spill] sm:$0xff] %v6659_v44 }
  0xfb   : > { %v1283_v38 = vpop.f32.mrf.mxu2 }
  0xfc   : > { %v6621_v30 = vadd.f32 %v1283_v38, %v1125_v39  ;;  %v1110_v32 = vpop.f32.mrf.mxu3  ;;  %v830_v42 = vpop.f32.mrf.mxu0 }
  0xfd   : > { %v6635_v62 = vadd.f32 %v1110_v32, %v919_v4  ;;  %v898_v63 = vadd.f32 %v6501_v9, %v830_v42 }
  0xfe   : > { %v1058_v0 = vpop.f32.mrf.mxu1 }
  0xff   : > { %v1126_v57 = vadd.f32 %v1058_v0, %v898_v63  ;;  %5560 = vmatmul.msk.bf16.gmra.mxu0 %vm600_vm1, %v6623_v50 }
 0x100   : > { %5604 = vmatmul.msk.bf16.gmra.mxu2 %vm600_vm1, %v6625_v54 }
 0x101   : > { %5582 = vmatmul.msk.bf16.gmra.mxu1 %vm600_vm1, %v6627_v34  ;;  %5619 = vmatmul.msk.bf16.gmra.mxu3 %vm600_vm1, %v6506_v3  ;;  %v949_v3 = vld [vmem:[#allocation2 + $0x141] sm:$0xff] }
 0x102   : > { %v6661_v45 = vpack.c.bf16 %v949_v3, %v948_v37 }
 0x103   : > { %v1286_v58 = vpop.f32.mrf.mxu2 }
 0x104   : > { %v6650_v59 = vadd.f32 %v1286_v58, %v1126_v57  ;;  %v1113_v7 = vpop.f32.mrf.mxu3  ;;  %v832_v14 = vpop.f32.mrf.mxu0  ;;  %v2063_v57 = vld [vmem:[#allocation2 + $0x30] sm:$0xff]  ;;  %v1835_v58 = vld [vmem:[#allocation2 + $0x22] sm:$0xff] }
 0x105   : > { %v1148_v19 = vadd.f32 %v1113_v7, %v920_v5  ;;  %v899_v20 = vadd.f32 %v6501_v9, %v832_v14  ;;  %v1834_v5 = vld [vmem:[#allocation2 + $0x1a] sm:$0xff]  ;;  %v1638_v14 = vpack.c.bf16 %v1607_v36, %v1606_v15 }
 0x106   : > { %v1060_v21 = vpop.f32.mrf.mxu1  ;;  %v1866_v17 = vpack.c.bf16 %v1835_v58, %v1834_v5 }
 0x107   : > { %v1127_v27 = vadd.f32 %v1060_v21, %v899_v20  ;;  %v2095_v20 = vpack.c.bf16 %v2064_v2, %v2063_v57 }
 0x10b   : > { %v1288_v39 = vpop.f32.mrf.mxu2 }
 0x10c   : > { %v6655_v22 = vadd.f32 %v1288_v39, %v1127_v27  ;;  %v1115_v43 = vpop.f32.mrf.mxu3  ;;  %v835_v4 = vpop.f32.mrf.mxu0 }
 0x10d   : > { %v1149_v46 = vadd.f32 %v1115_v43, %v921_v56  ;;  %v900_v38 = vadd.f32 %v6501_v9, %v835_v4 }
 0x10e   : > { %v1063_v48 = vpop.f32.mrf.mxu1 }
 0x10f   : > { %v1128_v25 = vadd.f32 %v1063_v48, %v900_v38  ;;  %5561 = vmatmul.msk.bf16.gmra.mxu0 %vm600_vm1, %v6657_v41  ;;  %v1608_v48 = vld [vmem:[#allocation2 + $0x31] sm:$0xff] }
 0x110   : > { %5605 = vmatmul.msk.bf16.gmra.mxu2 %vm600_vm1, %v6659_v44 }
 0x111   : > { %5583 = vmatmul.msk.bf16.gmra.mxu1 %vm600_vm1, %v6661_v45  ;;  %5620 = vmatmul.msk.bf16.gmra.mxu3 %vm600_vm1, %v6519_v47 }
 0x113   : > { %v1291_v11 = vpop.f32.mrf.mxu2 }
 0x114   : > { %v6672_v55 = vadd.f32 %v1291_v11, %v1128_v25  ;;  %v1336_v32 = vpop.f32.mrf.mxu3  ;;  %v837_v42 = vpop.f32.mrf.mxu0  ;;  %v1609_v25 = vld [vmem:[#allocation2 + $0x39] sm:$0xff]  ;;  %v2065_v11 = vld [vmem:[#allocation2 + $0x48] sm:$0xff] }
 0x115   : > { %v6675_v60 = vadd.f32 %v1336_v32, %v6611_v31  ;;  %v901_v61 = vadd.f32 %v6501_v9, %v837_v42  ;;  %v2066_v32 = vld [vmem:[#allocation2 + $0x50] sm:$0xff]  ;;  %v6696_v15 = vpack.c.bf16 %v1609_v25, %v1608_v48 }
 0x116   : > { %v1065_v63 = vpop.f32.mrf.mxu1  ;;  %v1836_v42 = vld [vmem:[#allocation2 + $0x32] sm:$0xff]  ;;  %v2096_v36 = vpack.c.bf16 %v2066_v32, %v2065_v11 }
 0x117   : > { %8569 = vst [vmem:[#allocation5_spill] sm:$0xff] %v6675_v60  ;;  %v1129_v0 = vadd.f32 %v1065_v63, %v901_v61  ;;  %v1837_v61 = vld [vmem:[#allocation2 + $0x3a] sm:$0xff] }
 0x118   : > { %v1845_v60 = vld [vmem:[#allocation2 + $0x9a] sm:$0xff] }
 0x11b   : > { %v1293_v7 = vpop.f32.mrf.mxu2 }
 0x11c   : > { %v6678_v47 = vadd.f32 %v1293_v7, %v1129_v0  ;;  %v1338_v21 = vpop.f32.mrf.mxu3  ;;  %v840_v27 = vpop.f32.mrf.mxu0 }
 0x11d   : > { %v6681_v31 = vadd.f32 %v1338_v21, %v6635_v62  ;;  %v902_v28 = vadd.f32 %v6501_v9, %v840_v27 }
 0x11e   : > { %v1068_v29 = vpop.f32.mrf.mxu1 }
 0x11f   : > { %8570 = vst [vmem:[#allocation6_spill] sm:$0xff] %v6681_v31  ;;  %v1130_v35 = vadd.f32 %v1068_v29, %v902_v28  ;;  %5636 = vmatmul.msk.bf16.vlgmr.msrb.gmra.mxu0 %vm600_vm1, %v1638_v14 }
 0x120   : > { %5680 = vmatmul.msk.bf16.vlgmr.msrb.gmra.mxu2 %vm600_vm1, %v2095_v20 }
 0x121   : > { %5658 = vmatmul.msk.bf16.vlgmr.msrb.gmra.mxu1 %vm600_vm1, %v1866_v17  ;;  %5621 = vmatmul.msk.bf16.gmra.mxu3 %vm600_vm1, %v6531_v12 }
 0x123   : > { %v1296_v56 = vpop.f32.mrf.mxu2 }
 0x124   : > { %v6689_v37 = vadd.f32 %v1296_v56, %v1130_v35  ;;  %v1341_v3 = vpop.f32.mrf.mxu3  ;;  %v842_v39 = vpop.f32.mrf.mxu0  ;;  %v1610_v56 = vld [vmem:[#allocation2 + $0x49] sm:$0xff] }
 0x125   : > { %v6691_v62 = vadd.f32 %v1341_v3, %v1148_v19  ;;  %v903_v43 = vadd.f32 %v6501_v9, %v842_v39  ;;  %v6698_v19 = vpack.c.bf16 %v1837_v61, %v1836_v42  ;;  %v1611_v3 = vld [vmem:[#allocation2 + $0x51] sm:$0xff]  ;;  %v2067_v39 = vld [vmem:[#allocation2 + $0x60] sm:$0xff] }
 0x126   : > { %v1070_v4 = vpop.f32.mrf.mxu1  ;;  %v6718_v11 = vpack.c.bf16 %v1611_v3, %v1610_v56 }
 0x127   : > { %8571 = vst [vmem:[#allocation7_spill] sm:$0xff] %v6691_v62  ;;  %v1131_v38 = vadd.f32 %v1070_v4, %v903_v43  ;;  %v2068_v43 = vld [vmem:[#allocation2 + $0x68] sm:$0xff] }
 0x128   : > { %8572 = vst [vmem:[#allocation8_spill] sm:$0xff] %v6698_v19  ;;  %v1838_v4 = vld [vmem:[#allocation2 + $0x4a] sm:$0xff]  ;;  %v2097_v32 = vpack.c.bf16 %v2068_v43, %v2067_v39  ;;  %v1612_v39 = vld [vmem:[#allocation2 + $0x61] sm:$0xff] }
 0x129   : > { %v5722_v43 = vld [vmem:[%s8540_s1 + $0x40] sm:$0xf]  ;;  %v2073_v62 = vld [vmem:[#allocation2 + $0xa8] sm:$0xff] }
 0x12b   : > { %v1298_v63 = vpop.f32.mrf.mxu2 }
 0x12c   : > { %v6694_v0 = vadd.f32 %v1298_v63, %v1131_v38  ;;  %v1343_v57 = vpop.f32.mrf.mxu3  ;;  %v845_v2 = vpop.f32.mrf.mxu0  ;;  %v1839_v38 = vld [vmem:[#allocation2 + $0x52] sm:$0xff] }
 0x12d   : > { %v6700_v5 = vadd.f32 %v1343_v57, %v1149_v46  ;;  %v904_v58 = vadd.f32 %v6501_v9, %v845_v2  ;;  %v6722_v61 = vpack.c.bf16 %v1839_v38, %v1838_v4  ;;  %v5700_v2 = vld [vmem:[%s8540_s1 + $0x38] sm:$0xf]  ;;  %v5959_v4 = vld [vmem:[%s8540_s1 + $0x40] sm:$0x30]  ;;  %v1613_v38 = vld [vmem:[#allocation2 + $0x69] sm:$0xff] }
 0x12e   : > { %v1073_v7 = vpop.f32.mrf.mxu1 }
 0x12f   : > { %8573 = vst [vmem:[#allocation9_spill] sm:$0xff] %v6700_v5  ;;  %v1132_v14 = vadd.f32 %v1073_v7, %v904_v58  ;;  %5637 = vmatmul.msk.bf16.gmra.mxu0 %vm600_vm1, %v6696_v15  ;;  %v5958_v58 = vld [vmem:[%s8540_s1 + $0x38] sm:$0x30] }
 0x130   : > { %5681 = vmatmul.msk.bf16.gmra.mxu2 %vm600_vm1, %v2096_v36  ;;  %8574 = vst [vmem:[#allocation10_spill] sm:$0xff] %v6722_v61  ;;  %v1617_v5 = vld [vmem:[#allocation2 + $0x99] sm:$0xff] }
 0x131   : > { %5659 = vmatmul.msk.bf16.gmra.mxu1 %vm600_vm1, %v6698_v19  ;;  %5622 = vmatmul.msk.bf16.gmra.mxu3 %vm600_vm1, %v6549_v52  ;;  %v2074_v19 = vld [vmem:[#allocation2 + $0xb0] sm:$0xff] }
 0x133   : > { %v1301_v20 = vpop.f32.mrf.mxu2 }
 0x134   : > { %v6710_v21 = vadd.f32 %v1301_v20, %v1132_v14  ;;  %v1494_v46 = vpop.f32.mrf.mxu3  ;;  %v847_v27 = vpop.f32.mrf.mxu0  ;;  %v5701_v14 = vor.u32 %v5958_v58, %v5700_v2  ;;  %v6754_v58 = vpack.c.bf16 %v1613_v38, %v1612_v39 }
 0x135   : > { %v6713_v17 = vadd.f32 %v1494_v46, %v6508_v13  ;;  %v905_v28 = vadd.f32 %v6501_v9, %v847_v27 }
 0x136   : > { %v1075_v29 = vpop.f32.mrf.mxu1 }
 0x137   : > { %v1133_v35 = vadd.f32 %v1075_v29, %v905_v28  ;;  %v2396_v28 = vsel %vm797_vm0, %v5701_v14, 0 }
 0x138   : > { %2405 = vmatpush.bf16.msra.mxu3 %v2396_v28 }
 0x13b   : > { %v1303_v48 = vpop.f32.mrf.mxu2 }
 0x13c   : > { %v6716_v25 = vadd.f32 %v1303_v48, %v1133_v35  ;;  %v6720_v42 = vpop.f32.mrf.mxu3  ;;  %v850_v13 = vpop.f32.mrf.mxu0  ;;  %v2069_v48 = vld [vmem:[#allocation2 + $0x78] sm:$0xff] }
 0x13d   : > { %v906_v63 = vadd.f32 %v6501_v9, %v850_v13  ;;  %v5723_v13 = vor.u32 %v5959_v4, %v5722_v43 }
 0x13e   : > { %v1078_v36 = vpop.f32.mrf.mxu1 }
 0x13f   : > { %v1134_v57 = vadd.f32 %v1078_v36, %v906_v63  ;;  %5638 = vmatmul.msk.bf16.gmra.mxu0 %vm600_vm1, %v6718_v11  ;;  %v1841_v63 = vld [vmem:[#allocation2 + $0x6a] sm:$0xff] }
 0x140   : > { %5682 = vmatmul.msk.bf16.gmra.mxu2 %vm600_vm1, %v2097_v32  ;;  %v2070_v32 = vld [vmem:[#allocation2 + $0x80] sm:$0xff] }
 0x141   : > { %5660 = vmatmul.msk.bf16.gmra.mxu1 %vm600_vm1, %v6722_v61  ;;  %5623 = vmatmul.msk.bf16.gmra.mxu3 %vm600_vm1, %v6569_v51  ;;  %v1616_v61 = vld [vmem:[#allocation2 + $0x91] sm:$0xff] }
 0x143   : > { %v1306_v7 = vpop.f32.mrf.mxu2 }
 0x144   : > { %v6738_v20 = vadd.f32 %v1306_v7, %v1134_v57  ;;  %v1499_v46 = vpop.f32.mrf.mxu3  ;;  %v852_v27 = vpop.f32.mrf.mxu0  ;;  %v2624_v57 = vsel %vm797_vm0, %v5723_v13, 0  ;;  %v2098_v7 = vpack.c.bf16 %v2070_v32, %v2069_v48 }
 0x145   : > { %v6742_v29 = vadd.f32 %v1499_v46, %v6560_v1  ;;  %v907_v35 = vadd.f32 %v6501_v9, %v852_v27  ;;  %v1840_v1 = vld [vmem:[#allocation2 + $0x62] sm:$0xff]  ;;  %2633 = vmatpush.bf16.msra.mxu0 %v2624_v57  ;;  %v2072_v57 = vld [vmem:[#allocation2 + $0x98] sm:$0xff] }
 0x146   : > { %v1080_v56 = vpop.f32.mrf.mxu1  ;;  %v6756_v27 = vpack.c.bf16 %v1841_v63, %v1840_v1  ;;  %v1614_v1 = vld [vmem:[#allocation2 + $0x79] sm:$0xff]  ;;  %v1615_v63 = vld [vmem:[#allocation2 + $0x81] sm:$0xff] }
 0x147   : > { %v1135_v3 = vadd.f32 %v1080_v56, %v907_v35 }
 0x148   : > { %8575 = vst [vmem:[#allocation11_spill] sm:$0xff] %v6756_v27 }
 0x14b   : > { %v1308_v36 = vpop.f32.mrf.mxu2 }
 0x14c   : > { %v6752_v2 = vadd.f32 %v1308_v36, %v1135_v3  ;;  %v1501_v14 = vpop.f32.mrf.mxu3  ;;  %v855_v46 = vpop.f32.mrf.mxu0  ;;  %v2071_v36 = vld [vmem:[#allocation2 + $0x90] sm:$0xff] }
 0x14d   : > { %v6759_v28 = vadd.f32 %v1501_v14, %v6567_v23  ;;  %v908_v35 = vadd.f32 %v6501_v9, %v855_v46  ;;  %v1843_v14 = vld [vmem:[#allocation2 + $0x82] sm:$0xff] }
 0x14e   : > { %v1083_v56 = vpop.f32.mrf.mxu1 }
 0x14f   : > { %v1136_v43 = vadd.f32 %v1083_v56, %v908_v35  ;;  %5639 = vmatmul.msk.bf16.gmra.mxu0 %vm600_vm1, %v6754_v58  ;;  %v6777_v56 = vpack.c.bf16 %v1615_v63, %v1614_v1  ;;  %v311_v1 = vld [vmem:[%s6247_s18 + $0xf8] sm:$0xff] }
 0x150   : > { %5683 = vmatmul.msk.bf16.gmra.mxu2 %vm600_vm1, %v2098_v7  ;;  %v1842_v7 = vld [vmem:[#allocation2 + $0x7a] sm:$0xff] }
 0x151   : > { %5661 = vmatmul.msk.bf16.gmra.mxu1 %vm600_vm1, %v6756_v27  ;;  %5624 = vmatmul.msk.bf16.gmra.mxu3 %vm600_vm1, %v6590_v10  ;;  %8576 = vst [vmem:[#allocation12_spill] sm:$0xff] %v6777_v56 }
 0x153   : > { %v1311_v3 = vpop.f32.mrf.mxu2 }
 0x154   : > { %v6769_v39 = vadd.f32 %v1311_v3, %v1136_v43  ;;  %v1504_v23 = vpop.f32.mrf.mxu3  ;;  %v857_v4 = vpop.f32.mrf.mxu0  ;;  %v2099_v43 = vpack.c.bf16 %v2072_v57, %v2071_v36  ;;  %v375_v36 = vmul.f32 0.044715, %v311_v1 }
 0x155   : > { %v6772_v38 = vadd.f32 %v1504_v23, %v6581_v53  ;;  %v909_v48 = vadd.f32 %v6501_v9, %v857_v4  ;;  %v6779_v23 = vpack.c.bf16 %v1843_v14, %v1842_v7 }
 0x156   : > { %v1085_v32 = vpop.f32.mrf.mxu1 }
 0x157   : > { %v1137_v13 = vadd.f32 %v1085_v32, %v909_v48  ;;  %8577 = vst [vmem:[#allocation13_spill] sm:$0xff] %v6779_v23 }
 0x15b   : > { %v1313_v46 = vpop.f32.mrf.mxu2 }
 0x15c   : > { %v6775_v35 = vadd.f32 %v1313_v46, %v1137_v13  ;;  %v1506_v53 = vpop.f32.mrf.mxu3  ;;  %v860_v3 = vpop.f32.mrf.mxu0  ;;  %v310_v13 = vld [vmem:[%s6247_s18 + $0xf0] sm:$0xff] }
 0x15d   : > { %v6782_v4 = vadd.f32 %v1506_v53, %v6588_v8  ;;  %v910_v48 = vadd.f32 %v6501_v9, %v860_v3  ;;  %v374_v8 = vmul.f32 0.044715, %v310_v13  ;;  %v407_v53 = vmul.f32 %v375_v36, %v311_v1 }
 0x15e   : > { %v1088_v32 = vpop.f32.mrf.mxu1 }
 0x15f   : > { %v1138_v6 = vadd.f32 %v1088_v32, %v910_v48  ;;  %5640 = vmatmul.msk.bf16.gmra.mxu0 %vm600_vm1, %v6777_v56  ;;  %v406_v46 = vmul.f32 %v374_v8, %v310_v13 }
 0x160   : > { %5684 = vmatmul.msk.bf16.gmra.mxu2 %vm600_vm1, %v2099_v43 }
 0x161   : > { %5662 = vmatmul.msk.bf16.gmra.mxu1 %vm600_vm1, %v6779_v23  ;;  %5625 = vmatmul.msk.bf16.gmra.mxu3 %vm600_vm1, %v6623_v50  ;;  %v438_v32 = vmul.f32 %v406_v46, %v310_v13  ;;  %v439_v23 = vmul.f32 %v407_v53, %v311_v1 }
 0x163   : > { %v1316_v63 = vpop.f32.mrf.mxu2  ;;  %v470_v31 = vadd.f32 %v438_v32, %v310_v13 }
 0x164   : > { %v6794_v57 = vadd.f32 %v1316_v63, %v1138_v6  ;;  %v1509_v7 = vpop.f32.mrf.mxu3  ;;  %v862_v14 = vpop.f32.mrf.mxu0  ;;  %v471_v6 = vadd.f32 %v439_v23, %v311_v1  ;;  %v1844_v63 = vld [vmem:[#allocation2 + $0x92] sm:$0xff] }
 0x165   : > { %v6797_v3 = vadd.f32 %v1509_v7, %v6609_v18  ;;  %v911_v43 = vadd.f32 %v6501_v9, %v862_v14  ;;  %v502_v8 = vmul.f32 0.7978846, %v470_v31  ;;  %v6802_v18 = vpack.c.bf16 %v1617_v5, %v1616_v61 }
 0x166   : > { %v1090_v48 = vpop.f32.mrf.mxu1  ;;  %v503_v36 = vmul.f32 0.7978846, %v471_v6  ;;  %v2100_v7 = vpack.c.bf16 %v2074_v19, %v2073_v62  ;;  %v6804_v53 = vpack.c.bf16 %v1845_v60, %v1844_v63  ;;  %v343_v19 = vmul.f32 0.5, %v311_v1  ;;  %v6825_v63 = vld [vmem:[%s8541_s2] ss:$0 sm:$0xff]  ;;  %v1619_v1 = vld [vmem:[#allocation2 + $0xb1] sm:$0xff] }
 0x167   : > { %v1139_v27 = vadd.f32 %v1090_v48, %v911_v43  ;;  %6036 = vtanh.f32 %v502_v8 }
 0x168   : > { %8578 = vst [vmem:[#allocation14_spill] sm:$0xff] %v6804_v53  ;;  %6038 = vtanh.f32 %v503_v36 }
 0x16b   : > { %v1318_v56 = vpop.f32.mrf.mxu2 }
 0x16c   : > { %v6800_v44 = vadd.f32 %v1318_v56, %v1139_v27  ;;  %v1511_v14 = vpop.f32.mrf.mxu3  ;;  %v865_v46 = vpop.f32.mrf.mxu0 }
 0x16d   : > { %v6807_v43 = vadd.f32 %v1511_v14, %v6621_v30  ;;  %v912_v23 = vadd.f32 %v6501_v9, %v865_v46  ;;  %v6037_v60 = vpop.eup %6036  ;;  %v342_v9 = vmul.f32 0.5, %v310_v13  ;;  %v1618_v13 = vld [vmem:[#allocation2 + $0xa9] sm:$0xff] }
 0x16e   : > { %v1093_v48 = vpop.f32.mrf.mxu1  ;;  %v6039_v30 = vpop.eup %6038  ;;  %v566_v5 = vadd.f32 1.0, %v6037_v60  ;;  %v1405_v60 = vld [vmem:[#allocation2 + $0x158] sm:$0xff] }
 0x16f   : > { %v1140_v32 = vadd.f32 %v1093_v48, %v912_v23  ;;  %5641 = vmatmul.msk.bf16.gmra.mxu0 %vm600_vm1, %v6802_v18  ;;  %v567_v56 = vadd.f32 1.0, %v6039_v30  ;;  %v1846_v23 = vld [vmem:[#allocation2 + $0xaa] sm:$0xff]  ;;  %v6832_v30 = vpack.c.bf16 %v1619_v1, %v1618_v13 }
 0x170   : > { %5685 = vmatmul.msk.bf16.gmra.mxu2 %vm600_vm1, %v2100_v7  ;;  %v598_v7 = vmul.f32 %v566_v5, %v342_v9 }
 0x171   : > { %5663 = vmatmul.msk.bf16.gmra.mxu1 %vm600_vm1, %v6804_v53  ;;  %5626 = vmatmul.msk.bf16.gmra.mxu3 %vm600_vm1, %v6657_v41  ;;  %v599_v14 = vmul.f32 %v567_v56, %v343_v19  ;;  %8579 = vst [vmem:[#allocation15_spill] sm:$0xff] %v6832_v30 }
 0x172   : > { %687 = vst.msk [vmem:[#allocation2 + $0x181] sm:$0xff] %vm600_vm1, %v598_v7 }
 0x173   : > { %v1321_v31 = vpop.f32.mrf.mxu2  ;;  %688 = vst.msk [vmem:[#allocation2 + $0x189] sm:$0xff] %vm600_vm1, %v599_v14 }
 0x174   : > { %v6817_v62 = vadd.f32 %v1321_v31, %v1140_v32  ;;  %v1514_v61 = vpop.f32.mrf.mxu3  ;;  %v867_v27 = vpop.f32.mrf.mxu0  ;;  %v1404_v32 = vld [vmem:[#allocation2 + $0x150] sm:$0xff] }
 0x175   : > { %v6820_v6 = vadd.f32 %v1514_v61, %v6650_v59  ;;  %v913_v8 = vadd.f32 %v6825_v63, %v867_v27  ;;  %v1847_v59 = vld [vmem:[#allocation2 + $0xb2] sm:$0xff] }
 0x176   : > { %v1095_v36 = vpop.f32.mrf.mxu1  ;;  %v6834_v9 = vpack.c.bf16 %v1847_v59, %v1846_v23 }
 0x177   : > { %v1141_v46 = vadd.f32 %v1095_v36, %v913_v8  ;;  %v6840_v8 = vpack.c.bf16 %v1405_v60, %v1404_v32  ;;  %v1848_v32 = vld [vmem:[#allocation2 + $0xc2] sm:$0xff]  ;;  %v1849_v60 = vld [vmem:[#allocation2 + $0xca] sm:$0xff] }
 0x178   : > { %8580 = vst [vmem:[#allocation16_spill] sm:$0xff] %v6834_v9  ;;  %v6860_v53 = vpack.c.bf16 %v1849_v60, %v1848_v32 }
 0x17a   : > { %8582 = vst [vmem:[#allocation18_spill] sm:$0xff] %v6860_v53 }
 0x17b   : > { %v1323_v48 = vpop.f32.mrf.mxu2 }
 0x17c   : > { %v6830_v31 = vadd.f32 %v1323_v48, %v1141_v46  ;;  %v1516_v61 = vpop.f32.mrf.mxu3  ;;  %v870_v27 = vpop.f32.mrf.mxu0  ;;  %v1620_v48 = vld [vmem:[#allocation2 + $0xc1] sm:$0xff] }
 0x17d   : > { %v6837_v19 = vadd.f32 %v1516_v61, %v6655_v22  ;;  %v914_v5 = vadd.f32 %v6825_v63, %v870_v27  ;;  %v1406_v27 = vld [vmem:[#allocation2 + $0x168] sm:$0xff] }
 0x17e   : > { %v1098_v56 = vpop.f32.mrf.mxu1 }
 0x17f   : > { %v1142_v36 = vadd.f32 %v1098_v56, %v914_v5  ;;  %5642 = vmatmul.msk.bf16.gmra.mxu0 %vm600_vm1, %v6832_v30  ;;  %v1407_v5 = vld [vmem:[#allocation2 + $0x170] sm:$0xff] }
 0x180   : > { %5686 = vmatmul.msk.bf16.gmra.mxu2 %vm600_vm1, %v6531_v12  ;;  %v1621_v12 = vld [vmem:[#allocation2 + $0xc9] sm:$0xff] }
 0x181   : > { %5664 = vmatmul.msk.bf16.gmra.mxu1 %vm600_vm1, %v6834_v9  ;;  %5627 = vmatmul.msk.bf16.gmra.mxu3 %vm600_vm1, %v6840_v8 }
 0x183   : > { %v1326_v22 = vpop.f32.mrf.mxu2 }
 0x184   : > { %v6850_v7 = vadd.f32 %v1326_v22, %v1142_v36  ;;  %v1519_v14 = vpop.f32.mrf.mxu3  ;;  %v872_v46 = vpop.f32.mrf.mxu0  ;;  %v6858_v36 = vpack.c.bf16 %v1621_v12, %v1620_v48 }
 0x185   : > { %v6853_v13 = vadd.f32 %v1519_v14, %v6672_v55  ;;  %v915_v1 = vadd.f32 %v6825_v63, %v872_v46 }
 0x186   : > { %v1100_v23 = vpop.f32.mrf.mxu1  ;;  %8581 = vst [vmem:[#allocation17_spill] sm:$0xff] %v6858_v36 }
 0x187   : > { %v1143_v59 = vadd.f32 %v1100_v23, %v915_v1  ;;  %v6866_v1 = vpack.c.bf16 %v1407_v5, %v1406_v27  ;;  %v1622_v27 = vld [vmem:[#allocation2 + $0xd9] sm:$0xff]  ;;  %v891_v5 = vadd.f32 %v6825_v63, %v6541_v33 }
 0x18b   : > { %v1328_v61 = vpop.f32.mrf.mxu2 }
 0x18c   : > { %v6856_v56 = vadd.f32 %v1328_v61, %v1143_v59  ;;  %v1521_v22 = vpop.f32.mrf.mxu3  ;;  %v875_v9 = vpop.f32.mrf.mxu0 }
 0x18d   : > { %v6863_v55 = vadd.f32 %v1521_v22, %v6678_v47  ;;  %v916_v14 = vadd.f32 %v6825_v63, %v875_v9  ;;  %v1850_v22 = vld [vmem:[#allocation2 + $0xda] sm:$0xff] }
 0x18e   : > { %v1103_v46 = vpop.f32.mrf.mxu1 }
 0x18f   : > { %v1144_v23 = vadd.f32 %v1103_v46, %v916_v14  ;;  %5643 = vmatmul.msk.bf16.gmra.mxu0 %vm600_vm1, %v6858_v36  ;;  %v1851_v14 = vld [vmem:[#allocation2 + $0xe2] sm:$0xff] }
 0x190   : > { %5687 = vmatmul.msk.bf16.gmra.mxu2 %vm600_vm1, %v6549_v52  ;;  %v1623_v52 = vld [vmem:[#allocation2 + $0xe1] sm:$0xff] }
 0x191   : > { %5665 = vmatmul.msk.bf16.gmra.mxu1 %vm600_vm1, %v6860_v53  ;;  %5628 = vmatmul.msk.bf16.gmra.mxu3 %vm600_vm1, %v6866_v1  ;;  %v1408_v53 = vld [vmem:[#allocation2 + $0x180] sm:$0xff]  ;;  %v6886_v36 = vpack.c.bf16 %v1623_v52, %v1622_v27 }
 0x193   : > { %v1331_v47 = vpop.f32.mrf.mxu2 }
 0x194   : > { %v6876_v59 = vadd.f32 %v1331_v47, %v1144_v23  ;;  %v1524_v9 = vpop.f32.mrf.mxu3  ;;  %v877_v48 = vpop.f32.mrf.mxu0  ;;  %v1409_v23 = vld [vmem:[#allocation2 + $0x188] sm:$0xff] }
 0x195   : > { %v6879_v12 = vadd.f32 %v1524_v9, %v6689_v37  ;;  %v917_v32 = vadd.f32 %v6825_v63, %v877_v48  ;;  %v1119_v48 = vadd.f32 %v6543_v40, %v891_v5 }
 0x196   : > { %8583 = vst [vmem:[#allocation19_spill] sm:$0xff] %v6876_v59  ;;  %v1105_v60 = vpop.f32.mrf.mxu1  ;;  %v6888_v59 = vpack.c.bf16 %v1851_v14, %v1850_v22  ;;  %v1852_v14 = vld [vmem:[#allocation2 + $0xf2] sm:$0xff] }
 0x197   : > { %v1145_v61 = vadd.f32 %v1105_v60, %v917_v32  ;;  %v6895_v60 = vpack.c.bf16 %v1409_v23, %v1408_v53  ;;  %v1347_v40 = vadd.f32 %v6547_v49, %v1119_v48 }
 0x19b   : > { %v1333_v46 = vpop.f32.mrf.mxu2 }
 0x19c   : > { %v6884_v47 = vadd.f32 %v1333_v46, %v1145_v61  ;;  %v1526_v37 = vpop.f32.mrf.mxu3  ;;  %v1722_v9 = vpop.f32.mrf.mxu0  ;;  %v1853_v46 = vld [vmem:[#allocation2 + $0xfa] sm:$0xff] }
 0x19d   : > { %v6892_v32 = vadd.f32 %v1526_v37, %v6694_v0  ;;  %v1802_v33 = vadd.f32 %v1722_v9, %v6713_v17  ;;  %v1575_v17 = vadd.f32 %v6720_v42, %v1347_v40  ;;  %v6914_v48 = vpack.c.bf16 %v1853_v46, %v1852_v14 }
 0x19e   : > { %v1950_v63 = vpop.f32.mrf.mxu1 }
 0x19f   : > { %v2030_v30 = vadd.f32 %v1950_v63, %v1802_v33  ;;  %5644 = vmatmul.msk.bf16.gmra.mxu0 %vm600_vm1, %v6886_v36 }
 0x1a0   : > { %5688 = vmatmul.msk.bf16.gmra.mxu2 %vm600_vm1, %v6569_v51 }
 0x1a1   : > { %5666 = vmatmul.msk.bf16.gmra.mxu1 %vm600_vm1, %v6888_v59  ;;  %5629 = vmatmul.msk.bf16.gmra.mxu3 %vm600_vm1, %v6895_v60 }
 0x1a3   : > { %v2179_v0 = vpop.f32.mrf.mxu2 }
 0x1a4   : > { %v6907_v53 = vadd.f32 %v2179_v0, %v2030_v30  ;;  %v1529_v61 = vpop.f32.mrf.mxu3  ;;  %v1724_v27 = vpop.f32.mrf.mxu0 }
 0x1a5   : > { %v6910_v52 = vadd.f32 %v1529_v61, %v6710_v21  ;;  %v1803_v5 = vadd.f32 %v1724_v27, %v1575_v17 }
 0x1a6   : > { %v1952_v51 = vpop.f32.mrf.mxu1 }
 0x1a7   : > { %v2031_v22 = vadd.f32 %v1952_v51, %v1803_v5 }
 0x1ab   : > { %v2181_v23 = vpop.f32.mrf.mxu2 }
 0x1ac   : > { %v6912_v49 = vadd.f32 %v2181_v23, %v2031_v22  ;;  %v1531_v37 = vpop.f32.mrf.mxu3  ;;  %v1727_v9 = vpop.f32.mrf.mxu0 }
 0x1ad   : > { %v6917_v42 = vadd.f32 %v1531_v37, %v6716_v25  ;;  %v1804_v30 = vadd.f32 %v1727_v9, %v6742_v29 }
 0x1ae   : > { %v1955_v33 = vpop.f32.mrf.mxu1 }
 0x1af   : > { %v2032_v21 = vadd.f32 %v1955_v33, %v1804_v30  ;;  %5645 = vmatmul.msk.bf16.gmra.mxu0 %vm600_vm1, %v6571_v24 }
 0x1b0   : > { %5689 = vmatmul.msk.bf16.gmra.mxu2 %vm600_vm1, %v6590_v10 }
 0x1b1   : > { %5667 = vmatmul.msk.bf16.gmra.mxu1 %vm600_vm1, %v6914_v48  ;;  %5702 = vmatmul.msk.bf16.vlgmr.msra.gmra.mxu3 %vm600_vm1, %v6696_v15 }
 0x1b3   : > { %v2184_v63 = vpop.f32.mrf.mxu2 }
 0x1b4   : > { %v6928_v40 = vadd.f32 %v2184_v63, %v2032_v21  ;;  %v1534_v25 = vpop.f32.mrf.mxu3  ;;  %v1729_v0 = vpop.f32.mrf.mxu0 }
 0x1b5   : > { %v6931_v29 = vadd.f32 %v1534_v25, %v6738_v20  ;;  %v1805_v17 = vadd.f32 %v1729_v0, %v6759_v28 }
 0x1b6   : > { %v1957_v24 = vpop.f32.mrf.mxu1 }
 0x1b7   : > { %v2033_v61 = vadd.f32 %v1957_v24, %v1805_v17 }
 0x1bb   : > { %v2186_v27 = vpop.f32.mrf.mxu2 }
 0x1bc   : > { %v6934_v10 = vadd.f32 %v2186_v27, %v2033_v61  ;;  %v1536_v5 = vpop.f32.mrf.mxu3  ;;  %v1732_v51 = vpop.f32.mrf.mxu0 }
 0x1bd   : > { %v6937_v22 = vadd.f32 %v1536_v5, %v6752_v2  ;;  %v1806_v15 = vadd.f32 %v1732_v51, %v6772_v38 }
 0x1be   : > { %v1960_v14 = vpop.f32.mrf.mxu1 }
 0x1bf   : > { %v2034_v46 = vadd.f32 %v1960_v14, %v1806_v15  ;;  %5646 = vmatmul.msk.bf16.gmra.mxu0 %vm600_vm1, %v6596_v16 }
 0x1c0   : > { %5690 = vmatmul.msk.bf16.gmra.mxu2 %vm600_vm1, %v6623_v50 }
 0x1c1   : > { %5668 = vmatmul.msk.bf16.gmra.mxu1 %vm600_vm1, %v6592_v26  ;;  %5703 = vmatmul.msk.bf16.gmra.mxu3 %vm600_vm1, %v6718_v11 }
 0x1c3   : > { %v2189_v20 = vpop.f32.mrf.mxu2 }
 0x1c4   : > { %v6948_v28 = vadd.f32 %v2189_v20, %v2034_v46  ;;  %v1539_v2 = vpop.f32.mrf.mxu3  ;;  %v1734_v23 = vpop.f32.mrf.mxu0 }
 0x1c5   : > { %v6951_v38 = vadd.f32 %v1539_v2, %v6769_v39  ;;  %v1807_v37 = vadd.f32 %v1734_v23, %v6782_v4 }
 0x1c6   : > { %v1962_v16 = vpop.f32.mrf.mxu1 }
 0x1c7   : > { %v2035_v9 = vadd.f32 %v1962_v16, %v1807_v37  ;;  %v3177_v37 = vld [vmem:[%s8542_s3] sm:$0x3] }
 0x1c8   : > { %v3228_v16 = vsel %vm3226_vm3, %v3177_v37, 0 }
 0x1c9   : > { %3237 = vmatpush.bf16.msra.mxu1 %v3228_v16 }
 0x1cb   : > { %v2191_v30 = vpop.f32.mrf.mxu2 }
 0x1cc   : > { %v6954_v50 = vadd.f32 %v2191_v30, %v2035_v9  ;;  %v1541_v33 = vpop.f32.mrf.mxu3  ;;  %v1737_v26 = vpop.f32.mrf.mxu0  ;;  %v1632_v9 = vld [vmem:[#allocation2 + $0x151] sm:$0xff]  ;;  %v1633_v30 = vld [vmem:[#allocation2 + $0x159] sm:$0xff] }
 0x1cd   : > { %v6957_v21 = vadd.f32 %v1541_v33, %v6775_v35  ;;  %v1808_v11 = vadd.f32 %v1737_v26, %v6797_v3  ;;  %v1860_v33 = vld [vmem:[#allocation2 + $0x152] sm:$0xff]  ;;  %v1861_v26 = vld [vmem:[#allocation2 + $0x15a] sm:$0xff] }
 0x1ce   : > { %v1965_v63 = vpop.f32.mrf.mxu1 }
 0x1cf   : > { %v2036_v25 = vadd.f32 %v1965_v63, %v1808_v11  ;;  %5647 = vmatmul.msk.bf16.gmra.mxu0 %vm600_vm1, %v6627_v34 }
 0x1d0   : > { %5691 = vmatmul.msk.bf16.gmra.mxu2 %vm600_vm1, %v6657_v41 }
 0x1d1   : > { %5669 = vmatmul.msk.bf16.gmra.mxu1 %vm600_vm1, %v6625_v54  ;;  %5704 = vmatmul.msk.bf16.gmra.mxu3 %vm600_vm1, %v6754_v58 }
 0x1d3   : > { %v2194_v39 = vpop.f32.mrf.mxu2 }
 0x1d4   : > { %v6968_v4 = vadd.f32 %v2194_v39, %v2036_v25  ;;  %v1544_v35 = vpop.f32.mrf.mxu3  ;;  %v1739_v0 = vpop.f32.mrf.mxu0  ;;  %v1879_v25 = vpack.c.bf16 %v1861_v26, %v1860_v33 }
 0x1d5   : > { %v6971_v3 = vadd.f32 %v1544_v35, %v6794_v57  ;;  %v1809_v17 = vadd.f32 %v1739_v0, %v6807_v43  ;;  %v8584_v57 = vld [vmem:[#allocation4_spill] sm:$0xff] }
 0x1d6   : > { %v1967_v34 = vpop.f32.mrf.mxu1  ;;  %v8585_v43 = vld [vmem:[#allocation12_spill] sm:$0xff] }
 0x1d7   : > { %v2037_v24 = vadd.f32 %v1967_v34, %v1809_v17 }
 0x1db   : > { %v2196_v61 = vpop.f32.mrf.mxu2 }
 0x1dc   : > { %v6974_v41 = vadd.f32 %v2196_v61, %v2037_v24  ;;  %v1546_v27 = vpop.f32.mrf.mxu3  ;;  %v1742_v54 = vpop.f32.mrf.mxu0 }
 0x1dd   : > { %v6977_v5 = vadd.f32 %v1546_v27, %v6800_v44  ;;  %v1810_v58 = vadd.f32 %v1742_v54, %v6820_v6  ;;  %v5756_v44 = vld [vmem:[%s8542_s3 + $0x2] sm:$0x3] }
 0x1de   : > { %v1970_v51 = vpop.f32.mrf.mxu1  ;;  %v3450_v14 = vsel %vm3226_vm3, %v5756_v44, 0 }
 0x1df   : > { %v2038_v15 = vadd.f32 %v1970_v51, %v1810_v58  ;;  %5648 = vmatmul.msk.bf16.gmra.mxu0 %vm600_vm1, %v6661_v45  ;;  %3459 = vmatpush.bf16.msra.mxu2 %v3450_v14  ;;  %v1634_v58 = vld [vmem:[#allocation2 + $0x169] sm:$0xff] }
 0x1e0   : > { %5692 = vmatmul.msk.bf16.gmra.mxu2 %vm600_vm1, %v6840_v8  ;;  %v1862_v51 = vld [vmem:[#allocation2 + $0x16a] sm:$0xff] }
 0x1e1   : > { %5670 = vmatmul.msk.bf16.gmra.mxu1 %vm600_vm1, %v8584_v57  ;;  %5705 = vmatmul.msk.bf16.gmra.mxu3 %vm600_vm1, %v8585_v43 }
 0x1e3   : > { %v2199_v6 = vpop.f32.mrf.mxu2 }
 0x1e4   : > { %v6992_v46 = vadd.f32 %v2199_v6, %v2038_v15  ;;  %v1549_v45 = vpop.f32.mrf.mxu3  ;;  %v1744_v20 = vpop.f32.mrf.mxu0  ;;  %v1863_v15 = vld [vmem:[#allocation2 + $0x172] sm:$0xff] }
 0x1e5   : > { %v6995_v8 = vadd.f32 %v1549_v45, %v6817_v62  ;;  %v6998_v2 = vadd.f32 %v1744_v20, %v6837_v19  ;;  %v7008_v62 = vpack.c.bf16 %v1633_v30, %v1632_v9  ;;  %v1880_v6 = vpack.c.bf16 %v1863_v15, %v1862_v51  ;;  %v8586_v20 = vld [vmem:[#allocation15_spill] sm:$0xff] }
 0x1e6   : > { %v7000_v23 = vpop.f32.mrf.mxu1  ;;  %v8587_v30 = vld [vmem:[#allocation19_spill] sm:$0xff] }
 0x1eb   : > { %v7006_v11 = vpop.f32.mrf.mxu2 }
 0x1ec   : > { %v1551_v63 = vpop.f32.mrf.mxu3  ;;  %v1747_v19 = vpop.f32.mrf.mxu0 }
 0x1ed   : > { %v7011_v39 = vadd.f32 %v1551_v63, %v6830_v31  ;;  %v1812_v35 = vadd.f32 %v1747_v19, %v6853_v13  ;;  %v1636_v63 = vld [vmem:[#allocation2 + $0x181] sm:$0xff]  ;;  %v2093_v19 = vld [vmem:[#allocation2 + $0x198] sm:$0xff] }
 0x1ee   : > { %v1975_v0 = vpop.f32.mrf.mxu1 }
 0x1ef   : > { %v2040_v17 = vadd.f32 %v1975_v0, %v1812_v35  ;;  %5649 = vmatmul.msk.bf16.gmra.mxu0 %vm600_vm1, %v7008_v62  ;;  %v1864_v35 = vld [vmem:[#allocation2 + $0x182] sm:$0xff]  ;;  %v1865_v0 = vld [vmem:[#allocation2 + $0x18a] sm:$0xff] }
 0x1f0   : > { %5693 = vmatmul.msk.bf16.gmra.mxu2 %vm600_vm1, %v6866_v1  ;;  %v1635_v1 = vld [vmem:[#allocation2 + $0x171] sm:$0xff] }
 0x1f1   : > { %5671 = vmatmul.msk.bf16.gmra.mxu1 %vm600_vm1, %v1879_v25  ;;  %5706 = vmatmul.msk.bf16.gmra.mxu3 %vm600_vm1, %v6802_v18  ;;  %v7033_v18 = vpack.c.bf16 %v1635_v1, %v1634_v58  ;;  %v2094_v25 = vld [vmem:[#allocation2 + $0x1a0] sm:$0xff]  ;;  %v1881_v1 = vpack.c.bf16 %v1865_v0, %v1864_v35 }
 0x1f2   : > { %v8591_v0 = vld [vmem:[#allocation8_spill] sm:$0xff] }
 0x1f3   : > { %v2204_v34 = vpop.f32.mrf.mxu2 }
 0x1f4   : > { %v7021_v24 = vadd.f32 %v2204_v34, %v2040_v17  ;;  %v1554_v31 = vpop.f32.mrf.mxu3  ;;  %v1749_v61 = vpop.f32.mrf.mxu0 }
 0x1f5   : > { %v7024_v13 = vadd.f32 %v1554_v31, %v6850_v7  ;;  %v7027_v27 = vadd.f32 %v1749_v61, %v6863_v55  ;;  %v2110_v31 = vpack.c.bf16 %v2094_v25, %v2093_v19 }
 0x1f6   : > { %v7029_v54 = vpop.f32.mrf.mxu1 }
 0x1fb   : > { %v7031_v57 = vpop.f32.mrf.mxu2 }
 0x1fc   : > { %v1556_v43 = vpop.f32.mrf.mxu3  ;;  %v1752_v44 = vpop.f32.mrf.mxu0 }
 0x1fd   : > { %v7036_v14 = vadd.f32 %v1556_v43, %v6856_v56  ;;  %v1814_v7 = vadd.f32 %v1752_v44, %v6879_v12  ;;  %v8588_v44 = vld [vmem:[#allocation17_spill] sm:$0xff] }
 0x1fe   : > { %v1980_v55 = vpop.f32.mrf.mxu1 }
 0x1ff   : > { %v2042_v45 = vadd.f32 %v1980_v55, %v1814_v7  ;;  %5650 = vmatmul.msk.bf16.gmra.mxu0 %vm600_vm1, %v7033_v18 }
 0x200   : > { %5694 = vmatmul.msk.bf16.gmra.mxu2 %vm600_vm1, %v6895_v60  ;;  %v1637_v60 = vld [vmem:[#allocation2 + $0x189] sm:$0xff] }
 0x201   : > { %5672 = vmatmul.msk.bf16.gmra.mxu1 %vm600_vm1, %v1880_v6  ;;  %5707 = vmatmul.msk.bf16.gmra.mxu3 %vm600_vm1, %v8586_v20  ;;  %v7058_v34 = vpack.c.bf16 %v1637_v60, %v1636_v63  ;;  %v8590_v63 = vld [vmem:[#allocation6_spill] sm:$0xff] }
 0x203   : > { %v2209_v37 = vpop.f32.mrf.mxu2 }
 0x204   : > { %v7046_v16 = vadd.f32 %v2209_v37, %v2042_v45  ;;  %v1559_v56 = vpop.f32.mrf.mxu3  ;;  %v1754_v9 = vpop.f32.mrf.mxu0  ;;  %v8589_v45 = vld [vmem:[#allocation5_spill] sm:$0xff] }
 0x205   : > { %v7049_v12 = vadd.f32 %v1559_v56, %v8587_v30  ;;  %v7052_v33 = vadd.f32 %v1754_v9, %v6892_v32 }
 0x206   : > { %v7054_v26 = vpop.f32.mrf.mxu1 }
 0x20b   : > { %v7056_v17 = vpop.f32.mrf.mxu2 }
 0x20c   : > { %v1561_v61 = vpop.f32.mrf.mxu3  ;;  %v1757_v58 = vpop.f32.mrf.mxu0 }
 0x20d   : > { %v7061_v51 = vadd.f32 %v1561_v61, %v6884_v47  ;;  %v1816_v32 = vadd.f32 %v1757_v58, %v6910_v52 }
 0x20e   : > { %v1985_v15 = vpop.f32.mrf.mxu1 }
 0x20f   : > { %v2044_v43 = vadd.f32 %v1985_v15, %v1816_v32  ;;  %5651 = vmatmul.msk.bf16.gmra.mxu0 %vm600_vm1, %v7058_v34 }
 0x210   : > { %5695 = vmatmul.msk.bf16.gmra.mxu2 %vm600_vm1, %v2110_v31 }
 0x211   : > { %5673 = vmatmul.msk.bf16.gmra.mxu1 %vm600_vm1, %v1881_v1  ;;  %5708 = vmatmul.msk.bf16.gmra.mxu3 %vm600_vm1, %v8588_v44  ;;  %v8592_v1 = vld [vmem:[#allocation7_spill] sm:$0xff] }
 0x212   : > { %v2307_v44 = vld [vmem:[#allocation2 + $0xf1] sm:$0xff] }
 0x213   : > { %v2214_v6 = vpop.f32.mrf.mxu2 }
 0x214   : > { %v7070_v7 = vadd.f32 %v2214_v6, %v2044_v43  ;;  %v1564_v55 = vpop.f32.mrf.mxu3  ;;  %v1759_v47 = vpop.f32.mrf.mxu0  ;;  %v2308_v6 = vld [vmem:[#allocation2 + $0xf9] sm:$0xff] }
 0x215   : > { %v7073_v20 = vadd.f32 %v1564_v55, %v8589_v45  ;;  %v7076_v52 = vadd.f32 %v1759_v47, %v6917_v42 }
 0x216   : > { %v7078_v37 = vpop.f32.mrf.mxu1 }
 0x21b   : > { %v7080_v56 = vpop.f32.mrf.mxu2 }
 0x21c   : > { %v1566_v9 = vpop.f32.mrf.mxu3  ;;  %v1762_v30 = vpop.f32.mrf.mxu0 }
 0x21d   : > { %v7083_v60 = vadd.f32 %v1566_v9, %v8590_v63  ;;  %v1818_v19 = vadd.f32 %v1762_v30, %v6931_v29  ;;  %v2331_v63 = vpack.c.bf16 %v2308_v6, %v2307_v44  ;;  %v2310_v44 = vld [vmem:[#allocation2 + $0x111] sm:$0xff] }
 0x21e   : > { %v1990_v25 = vpop.f32.mrf.mxu1 }
 0x21f   : > { %v2046_v35 = vadd.f32 %v1990_v25, %v1818_v19  ;;  %5724 = vmatmul.msk.bf16.vlgmr.msra.gmra.mxu0 %vm600_vm1, %v8591_v0  ;;  %v8594_v25 = vld [vmem:[#allocation10_spill] sm:$0xff] }
 0x221   : > { %5709 = vmatmul.msk.bf16.gmra.mxu3 %vm600_vm1, %v6886_v36  ;;  %v8593_v36 = vld [vmem:[#allocation9_spill] sm:$0xff] }
 0x223   : > { %v2219_v42 = vpop.f32.mrf.mxu2 }
 0x224   : > { %v7090_v31 = vadd.f32 %v2219_v42, %v2046_v35  ;;  %v1569_v61 = vpop.f32.mrf.mxu3  ;;  %v1764_v58 = vpop.f32.mrf.mxu0 }
 0x225   : > { %v7093_v32 = vadd.f32 %v1569_v61, %v8592_v1  ;;  %v7096_v15 = vadd.f32 %v1764_v58, %v6937_v22  ;;  %v2309_v1 = vld [vmem:[#allocation2 + $0x109] sm:$0xff] }
 0x226   : > { %v7098_v29 = vpop.f32.mrf.mxu1 }
 0x22b   : > { %v7100_v43 = vpop.f32.mrf.mxu2 }
 0x22c   : > { %v1571_v55 = vpop.f32.mrf.mxu3  ;;  %v1767_v47 = vpop.f32.mrf.mxu0 }
 0x22d   : > { %v7103_v45 = vadd.f32 %v1571_v55, %v8593_v36  ;;  %v1820_v9 = vadd.f32 %v1767_v47, %v6951_v38 }
 0x22e   : > { %v1995_v30 = vpop.f32.mrf.mxu1 }
 0x22f   : > { %v2048_v19 = vadd.f32 %v1995_v30, %v1820_v9  ;;  %5725 = vmatmul.msk.bf16.gmra.mxu0 %vm600_vm1, %v8594_v25  ;;  %v2332_v9 = vpack.c.bf16 %v2310_v44, %v2309_v1  ;;  %v2311_v1 = vld [vmem:[#allocation2 + $0x121] sm:$0xff]  ;;  %v2312_v44 = vld [vmem:[#allocation2 + $0x129] sm:$0xff] }
 0x231   : > { %5710 = vmatmul.msk.bf16.gmra.mxu3 %vm600_vm1, %v2331_v63  ;;  %v8596_v63 = vld [vmem:[#allocation11_spill] sm:$0xff] }
 0x233   : > { %v2224_v22 = vpop.f32.mrf.mxu2 }
 0x234   : > { %v7109_v35 = vadd.f32 %v2224_v22, %v2048_v19  ;;  %v7111_v0 = vpop.f32.mrf.mxu3  ;;  %v1769_v42 = vpop.f32.mrf.mxu0 }
 0x235   : > { %v7114_v61 = vadd.f32 %v1769_v42, %v6957_v21 }
 0x236   : > { %v7116_v58 = vpop.f32.mrf.mxu1 }
 0x23b   : > { %v7118_v38 = vpop.f32.mrf.mxu2 }
 0x23c   : > { %8595 = vst [vmem:[#allocation4_spill] sm:$0xff] %v7118_v38  ;;  %v7120_v6 = vpop.f32.mrf.mxu3  ;;  %v1772_v55 = vpop.f32.mrf.mxu0 }
 0x23d   : > { %v1822_v47 = vadd.f32 %v1772_v55, %v6971_v3 }
 0x23e   : > { %v2000_v36 = vpop.f32.mrf.mxu1 }
 0x23f   : > { %v2050_v30 = vadd.f32 %v2000_v36, %v1822_v47  ;;  %5726 = vmatmul.msk.bf16.gmra.mxu0 %vm600_vm1, %v8596_v63 }
 0x241   : > { %5711 = vmatmul.msk.bf16.gmra.mxu3 %vm600_vm1, %v2332_v9 }
 0x243   : > { %v2229_v21 = vpop.f32.mrf.mxu2 }
 0x244   : > { %v7126_v19 = vadd.f32 %v2229_v21, %v2050_v30  ;;  %v7128_v25 = vpop.f32.mrf.mxu3  ;;  %v1774_v22 = vpop.f32.mrf.mxu0  ;;  %v2333_v30 = vpack.c.bf16 %v2312_v44, %v2311_v1  ;;  %v8601_v21 = vld [vmem:[#allocation13_spill] sm:$0xff]  ;;  %v2313_v1 = vld [vmem:[#allocation2 + $0x139] sm:$0xff] }
 0x245   : > { %v7131_v42 = vadd.f32 %v1774_v22, %v6977_v5  ;;  %v2314_v44 = vld [vmem:[#allocation2 + $0x141] sm:$0xff] }
 0x246   : > { %8597 = vst [vmem:[#allocation12_spill] sm:$0xff] %v7126_v19  ;;  %v7133_v38 = vpop.f32.mrf.mxu1 }
 0x247   : > { %8598 = vst [vmem:[#allocation15_spill] sm:$0xff] %v7131_v42 }
 0x248   : > { %8599 = vst [vmem:[#allocation19_spill] sm:$0xff] %v7133_v38 }
 0x24b   : > { %v7135_v3 = vpop.f32.mrf.mxu2 }
 0x24c   : > { %8600 = vst [vmem:[#allocation17_spill] sm:$0xff] %v7135_v3  ;;  %v7137_v55 = vpop.f32.mrf.mxu3  ;;  %v1777_v47 = vpop.f32.mrf.mxu0 }
 0x24d   : > { %v1824_v36 = vadd.f32 %v1777_v47, %v6995_v8 }
 0x24e   : > { %v2005_v9 = vpop.f32.mrf.mxu1 }
 0x24f   : > { %v2052_v63 = vadd.f32 %v2005_v9, %v1824_v36  ;;  %5727 = vmatmul.msk.bf16.gmra.mxu0 %vm600_vm1, %v8601_v21 }
 0x251   : > { %5712 = vmatmul.msk.bf16.gmra.mxu3 %vm600_vm1, %v2333_v30 }
 0x253   : > { %v2234_v5 = vpop.f32.mrf.mxu2 }
 0x254   : > { %v7143_v22 = vadd.f32 %v2234_v5, %v2052_v63  ;;  %v7145_v38 = vpop.f32.mrf.mxu3  ;;  %v1779_v3 = vpop.f32.mrf.mxu0  ;;  %v2334_v63 = vpack.c.bf16 %v2314_v44, %v2313_v1  ;;  %v8606_v5 = vld [vmem:[#allocation14_spill] sm:$0xff] }
 0x255   : > { %v7148_v42 = vadd.f32 %v1779_v3, %v7011_v39 }
 0x256   : > { %8602 = vst [vmem:[#allocation5_spill] sm:$0xff] %v7143_v22  ;;  %v7150_v19 = vpop.f32.mrf.mxu1 }
 0x257   : > { %8603 = vst [vmem:[#allocation6_spill] sm:$0xff] %v7148_v42 }
 0x258   : > { %8604 = vst [vmem:[#allocation8_spill] sm:$0xff] %v7150_v19 }
 0x25b   : > { %v7152_v8 = vpop.f32.mrf.mxu2 }
 0x25c   : > { %8605 = vst [vmem:[#allocation7_spill] sm:$0xff] %v7152_v8  ;;  %v7154_v47 = vpop.f32.mrf.mxu3  ;;  %v1782_v36 = vpop.f32.mrf.mxu0 }
 0x25d   : > { %v1826_v9 = vadd.f32 %v1782_v36, %v7024_v13 }
 0x25e   : > { %v2010_v30 = vpop.f32.mrf.mxu1 }
 0x25f   : > { %v2054_v21 = vadd.f32 %v2010_v30, %v1826_v9  ;;  %5728 = vmatmul.msk.bf16.gmra.mxu0 %vm600_vm1, %v8606_v5 }
 0x261   : > { %5713 = vmatmul.msk.bf16.gmra.mxu3 %vm600_vm1, %v2334_v63  ;;  %v8609_v63 = vld [vmem:[#allocation16_spill] sm:$0xff] }
 0x263   : > { %v2239_v39 = vpop.f32.mrf.mxu2 }
 0x264   : > { %v7160_v3 = vadd.f32 %v2239_v39, %v2054_v21  ;;  %v7162_v19 = vpop.f32.mrf.mxu3  ;;  %v1784_v8 = vpop.f32.mrf.mxu0 }
 0x265   : > { %v7165_v42 = vadd.f32 %v1784_v8, %v7036_v14 }
 0x266   : > { %v7167_v22 = vpop.f32.mrf.mxu1 }
 0x267   : > { %8607 = vst [vmem:[#allocation9_spill] sm:$0xff] %v7167_v22  ;;  %v8612_v22 = vld [vmem:[#allocation18_spill] sm:$0xff] }
 0x26b   : > { %v7169_v13 = vpop.f32.mrf.mxu2 }
 0x26c   : > { %8608 = vst [vmem:[#allocation10_spill] sm:$0xff] %v7169_v13  ;;  %v7171_v1 = vpop.f32.mrf.mxu3  ;;  %v1787_v44 = vpop.f32.mrf.mxu0 }
 0x26d   : > { %v1828_v36 = vadd.f32 %v1787_v44, %v7049_v12 }
 0x26e   : > { %v2015_v9 = vpop.f32.mrf.mxu1 }
 0x26f   : > { %v2056_v30 = vadd.f32 %v2015_v9, %v1828_v36  ;;  %5729 = vmatmul.msk.bf16.gmra.mxu0 %vm600_vm1, %v8609_v63 }
 0x271   : > { %5714 = vmatmul.msk.bf16.gmra.mxu3 %vm600_vm1, %v7008_v62 }
 0x273   : > { %v2244_v21 = vpop.f32.mrf.mxu2 }
 0x274   : > { %v7178_v14 = vadd.f32 %v2244_v21, %v2056_v30  ;;  %v7180_v8 = vpop.f32.mrf.mxu3  ;;  %v1789_v5 = vpop.f32.mrf.mxu0 }
 0x275   : > { %v7183_v39 = vadd.f32 %v1789_v5, %v7061_v51 }
 0x276   : > { %v7185_v13 = vpop.f32.mrf.mxu1 }
 0x277   : > { %8610 = vst [vmem:[#allocation11_spill] sm:$0xff] %v7185_v13 }
 0x27b   : > { %v7187_v12 = vpop.f32.mrf.mxu2 }
 0x27c   : > { %8611 = vst [vmem:[#allocation13_spill] sm:$0xff] %v7187_v12  ;;  %v7189_v44 = vpop.f32.mrf.mxu3  ;;  %v1792_v36 = vpop.f32.mrf.mxu0 }
 0x27d   : > { %v1830_v9 = vadd.f32 %v1792_v36, %v7073_v20  ;;  %v8616_v20 = vmov 0.0  }
 0x27e   : > { %v2020_v63 = vpop.f32.mrf.mxu1  ;;  %3040 = vst.msk [vmem:[#allocation3 + $0x18] sm:$0xff] %vm3035_vm4, %v8616_v20 }
 0x27f   : > { %v2058_v62 = vadd.f32 %v2020_v63, %v1830_v9  ;;  %5730 = vmatmul.msk.bf16.gmra.mxu0 %vm600_vm1, %v8612_v22  ;;  %3041 = vst.msk [vmem:[#allocation3 + $0x20] sm:$0xff] %vm3035_vm4, %v8616_v20 }
 0x280   : > { %3036 = vst.msk [vmem:[#allocation3] sm:$0xff] %vm3035_vm4, %v8616_v20 }
 0x281   : > { %5715 = vmatmul.msk.bf16.gmra.mxu3 %vm600_vm1, %v7033_v18  ;;  %3037 = vst.msk [vmem:[#allocation3 + $0x8] sm:$0xff] %vm3035_vm4, %v8616_v20 }
 0x282   : > { %3043 = vst.msk [vmem:[#allocation3 + $0x30] sm:$0xff] %vm3035_vm4, %v8616_v20 }
 0x283   : > { %v2249_v30 = vpop.f32.mrf.mxu2  ;;  %3044 = vst.msk [vmem:[#allocation3 + $0x38] sm:$0xff] %vm3035_vm4, %v8616_v20 }
 0x284   : > { %v7196_v51 = vadd.f32 %v2249_v30, %v2058_v62  ;;  %v7198_v21 = vpop.f32.mrf.mxu3  ;;  %v1794_v5 = vpop.f32.mrf.mxu0  ;;  %3046 = vst.msk [vmem:[#allocation3 + $0x48] sm:$0xff] %vm3035_vm4, %v8616_v20 }
 0x285   : > { %v7201_v12 = vadd.f32 %v1794_v5, %v7083_v60  ;;  %3047 = vst.msk [vmem:[#allocation3 + $0x50] sm:$0xff] %vm3035_vm4, %v8616_v20 }
 0x286   : > { %8613 = vst [vmem:[#allocation14_spill] sm:$0xff] %v7196_v51  ;;  %v7203_v13 = vpop.f32.mrf.mxu1 }
 0x287   : > { %8614 = vst [vmem:[#allocation16_spill] sm:$0xff] %v7201_v12 }
 0x288   : > { %8615 = vst [vmem:[#allocation18_spill] sm:$0xff] %v7203_v13 }
 0x289   : > { %3049 = vst.msk [vmem:[#allocation3 + $0x60] sm:$0xff] %vm3035_vm4, %v8616_v20 }
 0x28a   : > { %3050 = vst.msk [vmem:[#allocation3 + $0x68] sm:$0xff] %vm3035_vm4, %v8616_v20 }
 0x28b   : > { %v7213_v18 = vpop.f32.mrf.mxu2  ;;  %3052 = vst.msk [vmem:[#allocation3 + $0x78] sm:$0xff] %vm3035_vm4, %v8616_v20 }
 0x28c   : > { %8617 = vst [vmem:[#allocation20_spill] sm:$0xff] %v7213_v18  ;;  %v7219_v60 = vpop.f32.mrf.mxu3  ;;  %v1797_v22 = vpop.f32.mrf.mxu0 }
 0x28d   : > { %v1832_v36 = vadd.f32 %v1797_v22, %v7093_v32  ;;  %3053 = vst.msk [vmem:[#allocation3 + $0x80] sm:$0xff] %vm3035_vm4, %v8616_v20 }
 0x28e   : > { %v2025_v9 = vpop.f32.mrf.mxu1  ;;  %3055 = vst.msk [vmem:[#allocation3 + $0x90] sm:$0xff] %vm3035_vm4, %v8616_v20 }
 0x28f   : > { %v2060_v63 = vadd.f32 %v2025_v9, %v1832_v36  ;;  %5731 = vmatmul.msk.bf16.gmra.mxu0 %vm600_vm1, %v6888_v59  ;;  %v5773_v59 = vld [vmem:[%s8542_s3 + $0x4] sm:$0x3]  ;;  %3056 = vst.msk [vmem:[#allocation3 + $0x98] sm:$0xff] %vm3035_vm4, %v8616_v20  ;;  %v3129_v36 = vld [vmem:[#allocation3] sm:$0xff]  ;;  %v3130_v9 = vld [vmem:[#allocation3 + $0x8] sm:$0xff] }
 0x290   : > { %v3672_v30 = vsel %vm3226_vm3, %v5773_v59, 0  ;;  %3058 = vst.msk [vmem:[#allocation3 + $0xa8] sm:$0xff] %vm3035_vm4, %v8616_v20  ;;  %v2487_v59 = vadd.f32 %v7111_v0, %v6907_v53  ;;  %v2488_v0 = vadd.f32 %v7120_v6, %v6912_v49  ;;  %v2537_v6 = vld [vmem:[#allocation2 + $0x10a] sm:$0xff] }
 0x291   : > { %5716 = vmatmul.msk.bf16.gmra.mxu3 %vm600_vm1, %v7058_v34  ;;  %3059 = vst.msk [vmem:[#allocation3 + $0xb0] sm:$0xff] %vm3035_vm4, %v8616_v20 }
 0x292   : > { %3681 = vmatpush.bf16.msrb.mxu3 %v3672_v30  ;;  %3061 = vst.msk [vmem:[#allocation3 + $0xc0] sm:$0xff] %vm3035_vm4, %v8616_v20 }
 0x293   : > { %v2254_v32 = vpop.f32.mrf.mxu2  ;;  %3062 = vst.msk [vmem:[#allocation3 + $0xc8] sm:$0xff] %vm3035_vm4, %v8616_v20 }
 0x294   : > { %v7243_v62 = vadd.f32 %v2254_v32, %v2060_v63  ;;  %v7248_v5 = vpop.f32.mrf.mxu3  ;;  %v1799_v34 = vpop.f32.mrf.mxu0  ;;  %v3161_v63 = vpack.c.bf16 %v3130_v9, %v3129_v36  ;;  %3064 = vst.msk [vmem:[#allocation3 + $0xd8] sm:$0xff] %vm3035_vm4, %v8616_v20  ;;  %v2322_v32 = vld [vmem:[#allocation2 + $0x1a1] sm:$0xff] }
 0x295   : > { %v7253_v22 = vadd.f32 %v1799_v34, %v7103_v45  ;;  %3065 = vst.msk [vmem:[#allocation3 + $0xe0] sm:$0xff] %vm3035_vm4, %v8616_v20  ;;  %v2321_v45 = vld [vmem:[#allocation2 + $0x199] sm:$0xff] }
 0x296   : > { %8618 = vst [vmem:[#allocation21_spill] sm:$0xff] %v7243_v62  ;;  %5740 = vmatmul.msk.bf16.vlgmr.msra.gmra.mxu1 %vm3035_vm4, %v3161_v63  ;;  %v2338_v9 = vpack.c.bf16 %v2322_v32, %v2321_v45 }
 0x297   : > { %8619 = vst [vmem:[#allocation22_spill] sm:$0xff] %v7253_v22 }
 0x298   : > { %3067 = vst.msk [vmem:[#allocation3 + $0xf0] sm:$0xff] %vm3035_vm4, %v8616_v20 }
 0x299   : > { %3068 = vst.msk [vmem:[#allocation3 + $0xf8] sm:$0xff] %vm3035_vm4, %v8616_v20 }
 0x29a   : > { %3070 = vst.msk [vmem:[#allocation3 + $0x108] sm:$0xff] %vm3035_vm4, %v8616_v20 }
 0x29b   : > { %3071 = vst.msk [vmem:[#allocation3 + $0x110] sm:$0xff] %vm3035_vm4, %v8616_v20 }
 0x29c   : > { %v7272_v30 = vpop.f32.mrf.mxu3  ;;  %v2635_v34 = vpop.f32.mrf.mxu0  ;;  %3073 = vst.msk [vmem:[#allocation3 + $0x120] sm:$0xff] %vm3035_vm4, %v8616_v20 }
 0x29d   : > { %v2715_v36 = vadd.f32 %v2635_v34, %v2487_v59  ;;  %3074 = vst.msk [vmem:[#allocation3 + $0x128] sm:$0xff] %vm3035_vm4, %v8616_v20 }
 0x29e   : > { %3076 = vst.msk [vmem:[#allocation3 + $0x138] sm:$0xff] %vm3035_vm4, %v8616_v20 }
 0x29f   : > { %v2779_v63 = vmul.f32 0.044715, %v2715_v36  ;;  %5732 = vmatmul.msk.bf16.gmra.mxu0 %vm600_vm1, %v6914_v48  ;;  %3077 = vst.msk [vmem:[#allocation3 + $0x140] sm:$0xff] %vm3035_vm4, %v8616_v20 }
 0x2a0   : > { %3079 = vst.msk [vmem:[#allocation3 + $0x150] sm:$0xff] %vm3035_vm4, %v8616_v20 }
 0x2a1   : > { %v2811_v53 = vmul.f32 %v2779_v63, %v2715_v36  ;;  %5717 = vmatmul.msk.bf16.gmra.mxu3 %vm600_vm1, %v2338_v9  ;;  %3080 = vst.msk [vmem:[#allocation3 + $0x158] sm:$0xff] %vm3035_vm4, %v8616_v20  ;;  %v2538_v63 = vld [vmem:[#allocation2 + $0x112] sm:$0xff] }
 0x2a2   : > { %3082 = vst.msk [vmem:[#allocation3 + $0x168] sm:$0xff] %vm3035_vm4, %v8616_v20 }
 0x2a3   : > { %v2843_v45 = vmul.f32 %v2811_v53, %v2715_v36  ;;  %3083 = vst.msk [vmem:[#allocation3 + $0x170] sm:$0xff] %vm3035_vm4, %v8616_v20 }
 0x2a4   : > { %v7297_v48 = vpop.f32.mrf.mxu3  ;;  %v2637_v32 = vpop.f32.mrf.mxu0  ;;  %3085 = vst.msk [vmem:[#allocation3 + $0x180] sm:$0xff] %vm3035_vm4, %v8616_v20 }
 0x2a5   : > { %v2875_v59 = vadd.f32 %v2843_v45, %v2715_v36  ;;  %v2716_v34 = vadd.f32 %v2637_v32, %v2488_v0  ;;  %3086 = vst.msk [vmem:[#allocation3 + $0x188] sm:$0xff] %vm3035_vm4, %v8616_v20  ;;  %v2489_v0 = vadd.f32 %v7128_v25, %v6928_v40  ;;  %v2560_v32 = vpack.c.bf16 %v2538_v63, %v2537_v6  ;;  %v3351_v6 = vld [vmem:[#allocation3 + $0x1] sm:$0xff] }
 0x2a6   : > { %3088 = vst.msk [vmem:[#allocation3 + $0x198] sm:$0xff] %vm3035_vm4, %v8616_v20  ;;  %v3573_v63 = vld [vmem:[#allocation3 + $0x2] sm:$0xff] }
 0x2a7   : > { %v2907_v9 = vmul.f32 0.7978846, %v2875_v59  ;;  %v2780_v49 = vmul.f32 0.044715, %v2716_v34  ;;  %3089 = vst.msk [vmem:[#allocation3 + $0x1a0] sm:$0xff] %vm3035_vm4, %v8616_v20 }
 0x2a8   : > { %3042 = vst.msk [vmem:[#allocation3 + $0x28] sm:$0x3] %vm3038_vm5, %v8616_v20 }
 0x2a9   : > { %6040 = vtanh.f32 %v2907_v9  ;;  %v2812_v53 = vmul.f32 %v2780_v49, %v2716_v34  ;;  %3039 = vst.msk [vmem:[#allocation3 + $0x10] sm:$0x3] %vm3038_vm5, %v8616_v20 }
 0x2aa   : > { %3045 = vst.msk [vmem:[#allocation3 + $0x40] sm:$0x3] %vm3038_vm5, %v8616_v20 }
 0x2ab   : > { %v2844_v45 = vmul.f32 %v2812_v53, %v2716_v34  ;;  %3048 = vst.msk [vmem:[#allocation3 + $0x58] sm:$0x3] %vm3038_vm5, %v8616_v20  ;;  %v2747_v53 = vmul.f32 0.5, %v2715_v36 }
 0x2ac   : > { %v7317_v59 = vpop.f32.mrf.mxu3  ;;  %v2640_v9 = vpop.f32.mrf.mxu0  ;;  %3051 = vst.msk [vmem:[#allocation3 + $0x70] sm:$0x3] %vm3038_vm5, %v8616_v20 }
 0x2ad   : > { %v2876_v22 = vadd.f32 %v2844_v45, %v2716_v34  ;;  %v2717_v49 = vadd.f32 %v2640_v9, %v2489_v0  ;;  %3054 = vst.msk [vmem:[#allocation3 + $0x88] sm:$0x3] %vm3038_vm5, %v8616_v20 }
 0x2ae   : > { %3057 = vst.msk [vmem:[#allocation3 + $0xa0] sm:$0x3] %vm3038_vm5, %v8616_v20 }
 0x2af   : > { %v6041_v40 = vpop.eup %6040  ;;  %v2908_v25 = vmul.f32 0.7978846, %v2876_v22  ;;  %5733 = vmatmul.msk.bf16.gmra.mxu0 %vm600_vm1, %v2560_v32  ;;  %v2781_v45 = vmul.f32 0.044715, %v2717_v49  ;;  %3060 = vst.msk [vmem:[#allocation3 + $0xb8] sm:$0x3] %vm3038_vm5, %v8616_v20  ;;  %v2490_v32 = vadd.f32 %v7137_v55, %v6934_v10 }
 0x2b0   : > { %v2971_v62 = vadd.f32 1.0, %v6041_v40  ;;  %3063 = vst.msk [vmem:[#allocation3 + $0xd0] sm:$0x3] %vm3038_vm5, %v8616_v20  ;;  %v3352_v9 = vld [vmem:[#allocation3 + $0x9] sm:$0xff] }
 0x2b1   : > { %6042 = vtanh.f32 %v2908_v25  ;;  %v2813_v22 = vmul.f32 %v2781_v45, %v2717_v49  ;;  %v3574_v18 = vld [vmem:[#allocation3 + $0xa] sm:$0xff]  ;;  %3066 = vst.msk [vmem:[#allocation3 + $0xe8] sm:$0x3] %vm3038_vm5, %v8616_v20  ;;  %v3383_v36 = vpack.c.bf16 %v3352_v9, %v3351_v6  ;;  %v2539_v6 = vld [vmem:[#allocation2 + $0x122] sm:$0xff]  ;;  %v2748_v45 = vmul.f32 0.5, %v2716_v34 }
 0x2b2   : > { %v3003_v0 = vmul.f32 %v2971_v62, %v2747_v53  ;;  %v3605_v40 = vpack.c.bf16 %v3574_v18, %v3573_v63  ;;  %3069 = vst.msk [vmem:[#allocation3 + $0x100] sm:$0x3] %vm3038_vm5, %v8616_v20  ;;  %v2540_v63 = vld [vmem:[#allocation2 + $0x12a] sm:$0xff] }
 0x2b3   : > { %v2845_v25 = vmul.f32 %v2813_v22, %v2717_v49  ;;  %5757 = vmatmul.msk.bf16.vlgmr.msra.gmra.mxu2 %vm3035_vm4, %v3383_v36  ;;  %3072 = vst.msk [vmem:[#allocation3 + $0x118] sm:$0x3] %vm3038_vm5, %v8616_v20  ;;  %v2491_v36 = vadd.f32 %v7145_v38, %v6948_v28  ;;  %v2749_v38 = vmul.f32 0.5, %v2717_v49 }
 0x2b4   : > { %3092 = vst.msk [vmem:[#allocation3 + $0x19] sm:$0xff] %vm3035_vm4, %v3003_v0  ;;  %v7337_v13 = vpop.f32.mrf.mxu3  ;;  %v2642_v62 = vpop.f32.mrf.mxu0  ;;  %5774 = vmatmul.msk.bf16.vlgmr.msrb.gmra.mxu3 %vm3035_vm4, %v3605_v40  ;;  %v2561_v40 = vpack.c.bf16 %v2540_v63, %v2539_v6 }
 0x2b5   : > { %v2718_v53 = vadd.f32 %v2642_v62, %v2490_v32  ;;  %v2877_v10 = vadd.f32 %v2845_v25, %v2717_v49  ;;  %3075 = vst.msk [vmem:[#allocation3 + $0x130] sm:$0x3] %vm3038_vm5, %v8616_v20 }
 0x2b6   : > { %3078 = vst.msk [vmem:[#allocation3 + $0x148] sm:$0x3] %vm3038_vm5, %v8616_v20 }
 0x2b7   : > { %v6043_v55 = vpop.eup %6042  ;;  %v2782_v18 = vmul.f32 0.044715, %v2718_v53  ;;  %v2909_v22 = vmul.f32 0.7978846, %v2877_v10  ;;  %3081 = vst.msk [vmem:[#allocation3 + $0x160] sm:$0x3] %vm3038_vm5, %v8616_v20 }
 0x2b8   : > { %v2972_v0 = vadd.f32 1.0, %v6043_v55  ;;  %3084 = vst.msk [vmem:[#allocation3 + $0x178] sm:$0x3] %vm3038_vm5, %v8616_v20 }
 0x2b9   : > { %v2814_v9 = vmul.f32 %v2782_v18, %v2718_v53  ;;  %6044 = vtanh.f32 %v2909_v22  ;;  %3087 = vst.msk [vmem:[#allocation3 + $0x190] sm:$0x3] %vm3038_vm5, %v8616_v20 }
 0x2ba   : > { %v3004_v32 = vmul.f32 %v2972_v0, %v2748_v45  ;;  %3090 = vst.msk [vmem:[#allocation3 + $0x1a8] sm:$0x3] %vm3038_vm5, %v8616_v20 }
 0x2bb   : > { %v2846_v34 = vmul.f32 %v2814_v9, %v2718_v53  ;;  %v3131_v6 = vld [vmem:[#allocation3 + $0x18] sm:$0xff]  ;;  %v2492_v9 = vadd.f32 %v7154_v47, %v6954_v50 }
 0x2bc   : > { %3093 = vst.msk [vmem:[#allocation3 + $0x21] sm:$0xff] %vm3035_vm4, %v3004_v32  ;;  %v7358_v25 = vpop.f32.mrf.mxu3  ;;  %v2645_v62 = vpop.f32.mrf.mxu0  ;;  %v3353_v63 = vld [vmem:[#allocation3 + $0x19] sm:$0xff] }
 0x2bd   : > { %v2878_v10 = vadd.f32 %v2846_v34, %v2718_v53  ;;  %v2719_v55 = vadd.f32 %v2645_v62, %v2491_v36 }
 0x2bf   : > { %v2910_v18 = vmul.f32 0.7978846, %v2878_v10  ;;  %v2783_v45 = vmul.f32 0.044715, %v2719_v55  ;;  %5734 = vmatmul.msk.bf16.gmra.mxu0 %vm600_vm1, %v2561_v40  ;;  %v6045_v28 = vpop.eup %6044 }
 0x2c0   : > { %v2973_v0 = vadd.f32 1.0, %v6045_v28 }
 0x2c1   : > { %6046 = vtanh.f32 %v2910_v18  ;;  %v2815_v22 = vmul.f32 %v2783_v45, %v2719_v55 }
 0x2c2   : > { %v3005_v32 = vmul.f32 %v2973_v0, %v2749_v38  ;;  %v2750_v0 = vmul.f32 0.5, %v2718_v53 }
 0x2c3   : > { %v2847_v12 = vmul.f32 %v2815_v22, %v2719_v55  ;;  %v3132_v51 = vld [vmem:[#allocation3 + $0x20] sm:$0xff]  ;;  %v2541_v22 = vld [vmem:[#allocation2 + $0x13a] sm:$0xff] }
 0x2c4   : > { %v3354_v20 = vld [vmem:[#allocation3 + $0x21] sm:$0xff]  ;;  %v7365_v36 = vpop.f32.mrf.mxu3  ;;  %v2647_v62 = vpop.f32.mrf.mxu0  ;;  %v7367_v10 = vpack.c.bf16 %v3132_v51, %v3131_v6  ;;  %3094 = vst.msk [vmem:[#allocation3 + $0x31] sm:$0xff] %vm3035_vm4, %v3005_v32 }
 0x2c5   : > { %v3575_v34 = vld [vmem:[#allocation3 + $0x1a] sm:$0xff]  ;;  %v3384_v40 = vpack.c.bf16 %v3354_v20, %v3353_v63  ;;  %v3576_v49 = vld [vmem:[#allocation3 + $0x22] sm:$0xff]  ;;  %v2879_v18 = vadd.f32 %v2847_v12, %v2719_v55  ;;  %v2720_v45 = vadd.f32 %v2647_v62, %v2492_v9  ;;  %v2542_v20 = vld [vmem:[#allocation2 + $0x142] sm:$0xff]  ;;  %v2493_v12 = vadd.f32 %v7162_v19, %v6968_v4 }
 0x2c6   : > { %v3606_v28 = vpack.c.bf16 %v3576_v49, %v3575_v34  ;;  %5741 = vmatmul.msk.bf16.gmra.mxu1 %vm3035_vm4, %v7367_v10  ;;  %v2562_v32 = vpack.c.bf16 %v2542_v20, %v2541_v22 }
 0x2c7   : > { %5758 = vmatmul.msk.bf16.gmra.mxu2 %vm3035_vm4, %v3384_v40  ;;  %v6047_v50 = vpop.eup %6046  ;;  %v2911_v47 = vmul.f32 0.7978846, %v2879_v18  ;;  %v2784_v38 = vmul.f32 0.044715, %v2720_v45 }
 0x2c8   : > { %5775 = vmatmul.msk.bf16.gmra.mxu3 %vm3035_vm4, %v3606_v28  ;;  %v2974_v51 = vadd.f32 1.0, %v6047_v50  ;;  %v2751_v50 = vmul.f32 0.5, %v2719_v55 }
 0x2c9   : > { %6048 = vtanh.f32 %v2911_v47  ;;  %v2816_v6 = vmul.f32 %v2784_v38, %v2720_v45 }
 0x2ca   : > { %v3006_v63 = vmul.f32 %v2974_v51, %v2750_v0  ;;  %v2494_v51 = vadd.f32 %v7171_v1, %v6974_v41 }
 0x2cb   : > { %v2848_v9 = vmul.f32 %v2816_v6, %v2720_v45  ;;  %v3133_v4 = vld [vmem:[#allocation3 + $0x30] sm:$0xff] }
 0x2cc   : > { %3095 = vst.msk [vmem:[#allocation3 + $0x39] sm:$0xff] %vm3035_vm4, %v3006_v63  ;;  %v7377_v34 = vpop.f32.mrf.mxu3  ;;  %v2650_v62 = vpop.f32.mrf.mxu0  ;;  %v3355_v19 = vld [vmem:[#allocation3 + $0x31] sm:$0xff] }
 0x2cd   : > { %v2880_v40 = vadd.f32 %v2848_v9, %v2720_v45  ;;  %v2721_v49 = vadd.f32 %v2650_v62, %v2493_v12 }
 0x2cf   : > { %v6049_v18 = vpop.eup %6048  ;;  %v2912_v53 = vmul.f32 0.7978846, %v2880_v40  ;;  %v2785_v28 = vmul.f32 0.044715, %v2721_v49  ;;  %5735 = vmatmul.msk.bf16.gmra.mxu0 %vm600_vm1, %v2562_v32 }
 0x2d0   : > { %v2975_v47 = vadd.f32 1.0, %v6049_v18 }
 0x2d1   : > { %6050 = vtanh.f32 %v2912_v53  ;;  %v2817_v38 = vmul.f32 %v2785_v28, %v2721_v49 }
 0x2d2   : > { %v3007_v0 = vmul.f32 %v2975_v47, %v2751_v50  ;;  %v2752_v50 = vmul.f32 0.5, %v2720_v45  ;;  %v2039_v45 = vadd.f32 %v7000_v23, %v6998_v2 }
 0x2d3   : > { %v2849_v22 = vmul.f32 %v2817_v38, %v2721_v49  ;;  %v3134_v20 = vld [vmem:[#allocation3 + $0x38] sm:$0xff]  ;;  %v2543_v38 = vld [vmem:[#allocation2 + $0x152] sm:$0xff] }
 0x2d4   : > { %v3356_v6 = vld [vmem:[#allocation3 + $0x39] sm:$0xff]  ;;  %3096 = vst.msk [vmem:[#allocation3 + $0x49] sm:$0xff] %vm3035_vm4, %v3007_v0  ;;  %v7383_v12 = vpop.f32.mrf.mxu3  ;;  %v2652_v9 = vpop.f32.mrf.mxu0  ;;  %v7385_v32 = vpack.c.bf16 %v3134_v20, %v3133_v4  ;;  %v2544_v0 = vld [vmem:[#allocation2 + $0x15a] sm:$0xff] }
 0x2d5   : > { %v3577_v63 = vld [vmem:[#allocation3 + $0x32] sm:$0xff]  ;;  %v3385_v55 = vpack.c.bf16 %v3356_v6, %v3355_v19  ;;  %v3578_v62 = vld [vmem:[#allocation3 + $0x3a] sm:$0xff]  ;;  %v2881_v40 = vadd.f32 %v2849_v22, %v2721_v49  ;;  %v2722_v18 = vadd.f32 %v2652_v9, %v2494_v51  ;;  %v2495_v51 = vadd.f32 %v7180_v8, %v6992_v46 }
 0x2d6   : > { %v3607_v53 = vpack.c.bf16 %v3578_v62, %v3577_v63  ;;  %5742 = vmatmul.msk.bf16.gmra.mxu1 %vm3035_vm4, %v7385_v32  ;;  %v2563_v20 = vpack.c.bf16 %v2544_v0, %v2543_v38  ;;  %v2268_v46 = vadd.f32 %v7006_v11, %v2039_v45 }
 0x2d7   : > { %5759 = vmatmul.msk.bf16.gmra.mxu2 %vm3035_vm4, %v3385_v55  ;;  %v6051_v41 = vpop.eup %6050  ;;  %v2913_v1 = vmul.f32 0.7978846, %v2881_v40  ;;  %v2786_v28 = vmul.f32 0.044715, %v2722_v18 }
 0x2d8   : > { %5776 = vmatmul.msk.bf16.gmra.mxu3 %vm3035_vm4, %v3607_v53  ;;  %v2976_v47 = vadd.f32 1.0, %v6051_v41  ;;  %v2753_v41 = vmul.f32 0.5, %v2721_v49  ;;  %v2496_v38 = vadd.f32 %v7189_v44, %v2268_v46 }
 0x2d9   : > { %6052 = vtanh.f32 %v2913_v1  ;;  %v2818_v4 = vmul.f32 %v2786_v28, %v2722_v18 }
 0x2da   : > { %v3008_v19 = vmul.f32 %v2976_v47, %v2752_v50 }
 0x2db   : > { %v2850_v22 = vmul.f32 %v2818_v4, %v2722_v18  ;;  %v3135_v50 = vld [vmem:[#allocation3 + $0x48] sm:$0xff] }
 0x2dc   : > { %3097 = vst.msk [vmem:[#allocation3 + $0x51] sm:$0xff] %vm3035_vm4, %v3008_v19  ;;  %v7394_v6 = vpop.f32.mrf.mxu3  ;;  %v2655_v63 = vpop.f32.mrf.mxu0  ;;  %v3357_v47 = vld [vmem:[#allocation3 + $0x49] sm:$0xff] }
 0x2dd   : > { %v2882_v9 = vadd.f32 %v2850_v22, %v2722_v18  ;;  %v2723_v55 = vadd.f32 %v2655_v63, %v2495_v51 }
 0x2df   : > { %v6053_v62 = vpop.eup %6052  ;;  %v2914_v40 = vmul.f32 0.7978846, %v2882_v9  ;;  %v2787_v53 = vmul.f32 0.044715, %v2723_v55  ;;  %5736 = vmatmul.msk.bf16.gmra.mxu0 %vm600_vm1, %v2563_v20 }
 0x2e0   : > { %v2977_v1 = vadd.f32 1.0, %v6053_v62 }
 0x2e1   : > { %6054 = vtanh.f32 %v2914_v40  ;;  %v2819_v8 = vmul.f32 %v2787_v53, %v2723_v55  ;;  %v2754_v40 = vmul.f32 0.5, %v2722_v18 }
 0x2e2   : > { %v3009_v28 = vmul.f32 %v2977_v1, %v2753_v41  ;;  %v2545_v41 = vld [vmem:[#allocation2 + $0x16a] sm:$0xff]  ;;  %v2546_v1 = vld [vmem:[#allocation2 + $0x172] sm:$0xff] }
 0x2e3   : > { %v2851_v0 = vmul.f32 %v2819_v8, %v2723_v55  ;;  %v3136_v4 = vld [vmem:[#allocation3 + $0x50] sm:$0xff] }
 0x2e4   : > { %v3358_v19 = vld [vmem:[#allocation3 + $0x51] sm:$0xff]  ;;  %3098 = vst.msk [vmem:[#allocation3 + $0x61] sm:$0xff] %vm3035_vm4, %v3009_v28  ;;  %v7402_v2 = vpop.f32.mrf.mxu3  ;;  %v2657_v23 = vpop.f32.mrf.mxu0  ;;  %v7404_v49 = vpack.c.bf16 %v3136_v4, %v3135_v50  ;;  %v2497_v28 = vadd.f32 %v7198_v21, %v7021_v24  ;;  %v2755_v24 = vmul.f32 0.5, %v2723_v55 }
 0x2e5   : > { %v3579_v51 = vld [vmem:[#allocation3 + $0x4a] sm:$0xff]  ;;  %v3386_v22 = vpack.c.bf16 %v3358_v19, %v3357_v47  ;;  %v3580_v11 = vld [vmem:[#allocation3 + $0x52] sm:$0xff]  ;;  %v2883_v20 = vadd.f32 %v2851_v0, %v2723_v55  ;;  %v2724_v63 = vadd.f32 %v2657_v23, %v2496_v38  ;;  %v2564_v47 = vpack.c.bf16 %v2546_v1, %v2545_v41 }
 0x2e6   : > { %v3608_v9 = vpack.c.bf16 %v3580_v11, %v3579_v51  ;;  %5743 = vmatmul.msk.bf16.gmra.mxu1 %vm3035_vm4, %v7404_v49  ;;  %v2041_v51 = vadd.f32 %v7029_v54, %v7027_v27 }
 0x2e7   : > { %5760 = vmatmul.msk.bf16.gmra.mxu2 %vm3035_vm4, %v3386_v22  ;;  %v6055_v44 = vpop.eup %6054  ;;  %v2915_v62 = vmul.f32 0.7978846, %v2883_v20  ;;  %v2788_v45 = vmul.f32 0.044715, %v2724_v63 }
 0x2e8   : > { %5777 = vmatmul.msk.bf16.gmra.mxu3 %vm3035_vm4, %v3608_v9  ;;  %v2978_v53 = vadd.f32 1.0, %v6055_v44  ;;  %v2270_v11 = vadd.f32 %v7031_v57, %v2041_v51 }
 0x2e9   : > { %6056 = vtanh.f32 %v2915_v62  ;;  %v2820_v46 = vmul.f32 %v2788_v45, %v2724_v63 }
 0x2ea   : > { %v3010_v8 = vmul.f32 %v2978_v53, %v2754_v40  ;;  %v2498_v45 = vadd.f32 %v7219_v60, %v2270_v11  ;;  %v5790_v60 = vld [vmem:[%s8542_s3 + $0x6] sm:$0x3]  ;;  %v2548_v11 = vld [vmem:[#allocation2 + $0x18a] sm:$0xff] }
 0x2eb   : > { %v2852_v50 = vmul.f32 %v2820_v46, %v2724_v63  ;;  %v3137_v44 = vld [vmem:[#allocation3 + $0x60] sm:$0xff] }
 0x2ec   : > { %3099 = vst.msk [vmem:[#allocation3 + $0x69] sm:$0xff] %vm3035_vm4, %v3010_v8  ;;  %v7413_v38 = vpop.f32.mrf.mxu3  ;;  %v2660_v0 = vpop.f32.mrf.mxu0  ;;  %v3359_v62 = vld [vmem:[#allocation3 + $0x61] sm:$0xff]  ;;  %v5824_v8 = vld [vmem:[%s8542_s3 + $0xa] sm:$0x3] }
 0x2ed   : > { %v2884_v4 = vadd.f32 %v2852_v50, %v2724_v63  ;;  %v7415_v19 = vadd.f32 %v2660_v0, %v2497_v28  ;;  %v4338_v0 = vsel %vm3226_vm3, %v5824_v8, 0 }
 0x2ee   : > { %4347 = vmatpush.bf16.msrb.mxu2 %v4338_v0 }
 0x2ef   : > { %v6057_v18 = vpop.eup %6056  ;;  %v2916_v23 = vmul.f32 0.7978846, %v2884_v4  ;;  %v2789_v22 = vmul.f32 0.044715, %v7415_v19  ;;  %5737 = vmatmul.msk.bf16.gmra.mxu0 %vm600_vm1, %v2564_v47  ;;  %v3894_v4 = vsel %vm3226_vm3, %v5790_v60, 0  ;;  %v2757_v8 = vmul.f32 0.5, %v7415_v19 }
 0x2f0   : > { %v2979_v21 = vadd.f32 1.0, %v6057_v18  ;;  %3903 = vmatpush.bf16.msrb.mxu0 %v3894_v4 }
 0x2f1   : > { %6058 = vtanh.f32 %v2916_v23  ;;  %v2821_v20 = vmul.f32 %v2789_v22, %v7415_v19  ;;  %v2756_v22 = vmul.f32 0.5, %v2724_v63  ;;  %v5807_v63 = vld [vmem:[%s8542_s3 + $0x8] sm:$0x3] }
 0x2f2   : > { %v3011_v9 = vmul.f32 %v2979_v21, %v2755_v24  ;;  %v2547_v21 = vld [vmem:[#allocation2 + $0x182] sm:$0xff] }
 0x2f3   : > { %v2853_v40 = vmul.f32 %v2821_v20, %v7415_v19  ;;  %v3138_v27 = vld [vmem:[#allocation3 + $0x68] sm:$0xff] }
 0x2f4   : > { %v3360_v54 = vld [vmem:[#allocation3 + $0x69] sm:$0xff]  ;;  %3100 = vst.msk [vmem:[#allocation3 + $0x79] sm:$0xff] %vm3035_vm4, %v3011_v9  ;;  %v7426_v41 = vpop.f32.mrf.mxu3  ;;  %v2662_v55 = vpop.f32.mrf.mxu0  ;;  %v7428_v1 = vpack.c.bf16 %v3138_v27, %v3137_v44  ;;  %v2499_v44 = vadd.f32 %v7248_v5, %v7046_v16  ;;  %v2043_v16 = vadd.f32 %v7054_v26, %v7052_v33 }
 0x2f5   : > { %v3581_v53 = vld [vmem:[#allocation3 + $0x62] sm:$0xff]  ;;  %v3387_v57 = vpack.c.bf16 %v3360_v54, %v3359_v62  ;;  %v3582_v46 = vld [vmem:[#allocation3 + $0x6a] sm:$0xff]  ;;  %v2885_v28 = vadd.f32 %v2853_v40, %v7415_v19  ;;  %v7437_v50 = vadd.f32 %v2662_v55, %v2498_v45  ;;  %v2565_v45 = vpack.c.bf16 %v2548_v11, %v2547_v21 }
 0x2f6   : > { %v3609_v47 = vpack.c.bf16 %v3582_v46, %v3581_v53  ;;  %5744 = vmatmul.msk.bf16.gmra.mxu1 %vm3035_vm4, %v7428_v1  ;;  %v4116_v55 = vsel %vm3226_vm3, %v5807_v63, 0 }
 0x2f7   : > { %5761 = vmatmul.msk.bf16.gmra.mxu2 %vm3035_vm4, %v3387_v57  ;;  %v6059_v18 = vpop.eup %6058  ;;  %v2917_v51 = vmul.f32 0.7978846, %v2885_v28  ;;  %v2790_v23 = vmul.f32 0.044715, %v7437_v50  ;;  %4125 = vmatpush.bf16.msrb.mxu1 %v4116_v55  ;;  %v2272_v28 = vadd.f32 %v7056_v17, %v2043_v16  ;;  %v2550_v55 = vld [vmem:[#allocation2 + $0x1a2] sm:$0xff] }
 0x2f8   : > { %5778 = vmatmul.msk.bf16.gmra.mxu3 %vm3035_vm4, %v3609_v47  ;;  %v2980_v24 = vadd.f32 1.0, %v6059_v18 }
 0x2f9   : > { %6060 = vtanh.f32 %v2917_v51  ;;  %v2822_v20 = vmul.f32 %v2790_v23, %v7437_v50  ;;  %v2500_v51 = vadd.f32 %v7272_v30, %v2272_v28 }
 0x2fa   : > { %v3012_v9 = vmul.f32 %v2980_v24, %v2756_v22 }
 0x2fb   : > { %v2854_v62 = vmul.f32 %v2822_v20, %v7437_v50  ;;  %v3139_v4 = vld [vmem:[#allocation3 + $0x78] sm:$0xff] }
 0x2fc   : > { %3101 = vst.msk [vmem:[#allocation3 + $0x81] sm:$0xff] %vm3035_vm4, %v3012_v9  ;;  %v7451_v40 = vpop.f32.mrf.mxu3  ;;  %v2665_v27 = vpop.f32.mrf.mxu0  ;;  %v3361_v18 = vld [vmem:[#allocation3 + $0x79] sm:$0xff] }
 0x2fd   : > { %v2886_v54 = vadd.f32 %v2854_v62, %v7437_v50  ;;  %v2727_v53 = vadd.f32 %v2665_v27, %v2499_v44  ;;  %v2758_v27 = vmul.f32 0.5, %v7437_v50  ;;  %v2045_v50 = vadd.f32 %v7078_v37, %v7076_v52 }
 0x2ff   : > { %v6061_v57 = vpop.eup %6060  ;;  %v2918_v5 = vmul.f32 0.7978846, %v2886_v54  ;;  %v2791_v46 = vmul.f32 0.044715, %v2727_v53  ;;  %5738 = vmatmul.msk.bf16.gmra.mxu0 %vm600_vm1, %v2565_v45  ;;  %v2549_v54 = vld [vmem:[#allocation2 + $0x19a] sm:$0xff] }
 0x300   : > { %v2981_v60 = vadd.f32 1.0, %v6061_v57 }
 0x301   : > { %6062 = vtanh.f32 %v2918_v5  ;;  %v2823_v47 = vmul.f32 %v2791_v46, %v2727_v53  ;;  %v2501_v5 = vadd.f32 %v7297_v48, %v7070_v7  ;;  %v2274_v7 = vadd.f32 %v7080_v56, %v2045_v50 }
 0x302   : > { %v3013_v0 = vmul.f32 %v2981_v60, %v2757_v8  ;;  %v2566_v8 = vpack.c.bf16 %v2550_v55, %v2549_v54 }
 0x303   : > { %v2855_v23 = vmul.f32 %v2823_v47, %v2727_v53  ;;  %v3140_v22 = vld [vmem:[#allocation3 + $0x80] sm:$0xff] }
 0x304   : > { %v3362_v24 = vld [vmem:[#allocation3 + $0x81] sm:$0xff]  ;;  %3102 = vst.msk [vmem:[#allocation3 + $0x91] sm:$0xff] %vm3035_vm4, %v3013_v0  ;;  %v7465_v26 = vpop.f32.mrf.mxu3  ;;  %v2667_v21 = vpop.f32.mrf.mxu0  ;;  %v7467_v19 = vpack.c.bf16 %v3140_v22, %v3139_v4 }
 0x305   : > { %v3583_v33 = vld [vmem:[#allocation3 + $0x7a] sm:$0xff]  ;;  %v3388_v11 = vpack.c.bf16 %v3362_v24, %v3361_v18  ;;  %v3584_v17 = vld [vmem:[#allocation3 + $0x82] sm:$0xff]  ;;  %v2887_v20 = vadd.f32 %v2855_v23, %v2727_v53  ;;  %v2728_v9 = vadd.f32 %v2667_v21, %v2500_v51  ;;  %v2759_v23 = vmul.f32 0.5, %v2727_v53 }
 0x306   : > { %v3610_v44 = vpack.c.bf16 %v3584_v17, %v3583_v33  ;;  %5745 = vmatmul.msk.bf16.gmra.mxu1 %vm3035_vm4, %v7467_v19 }
 0x307   : > { %5762 = vmatmul.msk.bf16.gmra.mxu2 %vm3035_vm4, %v3388_v11  ;;  %v6063_v30 = vpop.eup %6062  ;;  %v2919_v62 = vmul.f32 0.7978846, %v2887_v20  ;;  %v2792_v45 = vmul.f32 0.044715, %v2728_v9  ;;  %v2502_v11 = vadd.f32 %v7317_v59, %v2274_v7 }
 0x308   : > { %5779 = vmatmul.msk.bf16.gmra.mxu3 %vm3035_vm4, %v3610_v44  ;;  %v2982_v63 = vadd.f32 1.0, %v6063_v30 }
 0x309   : > { %6064 = vtanh.f32 %v2919_v62  ;;  %v2824_v57 = vmul.f32 %v2792_v45, %v2728_v9 }
 0x30a   : > { %v3014_v16 = vmul.f32 %v2982_v63, %v2758_v27 }
 0x30b   : > { %v2856_v46 = vmul.f32 %v2824_v57, %v2728_v9  ;;  %v3141_v33 = vld [vmem:[#allocation3 + $0x90] sm:$0xff]  ;;  %v2760_v57 = vmul.f32 0.5, %v2728_v9 }
 0x30c   : > { %3103 = vst.msk [vmem:[#allocation3 + $0x99] sm:$0xff] %vm3035_vm4, %v3014_v16  ;;  %v7477_v60 = vpop.f32.mrf.mxu3  ;;  %v2670_v28 = vpop.f32.mrf.mxu0  ;;  %v3363_v21 = vld [vmem:[#allocation3 + $0x91] sm:$0xff] }
 0x30d   : > { %v2888_v47 = vadd.f32 %v2856_v46, %v2728_v9  ;;  %v2729_v0 = vadd.f32 %v2670_v28, %v2501_v5 }
 0x30f   : > { %v6065_v4 = vpop.eup %6064  ;;  %v2920_v18 = vmul.f32 0.7978846, %v2888_v47  ;;  %v2793_v51 = vmul.f32 0.044715, %v2729_v0  ;;  %5739 = vmatmul.msk.bf16.gmra.mxu0 %vm600_vm1, %v2566_v8  ;;  %v2503_v8 = vadd.f32 %v7337_v13, %v7090_v31  ;;  %v2761_v7 = vmul.f32 0.5, %v2729_v0 }
 0x310   : > { %v2983_v22 = vadd.f32 1.0, %v6065_v4 }
 0x311   : > { %6066 = vtanh.f32 %v2920_v18  ;;  %v2825_v48 = vmul.f32 %v2793_v51, %v2729_v0 }
 0x312   : > { %v3015_v24 = vmul.f32 %v2983_v22, %v2759_v23  ;;  %v2047_v23 = vadd.f32 %v7098_v29, %v7096_v15 }
 0x313   : > { %v2857_v17 = vmul.f32 %v2825_v48, %v2729_v0  ;;  %v3142_v20 = vld [vmem:[#allocation3 + $0x98] sm:$0xff] }
 0x314   : > { %v3364_v44 = vld [vmem:[#allocation3 + $0x99] sm:$0xff]  ;;  %3104 = vst.msk [vmem:[#allocation3 + $0xa9] sm:$0xff] %vm3035_vm4, %v3015_v24  ;;  %v7485_v52 = vpop.f32.mrf.mxu3  ;;  %v2672_v37 = vpop.f32.mrf.mxu0  ;;  %v7487_v53 = vpack.c.bf16 %v3142_v20, %v3141_v33  ;;  %v2276_v31 = vadd.f32 %v7100_v43, %v2047_v23  ;;  %v2049_v23 = vadd.f32 %v7116_v58, %v7114_v61 }
 0x315   : > { %v3585_v30 = vld [vmem:[#allocation3 + $0x92] sm:$0xff]  ;;  %v3389_v62 = vpack.c.bf16 %v3364_v44, %v3363_v21  ;;  %v3586_v56 = vld [vmem:[#allocation3 + $0x9a] sm:$0xff]  ;;  %v2889_v45 = vadd.f32 %v2857_v17, %v2729_v0  ;;  %v2730_v27 = vadd.f32 %v2672_v37, %v2502_v11 }
 0x316   : > { %v3611_v63 = vpack.c.bf16 %v3586_v56, %v3585_v30  ;;  %5746 = vmatmul.msk.bf16.gmra.mxu1 %vm3035_vm4, %v7487_v53  ;;  %v2504_v11 = vadd.f32 %v7358_v25, %v2276_v31 }
 0x317   : > { %5763 = vmatmul.msk.bf16.gmra.mxu2 %vm3035_vm4, %v3389_v62  ;;  %v6067_v59 = vpop.eup %6066  ;;  %v2921_v54 = vmul.f32 0.7978846, %v2889_v45  ;;  %v2794_v55 = vmul.f32 0.044715, %v2730_v27 }
 0x318   : > { %5780 = vmatmul.msk.bf16.gmra.mxu3 %vm3035_vm4, %v3611_v63  ;;  %v2984_v16 = vadd.f32 1.0, %v6067_v59  ;;  %v7513_v59 = vpop.f32.mrf.mxu1 }
 0x319   : > { %6068 = vtanh.f32 %v2921_v54  ;;  %v2826_v5 = vmul.f32 %v2794_v55, %v2730_v27  ;;  %v2762_v54 = vmul.f32 0.5, %v2730_v27 }
 0x31a   : > { %v3016_v46 = vmul.f32 %v2984_v16, %v2760_v57 }
 0x31b   : > { %v2858_v28 = vmul.f32 %v2826_v5, %v2730_v27  ;;  %v3143_v33 = vld [vmem:[#allocation3 + $0xa8] sm:$0xff]  ;;  %v2505_v5 = vadd.f32 %v7365_v36, %v7109_v35 }
 0x31c   : > { %3105 = vst.msk [vmem:[#allocation3 + $0xb1] sm:$0xff] %vm3035_vm4, %v3016_v46  ;;  %v7496_v47 = vpop.f32.mrf.mxu3  ;;  %v2675_v4 = vpop.f32.mrf.mxu0  ;;  %v3365_v21 = vld [vmem:[#allocation3 + $0xa9] sm:$0xff] }
 0x31d   : > { %v2890_v50 = vadd.f32 %v2858_v28, %v2730_v27  ;;  %v2731_v18 = vadd.f32 %v2675_v4, %v2503_v8 }
 0x31f   : > { %v6069_v51 = vpop.eup %6068  ;;  %v2922_v9 = vmul.f32 0.7978846, %v2890_v50  ;;  %v2795_v22 = vmul.f32 0.044715, %v2731_v18  ;;  %5791 = vmatmul.msk.bf16.vlgmr.msrb.gmra.mxu0 %vm3035_vm4, %v7367_v10  ;;  %v2763_v35 = vmul.f32 0.5, %v2731_v18 }
 0x320   : > { %v2985_v48 = vadd.f32 1.0, %v6069_v51 }
 0x321   : > { %6070 = vtanh.f32 %v2922_v9  ;;  %v2827_v13 = vmul.f32 %v2795_v22, %v2731_v18  ;;  %v7524_v22 = vpop.f32.mrf.mxu2 }
 0x322   : > { %v3017_v24 = vmul.f32 %v2985_v48, %v2761_v7  ;;  %v3239_v7 = vpop.f32.mrf.mxu1  ;;  %v8620_v48 = vld [vmem:[#allocation4_spill] sm:$0xff] }
 0x323   : > { %v2859_v17 = vmul.f32 %v2827_v13, %v2731_v18  ;;  %v3144_v20 = vld [vmem:[#allocation3 + $0xb0] sm:$0xff]  ;;  %v2278_v31 = vadd.f32 %v8620_v48, %v2049_v23  ;;  %v8622_v48 = vld [vmem:[#allocation15_spill] sm:$0xff] }
 0x324   : > { %v3366_v44 = vld [vmem:[#allocation3 + $0xb1] sm:$0xff]  ;;  %3106 = vst.msk [vmem:[#allocation3 + $0xc1] sm:$0xff] %vm3035_vm4, %v3017_v24  ;;  %v7505_v29 = vpop.f32.mrf.mxu3  ;;  %v2677_v10 = vpop.f32.mrf.mxu0  ;;  %v7507_v0 = vpack.c.bf16 %v3144_v20, %v3143_v33  ;;  %v7530_v24 = vld [vmem:[%s8543_s4] ss:$0 sm:$0xff] }
 0x325   : > { %v3587_v15 = vld [vmem:[#allocation3 + $0xaa] sm:$0xff]  ;;  %v3390_v30 = vpack.c.bf16 %v3366_v44, %v3365_v21  ;;  %v3588_v43 = vld [vmem:[#allocation3 + $0xb2] sm:$0xff]  ;;  %v2891_v37 = vadd.f32 %v2859_v17, %v2731_v18  ;;  %v2732_v62 = vadd.f32 %v2677_v10, %v2504_v11  ;;  %v2506_v21 = vadd.f32 %v7377_v34, %v2278_v31 }
 0x326   : > { %v3612_v56 = vpack.c.bf16 %v3588_v43, %v3587_v15  ;;  %5747 = vmatmul.msk.bf16.gmra.mxu1 %vm3035_vm4, %v7507_v0  ;;  %v3319_v43 = vadd.f32 %v7530_v24, %v3239_v7  ;;  %v8623_v31 = vld [vmem:[#allocation19_spill] sm:$0xff] }
 0x327   : > { %5764 = vmatmul.msk.bf16.gmra.mxu2 %vm3035_vm4, %v3390_v30  ;;  %v6071_v25 = vpop.eup %6070  ;;  %v2923_v45 = vmul.f32 0.7978846, %v2891_v37  ;;  %v2796_v63 = vmul.f32 0.044715, %v2732_v62 }
 0x328   : > { %5781 = vmatmul.msk.bf16.gmra.mxu3 %vm3035_vm4, %v3612_v56  ;;  %v2986_v55 = vadd.f32 1.0, %v6071_v25 }
 0x329   : > { %6072 = vtanh.f32 %v2923_v45  ;;  %v2828_v57 = vmul.f32 %v2796_v63, %v2732_v62  ;;  %v2764_v63 = vmul.f32 0.5, %v2732_v62 }
 0x32a   : > { %v3018_v16 = vmul.f32 %v2986_v55, %v2762_v54 }
 0x32b   : > { %v2860_v46 = vmul.f32 %v2828_v57, %v2732_v62  ;;  %v3145_v58 = vld [vmem:[#allocation3 + $0xc0] sm:$0xff] }
 0x32c   : > { %3107 = vst.msk [vmem:[#allocation3 + $0xc9] sm:$0xff] %vm3035_vm4, %v3018_v16  ;;  %v2680_v8 = vpop.f32.mrf.mxu0  ;;  %v7518_v50 = vpop.f32.mrf.mxu3  ;;  %v3367_v33 = vld [vmem:[#allocation3 + $0xc1] sm:$0xff] }
 0x32d   : > { %v2892_v28 = vadd.f32 %v2860_v46, %v2732_v62  ;;  %v2733_v4 = vadd.f32 %v2680_v8, %v2505_v5  ;;  %v3241_v8 = vpop.f32.mrf.mxu1 }
 0x32e   : > { %v3320_v62 = vadd.f32 %v7530_v24, %v3241_v8 }
 0x32f   : > { %v6073_v51 = vpop.eup %6072  ;;  %v2924_v27 = vmul.f32 0.7978846, %v2892_v28  ;;  %v2797_v9 = vmul.f32 0.044715, %v2733_v4  ;;  %5792 = vmatmul.msk.bf16.gmra.mxu0 %vm3035_vm4, %v7385_v32  ;;  %v8621_v28 = vld [vmem:[#allocation12_spill] sm:$0xff] }
 0x330   : > { %v2987_v36 = vadd.f32 1.0, %v6073_v51  ;;  %v2507_v51 = vadd.f32 %v7383_v12, %v8621_v28  ;;  %v2765_v12 = vmul.f32 0.5, %v2733_v4 }
 0x331   : > { %6074 = vtanh.f32 %v2924_v27  ;;  %v2829_v13 = vmul.f32 %v2797_v9, %v2733_v4 }
 0x332   : > { %v3019_v61 = vmul.f32 %v2987_v36, %v2763_v35 }
 0x333   : > { %v2861_v32 = vmul.f32 %v2829_v13, %v2733_v4  ;;  %v3146_v11 = vld [vmem:[#allocation3 + $0xc8] sm:$0xff]  ;;  %v2051_v13 = vadd.f32 %v8623_v31, %v8622_v48 }
 0x334   : > { %v3368_v17 = vld [vmem:[#allocation3 + $0xc9] sm:$0xff]  ;;  %3108 = vst.msk [vmem:[#allocation3 + $0xd9] sm:$0xff] %vm3035_vm4, %v3019_v61  ;;  %v2682_v20 = vpop.f32.mrf.mxu0  ;;  %v7534_v44 = vpack.c.bf16 %v3146_v11, %v3145_v58  ;;  %v8624_v11 = vld [vmem:[#allocation17_spill] sm:$0xff] }
 0x335   : > { %v3589_v18 = vld [vmem:[#allocation3 + $0xc2] sm:$0xff]  ;;  %v3391_v15 = vpack.c.bf16 %v3368_v17, %v3367_v33  ;;  %v3590_v10 = vld [vmem:[#allocation3 + $0xca] sm:$0xff]  ;;  %v2893_v30 = vadd.f32 %v2861_v32, %v2733_v4  ;;  %v2734_v37 = vadd.f32 %v2682_v20, %v2506_v21  ;;  %v2280_v17 = vadd.f32 %v8624_v11, %v2051_v13  ;;  %v8625_v13 = vld [vmem:[#allocation5_spill] sm:$0xff] }
 0x336   : > { %v3613_v56 = vpack.c.bf16 %v3590_v10, %v3589_v18  ;;  %5748 = vmatmul.msk.bf16.gmra.mxu1 %vm3035_vm4, %v7534_v44  ;;  %v3461_v55 = vpop.f32.mrf.mxu2 }
 0x337   : > { %5765 = vmatmul.msk.bf16.gmra.mxu2 %vm3035_vm4, %v3391_v15  ;;  %v6075_v34 = vpop.eup %6074  ;;  %v2925_v25 = vmul.f32 0.7978846, %v2893_v30  ;;  %v2798_v45 = vmul.f32 0.044715, %v2734_v37  ;;  %v3683_v57 = vpop.f32.mrf.mxu3  ;;  %v3541_v16 = vadd.f32 %v3461_v55, %v3319_v43  ;;  %v2508_v43 = vadd.f32 %v7394_v6, %v2280_v17  ;;  %v8626_v17 = vld [vmem:[#allocation6_spill] sm:$0xff] }
 0x338   : > { %5782 = vmatmul.msk.bf16.gmra.mxu3 %vm3035_vm4, %v3613_v56  ;;  %v2988_v54 = vadd.f32 1.0, %v6075_v34 }
 0x339   : > { %6076 = vtanh.f32 %v2925_v25  ;;  %v2830_v5 = vmul.f32 %v2798_v45, %v2734_v37  ;;  %v7543_v23 = vadd.f32 %v3683_v57, %v3541_v16 }
 0x33a   : > { %v3020_v46 = vmul.f32 %v2988_v54, %v2764_v63 }
 0x33b   : > { %v2862_v27 = vmul.f32 %v2830_v5, %v2734_v37  ;;  %v3147_v10 = vld [vmem:[#allocation3 + $0xd8] sm:$0xff] }
 0x33c   : > { %3109 = vst.msk [vmem:[#allocation3 + $0xe1] sm:$0xff] %vm3035_vm4, %v3020_v46  ;;  %v2685_v9 = vpop.f32.mrf.mxu0  ;;  %v3369_v30 = vld [vmem:[#allocation3 + $0xd9] sm:$0xff] }
 0x33d   : > { %v2894_v35 = vadd.f32 %v2862_v27, %v2734_v37  ;;  %v2735_v36 = vadd.f32 %v2685_v9, %v2507_v51  ;;  %v2766_v51 = vmul.f32 0.5, %v2734_v37 }
 0x33e   : > { %v3463_v21 = vpop.f32.mrf.mxu2 }
 0x33f   : > { %v6077_v7 = vpop.eup %6076  ;;  %v2926_v61 = vmul.f32 0.7978846, %v2894_v35  ;;  %v2799_v58 = vmul.f32 0.044715, %v2735_v36  ;;  %5793 = vmatmul.msk.bf16.gmra.mxu0 %vm3035_vm4, %v7404_v49  ;;  %v3685_v32 = vpop.f32.mrf.mxu3  ;;  %v3542_v18 = vadd.f32 %v3463_v21, %v3320_v62 }
 0x340   : > { %v2989_v33 = vadd.f32 1.0, %v6077_v7 }
 0x341   : > { %6078 = vtanh.f32 %v2926_v61  ;;  %v2831_v20 = vmul.f32 %v2799_v58, %v2735_v36  ;;  %v7553_v56 = vadd.f32 %v3685_v32, %v3542_v18  ;;  %v2509_v61 = vadd.f32 %v7402_v2, %v8625_v13  ;;  %v8627_v18 = vld [vmem:[#allocation8_spill] sm:$0xff] }
 0x342   : > { %v3021_v15 = vmul.f32 %v2989_v33, %v2765_v12  ;;  %v2767_v2 = vmul.f32 0.5, %v2735_v36 }
 0x343   : > { %v2863_v34 = vmul.f32 %v2831_v20, %v2735_v36  ;;  %v3244_v25 = vpop.f32.mrf.mxu1  ;;  %v3148_v45 = vld [vmem:[#allocation3 + $0xe0] sm:$0xff]  ;;  %v2053_v20 = vadd.f32 %v8627_v18, %v8626_v17 }
 0x344   : > { %v3370_v49 = vld [vmem:[#allocation3 + $0xe1] sm:$0xff]  ;;  %3110 = vst.msk [vmem:[#allocation3 + $0xf1] sm:$0xff] %vm3035_vm4, %v3021_v15  ;;  %v2687_v63 = vpop.f32.mrf.mxu0  ;;  %v7556_v54 = vpack.c.bf16 %v3148_v45, %v3147_v10  ;;  %v3321_v9 = vadd.f32 %v7530_v24, %v3244_v25 }
 0x345   : > { %v3591_v4 = vld [vmem:[#allocation3 + $0xda] sm:$0xff]  ;;  %v3392_v55 = vpack.c.bf16 %v3370_v49, %v3369_v30  ;;  %v3592_v57 = vld [vmem:[#allocation3 + $0xe2] sm:$0xff]  ;;  %v2895_v16 = vadd.f32 %v2863_v34, %v2735_v36  ;;  %v7558_v5 = vadd.f32 %v2687_v63, %v2508_v43 }
 0x346   : > { %v3614_v46 = vpack.c.bf16 %v3592_v57, %v3591_v4  ;;  %5749 = vmatmul.msk.bf16.gmra.mxu1 %vm3035_vm4, %v7556_v54  ;;  %v8628_v34 = vld [vmem:[#allocation7_spill] sm:$0xff] }
 0x347   : > { %5766 = vmatmul.msk.bf16.gmra.mxu2 %vm3035_vm4, %v3392_v55  ;;  %v6079_v6 = vpop.eup %6078  ;;  %v2927_v8 = vmul.f32 0.7978846, %v2895_v16  ;;  %v2800_v28 = vmul.f32 0.044715, %v7558_v5  ;;  %v2282_v25 = vadd.f32 %v8628_v34, %v2053_v20 }
 0x348   : > { %5783 = vmatmul.msk.bf16.gmra.mxu3 %vm3035_vm4, %v3614_v46  ;;  %v2990_v27 = vadd.f32 1.0, %v6079_v6 }
 0x349   : > { %6080 = vtanh.f32 %v2927_v8  ;;  %v2832_v35 = vmul.f32 %v2800_v28, %v7558_v5  ;;  %v2510_v46 = vadd.f32 %v7413_v38, %v2282_v25 }
 0x34a   : > { %v3466_v62 = vpop.f32.mrf.mxu2  ;;  %v3022_v7 = vmul.f32 %v2990_v27, %v2766_v51 }
 0x34b   : > { %v3543_v48 = vadd.f32 %v3466_v62, %v3321_v9  ;;  %v3688_v31 = vpop.f32.mrf.mxu3  ;;  %v2864_v58 = vmul.f32 %v2832_v35, %v7558_v5  ;;  %v3246_v12 = vpop.f32.mrf.mxu1  ;;  %v3149_v57 = vld [vmem:[#allocation3 + $0xf0] sm:$0xff] }
 0x34c   : > { %3111 = vst.msk [vmem:[#allocation3 + $0xf9] sm:$0xff] %vm3035_vm4, %v3022_v7  ;;  %v2690_v37 = vpop.f32.mrf.mxu0  ;;  %v3322_v43 = vadd.f32 %v7530_v24, %v3246_v12  ;;  %v3371_v16 = vld [vmem:[#allocation3 + $0xf1] sm:$0xff] }
 0x34d   : > { %v7571_v33 = vadd.f32 %v3688_v31, %v3543_v48  ;;  %v2896_v21 = vadd.f32 %v2864_v58, %v7558_v5  ;;  %v2737_v32 = vadd.f32 %v2690_v37, %v2509_v61  ;;  %v2768_v58 = vmul.f32 0.5, %v7558_v5 }
 0x34f   : > { %v6081_v11 = vpop.eup %6080  ;;  %v2928_v15 = vmul.f32 0.7978846, %v2896_v21  ;;  %v2801_v10 = vmul.f32 0.044715, %v2737_v32  ;;  %5794 = vmatmul.msk.bf16.gmra.mxu0 %vm3035_vm4, %v7428_v1 }
 0x350   : > { %v2991_v30 = vadd.f32 1.0, %v6081_v11 }
 0x351   : > { %6082 = vtanh.f32 %v2928_v15  ;;  %v2833_v45 = vmul.f32 %v2801_v10, %v2737_v32  ;;  %v2511_v15 = vadd.f32 %v7426_v41, %v7160_v3  ;;  %v2769_v3 = vmul.f32 0.5, %v2737_v32 }
 0x352   : > { %v3468_v49 = vpop.f32.mrf.mxu2  ;;  %v3023_v4 = vmul.f32 %v2991_v30, %v2767_v2 }
 0x353   : > { %v3544_v63 = vadd.f32 %v3468_v49, %v3322_v43  ;;  %v3690_v55 = vpop.f32.mrf.mxu3  ;;  %v2865_v6 = vmul.f32 %v2833_v45, %v2737_v32  ;;  %v3249_v8 = vpop.f32.mrf.mxu1  ;;  %v3150_v28 = vld [vmem:[#allocation3 + $0xf8] sm:$0xff] }
 0x354   : > { %v3372_v1 = vld [vmem:[#allocation3 + $0xf9] sm:$0xff]  ;;  %3112 = vst.msk [vmem:[#allocation3 + $0x109] sm:$0xff] %vm3035_vm4, %v3023_v4  ;;  %v2692_v27 = vpop.f32.mrf.mxu0  ;;  %v7584_v9 = vpack.c.bf16 %v3150_v28, %v3149_v57  ;;  %v3323_v37 = vadd.f32 %v7530_v24, %v3249_v8 }
 0x355   : > { %v3593_v36 = vld [vmem:[#allocation3 + $0xf2] sm:$0xff]  ;;  %v7582_v51 = vadd.f32 %v3690_v55, %v3544_v63  ;;  %v3393_v35 = vpack.c.bf16 %v3372_v1, %v3371_v16  ;;  %v3594_v62 = vld [vmem:[#allocation3 + $0xfa] sm:$0xff]  ;;  %v2897_v7 = vadd.f32 %v2865_v6, %v2737_v32  ;;  %v7586_v48 = vadd.f32 %v2692_v27, %v2510_v46 }
 0x356   : > { %v3615_v31 = vpack.c.bf16 %v3594_v62, %v3593_v36  ;;  %5750 = vmatmul.msk.bf16.gmra.mxu1 %vm3035_vm4, %v7584_v9  ;;  %v8629_v45 = vld [vmem:[#allocation9_spill] sm:$0xff]  ;;  %v8630_v57 = vld [vmem:[#allocation10_spill] sm:$0xff] }
 0x357   : > { %5767 = vmatmul.msk.bf16.gmra.mxu2 %vm3035_vm4, %v3393_v35  ;;  %v6083_v38 = vpop.eup %6082  ;;  %v2929_v13 = vmul.f32 0.7978846, %v2897_v7  ;;  %v2802_v61 = vmul.f32 0.044715, %v7586_v48  ;;  %v2055_v49 = vadd.f32 %v8629_v45, %v7165_v42  ;;  %v2513_v45 = vadd.f32 %v7465_v26, %v7178_v14 }
 0x358   : > { %5784 = vmatmul.msk.bf16.gmra.mxu3 %vm3035_vm4, %v3615_v31  ;;  %v2992_v12 = vadd.f32 1.0, %v6083_v38 }
 0x359   : > { %6084 = vtanh.f32 %v2929_v13  ;;  %v2834_v21 = vmul.f32 %v2802_v61, %v7586_v48  ;;  %v2284_v16 = vadd.f32 %v8630_v57, %v2055_v49  ;;  %v8631_v57 = vld [vmem:[#allocation11_spill] sm:$0xff] }
 0x35a   : > { %v3471_v11 = vpop.f32.mrf.mxu2  ;;  %v3024_v17 = vmul.f32 %v2992_v12, %v2768_v58 }
 0x35b   : > { %v3545_v18 = vadd.f32 %v3471_v11, %v3323_v37  ;;  %v3693_v20 = vpop.f32.mrf.mxu3  ;;  %v2866_v10 = vmul.f32 %v2834_v21, %v7586_v48  ;;  %v3251_v2 = vpop.f32.mrf.mxu1  ;;  %v3151_v36 = vld [vmem:[#allocation3 + $0x108] sm:$0xff]  ;;  %v2512_v42 = vadd.f32 %v7451_v40, %v2284_v16  ;;  %v2057_v16 = vadd.f32 %v8631_v57, %v7183_v39 }
 0x35c   : > { %3113 = vst.msk [vmem:[#allocation3 + $0x111] sm:$0xff] %vm3035_vm4, %v3024_v17  ;;  %v2695_v5 = vpop.f32.mrf.mxu0  ;;  %v3324_v55 = vadd.f32 %v7530_v24, %v3251_v2  ;;  %v3373_v27 = vld [vmem:[#allocation3 + $0x109] sm:$0xff] }
 0x35d   : > { %v7600_v30 = vadd.f32 %v3693_v20, %v3545_v18  ;;  %v2898_v43 = vadd.f32 %v2866_v10, %v7586_v48  ;;  %v2739_v34 = vadd.f32 %v2695_v5, %v2511_v15  ;;  %v2770_v18 = vmul.f32 0.5, %v7586_v48 }
 0x35f   : > { %v6085_v25 = vpop.eup %6084  ;;  %v2930_v4 = vmul.f32 0.7978846, %v2898_v43  ;;  %v2803_v63 = vmul.f32 0.044715, %v2739_v34  ;;  %5795 = vmatmul.msk.bf16.gmra.mxu0 %vm3035_vm4, %v7467_v19  ;;  %v2771_v14 = vmul.f32 0.5, %v2739_v34 }
 0x360   : > { %v2993_v41 = vadd.f32 1.0, %v6085_v25 }
 0x361   : > { %6086 = vtanh.f32 %v2930_v4  ;;  %v2835_v46 = vmul.f32 %v2803_v63, %v2739_v34 }
 0x362   : > { %v3473_v6 = vpop.f32.mrf.mxu2  ;;  %v3025_v8 = vmul.f32 %v2993_v41, %v2769_v3 }
 0x363   : > { %v3546_v28 = vadd.f32 %v3473_v6, %v3324_v55  ;;  %v3695_v1 = vpop.f32.mrf.mxu3  ;;  %v2867_v35 = vmul.f32 %v2835_v46, %v2739_v34  ;;  %v3254_v62 = vpop.f32.mrf.mxu1  ;;  %v3152_v7 = vld [vmem:[#allocation3 + $0x110] sm:$0xff] }
 0x364   : > { %v3374_v19 = vld [vmem:[#allocation3 + $0x111] sm:$0xff]  ;;  %3114 = vst.msk [vmem:[#allocation3 + $0x121] sm:$0xff] %vm3035_vm4, %v3025_v8  ;;  %v2697_v38 = vpop.f32.mrf.mxu0  ;;  %v7613_v13 = vpack.c.bf16 %v3152_v7, %v3151_v36  ;;  %v3325_v15 = vadd.f32 %v7530_v24, %v3254_v62 }
 0x365   : > { %v3595_v32 = vld [vmem:[#allocation3 + $0x10a] sm:$0xff]  ;;  %v7611_v31 = vadd.f32 %v3695_v1, %v3546_v28  ;;  %v3394_v61 = vpack.c.bf16 %v3374_v19, %v3373_v27  ;;  %v3596_v58 = vld [vmem:[#allocation3 + $0x112] sm:$0xff]  ;;  %v2899_v12 = vadd.f32 %v2867_v35, %v2739_v34  ;;  %v7615_v37 = vadd.f32 %v2697_v38, %v2512_v42 }
 0x366   : > { %v3616_v21 = vpack.c.bf16 %v3596_v58, %v3595_v32  ;;  %5751 = vmatmul.msk.bf16.gmra.mxu1 %vm3035_vm4, %v7613_v13  ;;  %v8632_v28 = vld [vmem:[#allocation13_spill] sm:$0xff] }
 0x367   : > { %5768 = vmatmul.msk.bf16.gmra.mxu2 %vm3035_vm4, %v3394_v61  ;;  %v6087_v40 = vpop.eup %6086  ;;  %v2931_v11 = vmul.f32 0.7978846, %v2899_v12  ;;  %v2804_v17 = vmul.f32 0.044715, %v7615_v37  ;;  %v2286_v1 = vadd.f32 %v8632_v28, %v2057_v16  ;;  %v8635_v28 = vld [vmem:[#allocation18_spill] sm:$0xff] }
 0x368   : > { %5785 = vmatmul.msk.bf16.gmra.mxu3 %vm3035_vm4, %v3616_v21  ;;  %v2994_v20 = vadd.f32 1.0, %v6087_v40 }
 0x369   : > { %6088 = vtanh.f32 %v2931_v11  ;;  %v2836_v10 = vmul.f32 %v2804_v17, %v7615_v37  ;;  %v2514_v39 = vadd.f32 %v7477_v60, %v2286_v1 }
 0x36a   : > { %v3476_v2 = vpop.f32.mrf.mxu2  ;;  %v3026_v5 = vmul.f32 %v2994_v20, %v2770_v18 }
 0x36b   : > { %v3547_v43 = vadd.f32 %v3476_v2, %v3325_v15  ;;  %v3698_v25 = vpop.f32.mrf.mxu3  ;;  %v2868_v49 = vmul.f32 %v2836_v10, %v7615_v37  ;;  %v3256_v4 = vpop.f32.mrf.mxu1  ;;  %v3153_v7 = vld [vmem:[#allocation3 + $0x120] sm:$0xff]  ;;  %v2772_v2 = vmul.f32 0.5, %v7615_v37 }
 0x36c   : > { %3115 = vst.msk [vmem:[#allocation3 + $0x129] sm:$0xff] %vm3035_vm4, %v3026_v5  ;;  %v2700_v48 = vpop.f32.mrf.mxu0  ;;  %v3326_v8 = vadd.f32 %v7530_v24, %v3256_v4  ;;  %v3375_v19 = vld [vmem:[#allocation3 + $0x121] sm:$0xff] }
 0x36d   : > { %v7629_v63 = vadd.f32 %v3698_v25, %v3547_v43  ;;  %v2900_v3 = vadd.f32 %v2868_v49, %v7615_v37  ;;  %v2741_v41 = vadd.f32 %v2700_v48, %v2513_v45 }
 0x36f   : > { %v6089_v55 = vpop.eup %6088  ;;  %v2932_v46 = vmul.f32 0.7978846, %v2900_v3  ;;  %v2805_v6 = vmul.f32 0.044715, %v2741_v41  ;;  %5796 = vmatmul.msk.bf16.gmra.mxu0 %vm3035_vm4, %v7487_v53  ;;  %v8633_v3 = vld [vmem:[#allocation14_spill] sm:$0xff] }
 0x370   : > { %v2995_v26 = vadd.f32 1.0, %v6089_v55  ;;  %v2515_v55 = vadd.f32 %v7485_v52, %v8633_v3  ;;  %v2773_v52 = vmul.f32 0.5, %v2741_v41 }
 0x371   : > { %6090 = vtanh.f32 %v2932_v46  ;;  %v2837_v36 = vmul.f32 %v2805_v6, %v2741_v41 }
 0x372   : > { %v3478_v27 = vpop.f32.mrf.mxu2  ;;  %v3027_v42 = vmul.f32 %v2995_v26, %v2771_v14 }
 0x373   : > { %v3548_v35 = vadd.f32 %v3478_v27, %v3326_v8  ;;  %v3700_v62 = vpop.f32.mrf.mxu3  ;;  %v2869_v32 = vmul.f32 %v2837_v36, %v2741_v41  ;;  %v3259_v38 = vpop.f32.mrf.mxu1  ;;  %v3154_v61 = vld [vmem:[#allocation3 + $0x128] sm:$0xff]  ;;  %v8634_v8 = vld [vmem:[#allocation16_spill] sm:$0xff] }
 0x374   : > { %v3376_v53 = vld [vmem:[#allocation3 + $0x129] sm:$0xff]  ;;  %3116 = vst.msk [vmem:[#allocation3 + $0x139] sm:$0xff] %vm3035_vm4, %v3027_v42  ;;  %v2702_v12 = vpop.f32.mrf.mxu0  ;;  %v7642_v21 = vpack.c.bf16 %v3154_v61, %v3153_v7  ;;  %v3327_v43 = vadd.f32 %v7530_v24, %v3259_v38  ;;  %v2059_v1 = vadd.f32 %v8635_v28, %v8634_v8 }
 0x375   : > { %v3597_v34 = vld [vmem:[#allocation3 + $0x122] sm:$0xff]  ;;  %v7640_v58 = vadd.f32 %v3700_v62, %v3548_v35  ;;  %v3395_v40 = vpack.c.bf16 %v3376_v53, %v3375_v19  ;;  %v3598_v11 = vld [vmem:[#allocation3 + $0x12a] sm:$0xff]  ;;  %v2901_v17 = vadd.f32 %v2869_v32, %v2741_v41  ;;  %v7644_v18 = vadd.f32 %v2702_v12, %v2514_v39 }
 0x376   : > { %v3617_v20 = vpack.c.bf16 %v3598_v11, %v3597_v34  ;;  %5752 = vmatmul.msk.bf16.gmra.mxu1 %vm3035_vm4, %v7642_v21  ;;  %v8636_v62 = vld [vmem:[#allocation20_spill] sm:$0xff] }
 0x377   : > { %5769 = vmatmul.msk.bf16.gmra.mxu2 %vm3035_vm4, %v3395_v40  ;;  %v6091_v60 = vpop.eup %6090  ;;  %v2933_v15 = vmul.f32 0.7978846, %v2901_v17  ;;  %v2806_v10 = vmul.f32 0.044715, %v7644_v18  ;;  %v2288_v7 = vadd.f32 %v8636_v62, %v2059_v1 }
 0x378   : > { %5786 = vmatmul.msk.bf16.gmra.mxu3 %vm3035_vm4, %v3617_v20  ;;  %v2996_v5 = vadd.f32 1.0, %v6091_v60 }
 0x379   : > { %6092 = vtanh.f32 %v2933_v15  ;;  %v2838_v25 = vmul.f32 %v2806_v10, %v7644_v18  ;;  %v2516_v12 = vadd.f32 %v7496_v47, %v2288_v7 }
 0x37a   : > { %v3481_v45 = vpop.f32.mrf.mxu2  ;;  %v3028_v49 = vmul.f32 %v2996_v5, %v2772_v2 }
 0x37b   : > { %v3549_v4 = vadd.f32 %v3481_v45, %v3327_v43  ;;  %v3703_v48 = vpop.f32.mrf.mxu3  ;;  %v2870_v57 = vmul.f32 %v2838_v25, %v7644_v18  ;;  %v3261_v16 = vpop.f32.mrf.mxu1  ;;  %v3155_v53 = vld [vmem:[#allocation3 + $0x138] sm:$0xff] }
 0x37c   : > { %3117 = vst.msk [vmem:[#allocation3 + $0x141] sm:$0xff] %vm3035_vm4, %v3028_v49  ;;  %v2705_v37 = vpop.f32.mrf.mxu0  ;;  %v3328_v35 = vadd.f32 %v7530_v24, %v3261_v16  ;;  %v3377_v34 = vld [vmem:[#allocation3 + $0x139] sm:$0xff] }
 0x37d   : > { %v7658_v46 = vadd.f32 %v3703_v48, %v3549_v4  ;;  %v2902_v6 = vadd.f32 %v2870_v57, %v7644_v18  ;;  %v2743_v14 = vadd.f32 %v2705_v37, %v2515_v55  ;;  %v2774_v4 = vmul.f32 0.5, %v7644_v18 }
 0x37f   : > { %v6093_v26 = vpop.eup %6092  ;;  %v2934_v36 = vmul.f32 0.7978846, %v2902_v6  ;;  %v2807_v27 = vmul.f32 0.044715, %v2743_v14  ;;  %5797 = vmatmul.msk.bf16.gmra.mxu0 %vm3035_vm4, %v7507_v0 }
 0x380   : > { %v2997_v42 = vadd.f32 1.0, %v6093_v26  ;;  %v8637_v26 = vld [vmem:[#allocation21_spill] sm:$0xff] }
 0x381   : > { %6094 = vtanh.f32 %v2934_v36  ;;  %v2839_v19 = vmul.f32 %v2807_v27, %v2743_v14  ;;  %v2517_v8 = vadd.f32 %v7505_v29, %v8637_v26  ;;  %v2775_v29 = vmul.f32 0.5, %v2743_v14 }
 0x382   : > { %v3483_v39 = vpop.f32.mrf.mxu2  ;;  %v3029_v32 = vmul.f32 %v2997_v42, %v2773_v52 }
 0x383   : > { %v3550_v38 = vadd.f32 %v3483_v39, %v3328_v35  ;;  %v3705_v61 = vpop.f32.mrf.mxu3  ;;  %v2871_v40 = vmul.f32 %v2839_v19, %v2743_v14  ;;  %v3264_v11 = vpop.f32.mrf.mxu1  ;;  %v3156_v17 = vld [vmem:[#allocation3 + $0x140] sm:$0xff] }
 0x384   : > { %v3378_v0 = vld [vmem:[#allocation3 + $0x141] sm:$0xff]  ;;  %3118 = vst.msk [vmem:[#allocation3 + $0x151] sm:$0xff] %vm3035_vm4, %v3029_v32  ;;  %v2707_v60 = vpop.f32.mrf.mxu0  ;;  %v7671_v15 = vpack.c.bf16 %v3156_v17, %v3155_v53  ;;  %v3329_v3 = vadd.f32 %v7530_v24, %v3264_v11 }
 0x385   : > { %v3599_v41 = vld [vmem:[#allocation3 + $0x13a] sm:$0xff]  ;;  %v7669_v20 = vadd.f32 %v3705_v61, %v3550_v38  ;;  %v7673_v10 = vpack.c.bf16 %v3378_v0, %v3377_v34  ;;  %v3600_v2 = vld [vmem:[#allocation3 + $0x142] sm:$0xff]  ;;  %v2903_v5 = vadd.f32 %v2871_v40, %v2743_v14  ;;  %v7675_v43 = vadd.f32 %v2707_v60, %v2516_v12 }
 0x386   : > { %v7677_v25 = vpack.c.bf16 %v3600_v2, %v3599_v41  ;;  %5753 = vmatmul.msk.bf16.gmra.mxu1 %vm3035_vm4, %v7671_v15  ;;  %v8638_v35 = vld [vmem:[#allocation22_spill] sm:$0xff] }
 0x387   : > { %5770 = vmatmul.msk.bf16.gmra.mxu2 %vm3035_vm4, %v7673_v10  ;;  %v6095_v47 = vpop.eup %6094  ;;  %v2935_v45 = vmul.f32 0.7978846, %v2903_v5  ;;  %v2808_v49 = vmul.f32 0.044715, %v7675_v43  ;;  %v2061_v62 = vadd.f32 %v7513_v59, %v8638_v35 }
 0x388   : > { %5787 = vmatmul.msk.bf16.gmra.mxu3 %vm3035_vm4, %v7677_v25  ;;  %v2998_v48 = vadd.f32 1.0, %v6095_v47 }
 0x389   : > { %6096 = vtanh.f32 %v2935_v45  ;;  %v2840_v55 = vmul.f32 %v2808_v49, %v7675_v43  ;;  %v2290_v38 = vadd.f32 %v7524_v22, %v2061_v62  ;;  %v5841_v49 = vld [vmem:[%s8542_s3 + $0xc] sm:$0x3] }
 0x38a   : > { %v3486_v57 = vpop.f32.mrf.mxu2  ;;  %v3030_v16 = vmul.f32 %v2998_v48, %v2774_v4 }
 0x38b   : > { %v3551_v37 = vadd.f32 %v3486_v57, %v3329_v3  ;;  %v3708_v6 = vpop.f32.mrf.mxu3  ;;  %v2872_v28 = vmul.f32 %v2840_v55, %v7675_v43  ;;  %v3266_v1 = vpop.f32.mrf.mxu1  ;;  %v3157_v11 = vld [vmem:[#allocation3 + $0x150] sm:$0xff]  ;;  %v2518_v59 = vadd.f32 %v7518_v50, %v2290_v38  ;;  %v4561_v3 = vsel %vm3226_vm3, %v5841_v49, 0 }
 0x38c   : > { %3119 = vst.msk [vmem:[#allocation3 + $0x159] sm:$0xff] %vm3035_vm4, %v3030_v16  ;;  %v2710_v18 = vpop.f32.mrf.mxu0  ;;  %v3330_v32 = vadd.f32 %v7530_v24, %v3266_v1  ;;  %v3379_v17 = vld [vmem:[#allocation3 + $0x151] sm:$0xff]  ;;  %4570 = vmatpush.bf16.msra.mxu3 %v4561_v3 }
 0x38d   : > { %v7693_v36 = vadd.f32 %v3708_v6, %v3551_v37  ;;  %v2904_v27 = vadd.f32 %v2872_v28, %v7675_v43  ;;  %v2745_v52 = vadd.f32 %v2710_v18, %v2517_v8  ;;  %v2776_v37 = vmul.f32 0.5, %v7675_v43 }
 0x38f   : > { %v6097_v42 = vpop.eup %6096  ;;  %v2936_v7 = vmul.f32 0.7978846, %v2904_v27  ;;  %v2809_v19 = vmul.f32 0.044715, %v2745_v52  ;;  %5798 = vmatmul.msk.bf16.gmra.mxu0 %vm3035_vm4, %v7534_v44 }
 0x390   : > { %v2999_v39 = vadd.f32 1.0, %v6097_v42 }
 0x391   : > { %6098 = vtanh.f32 %v2936_v7  ;;  %v2841_v61 = vmul.f32 %v2809_v19, %v2745_v52 }
 0x392   : > { %v3488_v53 = vpop.f32.mrf.mxu2  ;;  %v3031_v34 = vmul.f32 %v2999_v39, %v2775_v29 }
 0x393   : > { %v3552_v12 = vadd.f32 %v3488_v53, %v3330_v32  ;;  %v3710_v40 = vpop.f32.mrf.mxu3  ;;  %v2873_v0 = vmul.f32 %v2841_v61, %v2745_v52  ;;  %v3269_v41 = vpop.f32.mrf.mxu1  ;;  %v3158_v60 = vld [vmem:[#allocation3 + $0x158] sm:$0xff]  ;;  %v2777_v32 = vmul.f32 0.5, %v2745_v52 }
 0x394   : > { %v3380_v44 = vld [vmem:[#allocation3 + $0x159] sm:$0xff]  ;;  %3120 = vst.msk [vmem:[#allocation3 + $0x169] sm:$0xff] %vm3035_vm4, %v3031_v34  ;;  %v2712_v22 = vpop.f32.mrf.mxu0  ;;  %v7706_v5 = vpack.c.bf16 %v3158_v60, %v3157_v11  ;;  %v3331_v26 = vadd.f32 %v7530_v24, %v3269_v41 }
 0x395   : > { %v3601_v14 = vld [vmem:[#allocation3 + $0x152] sm:$0xff]  ;;  %v7704_v2 = vadd.f32 %v3710_v40, %v3552_v12  ;;  %v7708_v47 = vpack.c.bf16 %v3380_v44, %v3379_v17  ;;  %v3602_v45 = vld [vmem:[#allocation3 + $0x15a] sm:$0xff]  ;;  %v2905_v50 = vadd.f32 %v2873_v0, %v2745_v52  ;;  %v2746_v4 = vadd.f32 %v2712_v22, %v2518_v59 }
 0x396   : > { %v7713_v48 = vpack.c.bf16 %v3602_v45, %v3601_v14  ;;  %5754 = vmatmul.msk.bf16.gmra.mxu1 %vm3035_vm4, %v7706_v5 }
 0x397   : > { %5771 = vmatmul.msk.bf16.gmra.mxu2 %vm3035_vm4, %v7708_v47  ;;  %v6099_v55 = vpop.eup %6098  ;;  %v2937_v57 = vmul.f32 0.7978846, %v2905_v50  ;;  %v2810_v16 = vmul.f32 0.044715, %v2746_v4  ;;  %v2778_v50 = vmul.f32 0.5, %v2746_v4 }
 0x398   : > { %5788 = vmatmul.msk.bf16.gmra.mxu3 %vm3035_vm4, %v7713_v48  ;;  %v3000_v6 = vadd.f32 1.0, %v6099_v55 }
 0x399   : > { %6100 = vtanh.f32 %v2937_v57  ;;  %v2842_v8 = vmul.f32 %v2810_v16, %v2746_v4 }
 0x39a   : > { %v3491_v28 = vpop.f32.mrf.mxu2  ;;  %v3032_v1 = vmul.f32 %v3000_v6, %v2776_v37 }
 0x39b   : > { %v3553_v18 = vadd.f32 %v3491_v28, %v3331_v26  ;;  %v3713_v27 = vpop.f32.mrf.mxu3  ;;  %v2874_v42 = vmul.f32 %v2842_v8, %v2746_v4  ;;  %v3271_v35 = vpop.f32.mrf.mxu1  ;;  %v3159_v11 = vld [vmem:[#allocation3 + $0x168] sm:$0xff] }
 0x39c   : > { %3121 = vst.msk [vmem:[#allocation3 + $0x171] sm:$0xff] %vm3035_vm4, %v3032_v1  ;;  %v3905_v7 = vpop.f32.mrf.mxu0  ;;  %v3332_v61 = vadd.f32 %v7530_v24, %v3271_v35  ;;  %v3381_v17 = vld [vmem:[#allocation3 + $0x169] sm:$0xff] }
 0x39d   : > { %v7725_v62 = vadd.f32 %v3713_v27, %v3553_v18  ;;  %v2906_v19 = vadd.f32 %v2874_v42, %v2746_v4  ;;  %v7728_v43 = vadd.f32 %v3905_v7, %v7543_v23  ;;  %v4018_v18 = vld [vmem:[#allocation3 + $0x21] sm:$0xff] }
 0x39e   : > { %v4239_v27 = vld [vmem:[#allocation3 + $0x1a] sm:$0xff]  ;;  %v4240_v42 = vld [vmem:[#allocation3 + $0x22] sm:$0xff] }
 0x39f   : > { %v6101_v29 = vpop.eup %6100  ;;  %v2938_v39 = vmul.f32 0.7978846, %v2906_v19  ;;  %5799 = vmatmul.msk.bf16.gmra.mxu0 %vm3035_vm4, %v7556_v54  ;;  %v4463_v19 = vld [vmem:[#allocation3 + $0x38] sm:$0xff] }
 0x3a0   : > { %v3001_v38 = vadd.f32 1.0, %v6101_v29 }
 0x3a1   : > { %6102 = vtanh.f32 %v2938_v39  ;;  %v4017_v39 = vld [vmem:[#allocation3 + $0x19] sm:$0xff] }
 0x3a2   : > { %v3493_v53 = vpop.f32.mrf.mxu2  ;;  %v3033_v34 = vmul.f32 %v3001_v38, %v2777_v32 }
 0x3a3   : > { %v3554_v12 = vadd.f32 %v3493_v53, %v3332_v61  ;;  %v3715_v40 = vpop.f32.mrf.mxu3  ;;  %v3274_v59 = vpop.f32.mrf.mxu1  ;;  %v3160_v0 = vld [vmem:[#allocation3 + $0x170] sm:$0xff]  ;;  %v4049_v61 = vpack.c.bf16 %v4018_v18, %v4017_v39 }
 0x3a4   : > { %v3382_v23 = vld [vmem:[#allocation3 + $0x171] sm:$0xff]  ;;  %3122 = vst.msk [vmem:[#allocation3 + $0x181] sm:$0xff] %vm3035_vm4, %v3033_v34  ;;  %v3907_v54 = vpop.f32.mrf.mxu0  ;;  %v7736_v52 = vpack.c.bf16 %v3160_v0, %v3159_v11  ;;  %v3333_v55 = vadd.f32 %v7530_v24, %v3274_v59 }
 0x3a5   : > { %v3603_v41 = vld [vmem:[#allocation3 + $0x16a] sm:$0xff]  ;;  %v7734_v60 = vadd.f32 %v3715_v40, %v3554_v12  ;;  %v7738_v44 = vpack.c.bf16 %v3382_v23, %v3381_v17  ;;  %v3604_v14 = vld [vmem:[#allocation3 + $0x172] sm:$0xff]  ;;  %v7741_v22 = vadd.f32 %v3907_v54, %v7553_v56 }
 0x3a6   : > { %v7743_v45 = vpack.c.bf16 %v3604_v14, %v3603_v41  ;;  %5755 = vmatmul.msk.bf16.gmra.mxu1 %vm3035_vm4, %v7736_v52  ;;  %v4462_v53 = vld [vmem:[#allocation3 + $0x30] sm:$0xff]  ;;  %v4020_v14 = vld [vmem:[#allocation3 + $0x39] sm:$0xff] }
 0x3a7   : > { %5772 = vmatmul.msk.bf16.gmra.mxu2 %vm3035_vm4, %v7738_v44  ;;  %v6103_v49 = vpop.eup %6102 }
 0x3a8   : > { %5789 = vmatmul.msk.bf16.gmra.mxu3 %vm3035_vm4, %v7743_v45  ;;  %v3002_v3 = vadd.f32 1.0, %v6103_v49  ;;  %v4241_v49 = vld [vmem:[#allocation3 + $0x32] sm:$0xff] }
 0x3aa   : > { %v3496_v57 = vpop.f32.mrf.mxu2  ;;  %v3034_v16 = vmul.f32 %v3002_v3, %v2778_v50  ;;  %v4242_v50 = vld [vmem:[#allocation3 + $0x3a] sm:$0xff] }
 0x3ab   : > { %v3555_v56 = vadd.f32 %v3496_v57, %v3333_v55  ;;  %v3718_v37 = vpop.f32.mrf.mxu3  ;;  %v3276_v6 = vpop.f32.mrf.mxu1  ;;  %v4465_v57 = vld [vmem:[#allocation3 + $0x50] sm:$0xff] }
 0x3ac   : > { %3123 = vst.msk [vmem:[#allocation3 + $0x189] sm:$0xff] %vm3035_vm4, %v3034_v16  ;;  %v3910_v8 = vpop.f32.mrf.mxu0  ;;  %v3334_v4 = vadd.f32 %v7530_v24, %v3276_v6 }
 0x3ad   : > { %v7753_v26 = vadd.f32 %v3718_v37, %v3555_v56  ;;  %v7756_v28 = vadd.f32 %v3910_v8, %v7571_v33  ;;  %v4271_v33 = vpack.c.bf16 %v4240_v42, %v4239_v27  ;;  %v4019_v56 = vld [vmem:[#allocation3 + $0x31] sm:$0xff] }
 0x3ae   : > { %v7780_v8 = vpack.c.bf16 %v4020_v14, %v4019_v56 }
 0x3af   : > { %5800 = vmatmul.msk.bf16.gmra.mxu0 %vm3035_vm4, %v7584_v9  ;;  %v4494_v9 = vpack.c.bf16 %v4463_v19, %v4462_v53  ;;  %v4244_v53 = vld [vmem:[#allocation3 + $0x52] sm:$0xff] }
 0x3b2   : > { %v3498_v1 = vpop.f32.mrf.mxu2 }
 0x3b3   : > { %v3556_v35 = vadd.f32 %v3498_v1, %v3334_v4  ;;  %v3720_v7 = vpop.f32.mrf.mxu3  ;;  %v3279_v29 = vpop.f32.mrf.mxu1  ;;  %v4464_v4 = vld [vmem:[#allocation3 + $0x48] sm:$0xff] }
 0x3b4   : > { %v3912_v38 = vpop.f32.mrf.mxu0  ;;  %v3335_v12 = vadd.f32 %v7530_v24, %v3279_v29  ;;  %v4495_v1 = vpack.c.bf16 %v4465_v57, %v4464_v4  ;;  %v5894_v4 = vld [vmem:[%s8544_s5] sm:$0xf] }
 0x3b5   : > { %v7761_v32 = vadd.f32 %v3720_v7, %v3556_v35  ;;  %v7764_v34 = vadd.f32 %v3912_v38, %v7582_v51 }
 0x3b6   : > { %5808 = vmatmul.msk.bf16.vlgmr.msrb.gmra.mxu1 %vm3035_vm4, %v4049_v61  ;;  %v4022_v61 = vld [vmem:[#allocation3 + $0x51] sm:$0xff] }
 0x3b7   : > { %5825 = vmatmul.msk.bf16.vlgmr.msrb.gmra.mxu2 %vm3035_vm4, %v4271_v33  ;;  %v4243_v33 = vld [vmem:[#allocation3 + $0x4a] sm:$0xff] }
 0x3b8   : > { %5842 = vmatmul.msk.bf16.vlgmr.msra.gmra.mxu3 %vm3035_vm4, %v4494_v9 }
 0x3ba   : > { %v3501_v40 = vpop.f32.mrf.mxu2 }
 0x3bb   : > { %v3557_v11 = vadd.f32 %v3501_v40, %v3335_v12  ;;  %v3723_v17 = vpop.f32.mrf.mxu3  ;;  %v3281_v59 = vpop.f32.mrf.mxu1  ;;  %v4467_v40 = vld [vmem:[#allocation3 + $0x68] sm:$0xff] }
 0x3bc   : > { %v3915_v23 = vpop.f32.mrf.mxu0  ;;  %v3336_v51 = vadd.f32 %v7530_v24, %v3281_v59 }
 0x3bd   : > { %v7770_v0 = vadd.f32 %v3723_v17, %v3557_v11  ;;  %v7773_v41 = vadd.f32 %v3915_v23, %v7600_v30  ;;  %v7782_v30 = vpack.c.bf16 %v4242_v50, %v4241_v49  ;;  %v4021_v17 = vld [vmem:[#allocation3 + $0x49] sm:$0xff] }
 0x3bf   : > { %5801 = vmatmul.msk.bf16.gmra.mxu0 %vm3035_vm4, %v7613_v13 }
 0x3c2   : > { %v3503_v54 = vpop.f32.mrf.mxu2 }
 0x3c3   : > { %v3558_v3 = vadd.f32 %v3503_v54, %v3336_v51  ;;  %v3725_v55 = vpop.f32.mrf.mxu3  ;;  %v3284_v16 = vpop.f32.mrf.mxu1  ;;  %v7803_v51 = vpack.c.bf16 %v4022_v61, %v4021_v17  ;;  %v4466_v54 = vld [vmem:[#allocation3 + $0x60] sm:$0xff]  ;;  %v5858_v17 = vld [vmem:[%s8542_s3 + $0xe] sm:$0x3] }
 0x3c4   : > { %v3917_v6 = vpop.f32.mrf.mxu0  ;;  %v3337_v18 = vadd.f32 %v7530_v24, %v3284_v16  ;;  %v4496_v49 = vpack.c.bf16 %v4467_v40, %v4466_v54 }
 0x3c5   : > { %v7778_v37 = vadd.f32 %v3725_v55, %v3558_v3  ;;  %v7785_v13 = vadd.f32 %v3917_v6, %v7611_v31 }
 0x3c6   : > { %5809 = vmatmul.msk.bf16.gmra.mxu1 %vm3035_vm4, %v7780_v8 }
 0x3c7   : > { %5826 = vmatmul.msk.bf16.gmra.mxu2 %vm3035_vm4, %v7782_v30 }
 0x3c8   : > { %5843 = vmatmul.msk.bf16.gmra.mxu3 %vm3035_vm4, %v4495_v1  ;;  %v5960_v1 = vld [vmem:[%s8544_s5] sm:$0x30] }
 0x3ca   : > { %v3506_v27 = vpop.f32.mrf.mxu2 }
 0x3cb   : > { %v3559_v42 = vadd.f32 %v3506_v27, %v3337_v18  ;;  %v3728_v35 = vpop.f32.mrf.mxu3  ;;  %v3286_v7 = vpop.f32.mrf.mxu1  ;;  %v5895_v27 = vor.u32 %v5960_v1, %v5894_v4 }
 0x3cc   : > { %v3920_v29 = vpop.f32.mrf.mxu0  ;;  %v3338_v39 = vadd.f32 %v7530_v24, %v3286_v7  ;;  %v4245_v7 = vld [vmem:[#allocation3 + $0x62] sm:$0xff] }
 0x3cd   : > { %v7793_v19 = vadd.f32 %v3728_v35, %v3559_v42  ;;  %v7796_v31 = vadd.f32 %v3920_v29, %v7629_v63  ;;  %v7805_v63 = vpack.c.bf16 %v4244_v53, %v4243_v33  ;;  %v4024_v35 = vld [vmem:[#allocation3 + $0x69] sm:$0xff]  ;;  %v5204_v61 = vsel %vm797_vm0, %v5895_v27, 0  ;;  %v4023_v53 = vld [vmem:[#allocation3 + $0x61] sm:$0xff] }
 0x3ce   : > { %v4246_v29 = vld [vmem:[#allocation3 + $0x6a] sm:$0xff]  ;;  %5213 = vmatpush.bf16.msra.mxu2 %v5204_v61  ;;  %v7833_v40 = vpack.c.bf16 %v4024_v35, %v4023_v53  ;;  %v4471_v61 = vld [vmem:[#allocation3 + $0x98] sm:$0xff] }
 0x3cf   : > { %5802 = vmatmul.msk.bf16.gmra.mxu0 %vm3035_vm4, %v7642_v21  ;;  %8639 = vst [vmem:[#allocation4_spill] sm:$0xff] %v7805_v63  ;;  %v4025_v53 = vld [vmem:[#allocation3 + $0x79] sm:$0xff] }
 0x3d2   : > { %v3508_v38 = vpop.f32.mrf.mxu2 }
 0x3d3   : > { %v3560_v9 = vadd.f32 %v3508_v38, %v3338_v39  ;;  %v3730_v12 = vpop.f32.mrf.mxu3  ;;  %v3289_v11 = vpop.f32.mrf.mxu1  ;;  %v4469_v38 = vld [vmem:[#allocation3 + $0x80] sm:$0xff] }
 0x3d4   : > { %v3922_v23 = vpop.f32.mrf.mxu0  ;;  %v3339_v50 = vadd.f32 %v7530_v24, %v3289_v11  ;;  %v7835_v11 = vpack.c.bf16 %v4246_v29, %v4245_v7  ;;  %v4026_v7 = vld [vmem:[#allocation3 + $0x81] sm:$0xff] }
 0x3d5   : > { %v7801_v59 = vadd.f32 %v3730_v12, %v3560_v9  ;;  %v7808_v14 = vadd.f32 %v3922_v23, %v7640_v58  ;;  %v4247_v29 = vld [vmem:[#allocation3 + $0x7a] sm:$0xff] }
 0x3d6   : > { %5810 = vmatmul.msk.bf16.gmra.mxu1 %vm3035_vm4, %v7803_v51  ;;  %8640 = vst [vmem:[#allocation12_spill] sm:$0xff] %v7835_v11 }
 0x3d7   : > { %5827 = vmatmul.msk.bf16.gmra.mxu2 %vm3035_vm4, %v7805_v63 }
 0x3d8   : > { %5844 = vmatmul.msk.bf16.gmra.mxu3 %vm3035_vm4, %v4496_v49  ;;  %v4783_v49 = vsel %vm3226_vm3, %v5858_v17, 0  ;;  %v7869_v17 = vpack.c.bf16 %v4026_v7, %v4025_v53  ;;  %v4028_v7 = vld [vmem:[#allocation3 + $0x99] sm:$0xff]  ;;  %v4027_v53 = vld [vmem:[#allocation3 + $0x91] sm:$0xff] }
 0x3d9   : > { %4792 = vmatpush.bf16.msra.mxu0 %v4783_v49 }
 0x3da   : > { %v3511_v3 = vpop.f32.mrf.mxu2 }
 0x3db   : > { %v3561_v55 = vadd.f32 %v3511_v3, %v3339_v50  ;;  %v3733_v57 = vpop.f32.mrf.mxu3  ;;  %v3291_v16 = vpop.f32.mrf.mxu1  ;;  %v5875_v50 = vld [vmem:[%s8542_s3 + $0x10] sm:$0x3] }
 0x3dc   : > { %v3925_v6 = vpop.f32.mrf.mxu0  ;;  %v3340_v18 = vadd.f32 %v7530_v24, %v3291_v16  ;;  %v4468_v24 = vld [vmem:[#allocation3 + $0x78] sm:$0xff]  ;;  %v5005_v3 = vsel %vm3226_vm3, %v5875_v50, 0 }
 0x3dd   : > { %v7816_v56 = vadd.f32 %v3733_v57, %v3561_v55  ;;  %v7819_v58 = vadd.f32 %v3925_v6, %v7658_v46  ;;  %v4497_v54 = vpack.c.bf16 %v4469_v38, %v4468_v24  ;;  %5014 = vmatpush.bf16.msra.mxu1 %v5005_v3 }
 0x3df   : > { %5803 = vmatmul.msk.bf16.gmra.mxu0 %vm3035_vm4, %v7671_v15 }
 0x3e2   : > { %v3513_v42 = vpop.f32.mrf.mxu2 }
 0x3e3   : > { %v3562_v46 = vadd.f32 %v3513_v42, %v3340_v18  ;;  %v3735_v39 = vpop.f32.mrf.mxu3  ;;  %v3294_v33 = vpop.f32.mrf.mxu1 }
 0x3e4   : > { %v3927_v12 = vpop.f32.mrf.mxu0 }
 0x3e5   : > { %v7831_v9 = vadd.f32 %v3735_v39, %v3562_v46  ;;  %v7841_v23 = vadd.f32 %v3927_v12, %v7669_v20  ;;  %v7856_v20 = vld [vmem:[%s8543_s4] ss:$0 sm:$0xff]  ;;  %v4248_v46 = vld [vmem:[#allocation3 + $0x82] sm:$0xff] }
 0x3e6   : > { %5811 = vmatmul.msk.bf16.gmra.mxu1 %vm3035_vm4, %v7833_v40  ;;  %v3341_v55 = vadd.f32 %v7856_v20, %v3294_v33 }
 0x3e7   : > { %5828 = vmatmul.msk.bf16.gmra.mxu2 %vm3035_vm4, %v7835_v11  ;;  %v4031_v11 = vld [vmem:[#allocation3 + $0xc1] sm:$0xff] }
 0x3e8   : > { %5845 = vmatmul.msk.bf16.gmra.mxu3 %vm3035_vm4, %v4497_v54  ;;  %v4470_v54 = vld [vmem:[#allocation3 + $0x90] sm:$0xff] }
 0x3e9   : > { %v4498_v50 = vpack.c.bf16 %v4471_v61, %v4470_v54  ;;  %v4473_v61 = vld [vmem:[#allocation3 + $0xb0] sm:$0xff] }
 0x3ea   : > { %v3516_v57 = vpop.f32.mrf.mxu2 }
 0x3eb   : > { %v3563_v16 = vadd.f32 %v3516_v57, %v3341_v55  ;;  %v3738_v6 = vpop.f32.mrf.mxu3  ;;  %v3296_v4 = vpop.f32.mrf.mxu1 }
 0x3ec   : > { %v3930_v18 = vpop.f32.mrf.mxu0  ;;  %v3342_v42 = vadd.f32 %v7856_v20, %v3296_v4 }
 0x3ed   : > { %v7859_v1 = vadd.f32 %v3738_v6, %v3563_v16  ;;  %v7862_v27 = vadd.f32 %v3930_v18, %v7693_v36  ;;  %v7871_v36 = vpack.c.bf16 %v4248_v46, %v4247_v29  ;;  %v4249_v29 = vld [vmem:[#allocation3 + $0x92] sm:$0xff]  ;;  %v4250_v46 = vld [vmem:[#allocation3 + $0x9a] sm:$0xff] }
 0x3ef   : > { %5804 = vmatmul.msk.bf16.gmra.mxu0 %vm3035_vm4, %v7706_v5  ;;  %8641 = vst [vmem:[#allocation15_spill] sm:$0xff] %v7871_v36 }
 0x3f2   : > { %v3518_v35 = vpop.f32.mrf.mxu2 }
 0x3f3   : > { %v3564_v39 = vadd.f32 %v3518_v35, %v3342_v42  ;;  %v3740_v38 = vpop.f32.mrf.mxu3  ;;  %v3299_v33 = vpop.f32.mrf.mxu1 }
 0x3f4   : > { %v3932_v24 = vpop.f32.mrf.mxu0  ;;  %v3343_v3 = vadd.f32 %v7856_v20, %v3299_v33 }
 0x3f5   : > { %v7867_v12 = vadd.f32 %v3740_v38, %v3564_v39  ;;  %v7874_v49 = vadd.f32 %v3932_v24, %v7704_v2 }
 0x3f6   : > { %5812 = vmatmul.msk.bf16.gmra.mxu1 %vm3035_vm4, %v7869_v17 }
 0x3f7   : > { %5829 = vmatmul.msk.bf16.gmra.mxu2 %vm3035_vm4, %v7871_v36 }
 0x3f8   : > { %5846 = vmatmul.msk.bf16.gmra.mxu3 %vm3035_vm4, %v4498_v50  ;;  %v7892_v50 = vpack.c.bf16 %v4028_v7, %v4027_v53  ;;  %v4030_v53 = vld [vmem:[#allocation3 + $0xb1] sm:$0xff] }
 0x3fa   : > { %v3521_v55 = vpop.f32.mrf.mxu2 }
 0x3fb   : > { %v3565_v57 = vadd.f32 %v3521_v55, %v3343_v3  ;;  %v3743_v16 = vpop.f32.mrf.mxu3  ;;  %v3301_v6 = vpop.f32.mrf.mxu1  ;;  %v4472_v3 = vld [vmem:[#allocation3 + $0xa8] sm:$0xff] }
 0x3fc   : > { %v3935_v18 = vpop.f32.mrf.mxu0  ;;  %v3344_v42 = vadd.f32 %v7856_v20, %v3301_v6 }
 0x3fd   : > { %v7882_v4 = vadd.f32 %v3743_v16, %v3565_v57  ;;  %v7885_v2 = vadd.f32 %v3935_v18, %v7725_v62  ;;  %v7894_v62 = vpack.c.bf16 %v4250_v46, %v4249_v29  ;;  %v4499_v57 = vpack.c.bf16 %v4473_v61, %v4472_v3  ;;  %v3825_v46 = vld [vmem:[#allocation3 + $0x180] sm:$0xff]  ;;  %v4252_v3 = vld [vmem:[#allocation3 + $0xb2] sm:$0xff] }
 0x3ff   : > { %5805 = vmatmul.msk.bf16.gmra.mxu0 %vm3035_vm4, %v7736_v52  ;;  %8642 = vst [vmem:[#allocation19_spill] sm:$0xff] %v7894_v62 }
 0x402   : > { %v3523_v35 = vpop.f32.mrf.mxu2 }
 0x403   : > { %v3566_v39 = vadd.f32 %v3523_v35, %v3344_v42  ;;  %v3745_v38 = vpop.f32.mrf.mxu3  ;;  %v3304_v33 = vpop.f32.mrf.mxu1  ;;  %v3826_v35 = vld [vmem:[#allocation3 + $0x188] sm:$0xff] }
 0x404   : > { %v3937_v54 = vpop.f32.mrf.mxu0  ;;  %v3345_v16 = vadd.f32 %v7856_v20, %v3304_v33 }
 0x405   : > { %v7890_v24 = vadd.f32 %v3745_v38, %v3566_v39  ;;  %v7897_v55 = vadd.f32 %v3937_v54, %v7734_v60  ;;  %v7910_v38 = vpack.c.bf16 %v3826_v35, %v3825_v46  ;;  %v4251_v54 = vld [vmem:[#allocation3 + $0xaa] sm:$0xff]  ;;  %v4474_v46 = vld [vmem:[#allocation3 + $0xc0] sm:$0xff] }
 0x406   : > { %5813 = vmatmul.msk.bf16.gmra.mxu1 %vm3035_vm4, %v7892_v50  ;;  %v7919_v35 = vpack.c.bf16 %v4252_v3, %v4251_v54 }
 0x407   : > { %5830 = vmatmul.msk.bf16.gmra.mxu2 %vm3035_vm4, %v7894_v62 }
 0x408   : > { %5847 = vmatmul.msk.bf16.gmra.mxu3 %vm3035_vm4, %v4499_v57  ;;  %8643 = vst [vmem:[#allocation17_spill] sm:$0xff] %v7919_v35 }
 0x40a   : > { %v3526_v6 = vpop.f32.mrf.mxu2 }
 0x40b   : > { %v3567_v18 = vadd.f32 %v3526_v6, %v3345_v16  ;;  %v3748_v42 = vpop.f32.mrf.mxu3  ;;  %v3306_v7 = vpop.f32.mrf.mxu1  ;;  %v4475_v6 = vld [vmem:[#allocation3 + $0xc8] sm:$0xff] }
 0x40c   : > { %v3940_v60 = vpop.f32.mrf.mxu0  ;;  %v3346_v61 = vadd.f32 %v7856_v20, %v3306_v7  ;;  %v4500_v7 = vpack.c.bf16 %v4475_v6, %v4474_v46  ;;  %v4253_v46 = vld [vmem:[#allocation3 + $0xc2] sm:$0xff] }
 0x40d   : > { %v7905_v29 = vadd.f32 %v3748_v42, %v3567_v18  ;;  %v7908_v39 = vadd.f32 %v3940_v60, %v7753_v26  ;;  %v4029_v42 = vld [vmem:[#allocation3 + $0xa9] sm:$0xff] }
 0x40e   : > { %v7917_v60 = vpack.c.bf16 %v4030_v53, %v4029_v42 }
 0x40f   : > { %5806 = vmatmul.msk.bf16.gmra.mxu0 %vm3035_vm4, %v7910_v38 }
 0x412   : > { %v3528_v33 = vpop.f32.mrf.mxu2 }
 0x413   : > { %v3568_v57 = vadd.f32 %v3528_v33, %v3346_v61  ;;  %v3750_v16 = vpop.f32.mrf.mxu3  ;;  %v3309_v18 = vpop.f32.mrf.mxu1 }
 0x414   : > { %v3942_v26 = vpop.f32.mrf.mxu0  ;;  %v3347_v61 = vadd.f32 %v7856_v20, %v3309_v18 }
 0x415   : > { %v7915_v62 = vadd.f32 %v3750_v16, %v3568_v57  ;;  %v7922_v36 = vadd.f32 %v3942_v26, %v7761_v32  ;;  %v4032_v26 = vld [vmem:[#allocation3 + $0xc9] sm:$0xff] }
 0x416   : > { %5814 = vmatmul.msk.bf16.gmra.mxu1 %vm3035_vm4, %v7917_v60  ;;  %v7940_v63 = vpack.c.bf16 %v4032_v26, %v4031_v11 }
 0x417   : > { %5831 = vmatmul.msk.bf16.gmra.mxu2 %vm3035_vm4, %v7919_v35 }
 0x418   : > { %5848 = vmatmul.msk.bf16.gmra.mxu3 %vm3035_vm4, %v4500_v7  ;;  %v4254_v7 = vld [vmem:[#allocation3 + $0xca] sm:$0xff] }
 0x41a   : > { %v3531_v33 = vpop.f32.mrf.mxu2 }
 0x41b   : > { %v3569_v53 = vadd.f32 %v3531_v33, %v3347_v61  ;;  %v3753_v57 = vpop.f32.mrf.mxu3  ;;  %v3311_v54 = vpop.f32.mrf.mxu1  ;;  %v4477_v61 = vld [vmem:[#allocation3 + $0xe0] sm:$0xff] }
 0x41c   : > { %v3945_v16 = vpop.f32.mrf.mxu0  ;;  %v3348_v6 = vadd.f32 %v7856_v20, %v3311_v54 }
 0x41d   : > { %v7930_v3 = vadd.f32 %v3753_v57, %v3569_v53  ;;  %v7933_v32 = vadd.f32 %v3945_v16, %v7770_v0  ;;  %v7942_v0 = vpack.c.bf16 %v4254_v7, %v4253_v46  ;;  %v4476_v16 = vld [vmem:[#allocation3 + $0xd8] sm:$0xff] }
 0x41e   : > { %v4501_v54 = vpack.c.bf16 %v4477_v61, %v4476_v16  ;;  %v4255_v16 = vld [vmem:[#allocation3 + $0xda] sm:$0xff] }
 0x41f   : > { %5859 = vmatmul.msk.bf16.vlgmr.msra.gmra.mxu0 %vm3035_vm4, %v7780_v8  ;;  %8644 = vst [vmem:[#allocation5_spill] sm:$0xff] %v7942_v0 }
 0x422   : > { %v3533_v42 = vpop.f32.mrf.mxu2 }
 0x423   : > { %v3570_v18 = vadd.f32 %v3533_v42, %v3348_v6  ;;  %v3755_v35 = vpop.f32.mrf.mxu3  ;;  %v3314_v33 = vpop.f32.mrf.mxu1 }
 0x424   : > { %v3947_v57 = vpop.f32.mrf.mxu0 }
 0x425   : > { %v7938_v53 = vadd.f32 %v3755_v35, %v3570_v18  ;;  %v7945_v8 = vadd.f32 %v3947_v57, %v7778_v37  ;;  %v3349_v35 = vadd.f32 %v7856_v20, %v3314_v33  ;;  %v4034_v57 = vld [vmem:[#allocation3 + $0xe1] sm:$0xff] }
 0x426   : > { %5815 = vmatmul.msk.bf16.gmra.mxu1 %vm3035_vm4, %v7940_v63 }
 0x427   : > { %8645 = vst [vmem:[#allocation6_spill] sm:$0xff] %v7945_v8  ;;  %5832 = vmatmul.msk.bf16.gmra.mxu2 %vm3035_vm4, %v7942_v0  ;;  %v4033_v8 = vld [vmem:[#allocation3 + $0xd9] sm:$0xff] }
 0x428   : > { %5849 = vmatmul.msk.bf16.gmra.mxu3 %vm3035_vm4, %v4501_v54  ;;  %v4256_v54 = vld [vmem:[#allocation3 + $0xe2] sm:$0xff] }
 0x42a   : > { %v3536_v6 = vpop.f32.mrf.mxu2 }
 0x42b   : > { %v3571_v11 = vadd.f32 %v3536_v6, %v3349_v35  ;;  %v3758_v42 = vpop.f32.mrf.mxu3  ;;  %v3316_v26 = vpop.f32.mrf.mxu1  ;;  %v4479_v35 = vld [vmem:[#allocation3 + $0xf8] sm:$0xff] }
 0x42c   : > { %v3950_v7 = vpop.f32.mrf.mxu0  ;;  %v3350_v18 = vadd.f32 %v7856_v20, %v3316_v26 }
 0x42d   : > { %v7953_v46 = vadd.f32 %v3758_v42, %v3571_v11  ;;  %v7956_v37 = vadd.f32 %v3950_v7, %v7793_v19  ;;  %v7964_v7 = vpack.c.bf16 %v4034_v57, %v4033_v8 }
 0x42f   : > { %8646 = vst [vmem:[#allocation8_spill] sm:$0xff] %v7956_v37  ;;  %5860 = vmatmul.msk.bf16.gmra.mxu0 %vm3035_vm4, %v7803_v51  ;;  %v7966_v37 = vpack.c.bf16 %v4256_v54, %v4255_v16  ;;  %v4478_v51 = vld [vmem:[#allocation3 + $0xf0] sm:$0xff] }
 0x430   : > { %v4502_v26 = vpack.c.bf16 %v4479_v35, %v4478_v51  ;;  %v4257_v35 = vld [vmem:[#allocation3 + $0xf2] sm:$0xff] }
 0x431   : > { %8647 = vst [vmem:[#allocation7_spill] sm:$0xff] %v7966_v37 }
 0x432   : > { %v3538_v61 = vpop.f32.mrf.mxu2 }
 0x433   : > { %v3572_v33 = vadd.f32 %v3538_v61, %v3350_v18  ;;  %v3760_v0 = vpop.f32.mrf.mxu3  ;;  %v4127_v6 = vpop.f32.mrf.mxu1 }
 0x434   : > { %v4207_v42 = vadd.f32 %v4127_v6, %v7728_v43  ;;  %v3952_v19 = vpop.f32.mrf.mxu0  ;;  %v4258_v6 = vld [vmem:[#allocation3 + $0xfa] sm:$0xff] }
 0x435   : > { %v7961_v11 = vadd.f32 %v3760_v0, %v3572_v33  ;;  %v7969_v20 = vadd.f32 %v3952_v19, %v7801_v59  ;;  %v4036_v33 = vld [vmem:[#allocation3 + $0xf9] sm:$0xff] }
 0x436   : > { %5816 = vmatmul.msk.bf16.gmra.mxu1 %vm3035_vm4, %v7964_v7 }
 0x437   : > { %5833 = vmatmul.msk.bf16.gmra.mxu2 %vm3035_vm4, %v7966_v37 }
 0x438   : > { %5850 = vmatmul.msk.bf16.gmra.mxu3 %vm3035_vm4, %v4502_v26 }
 0x43a   : > { %v4349_v0 = vpop.f32.mrf.mxu2 }
 0x43b   : > { %v4429_v43 = vadd.f32 %v4349_v0, %v4207_v42  ;;  %v4572_v18 = vpop.f32.mrf.mxu3  ;;  %v4129_v8 = vpop.f32.mrf.mxu1  ;;  %v4481_v42 = vld [vmem:[#allocation3 + $0x110] sm:$0xff] }
 0x43c   : > { %v4208_v57 = vadd.f32 %v4129_v8, %v7741_v22  ;;  %v3955_v16 = vpop.f32.mrf.mxu0  ;;  %v4035_v0 = vld [vmem:[#allocation3 + $0xf1] sm:$0xff] }
 0x43d   : > { %v7976_v61 = vadd.f32 %v4572_v18, %v4429_v43  ;;  %v7980_v59 = vadd.f32 %v3955_v16, %v7816_v56  ;;  %v7987_v8 = vpack.c.bf16 %v4036_v33, %v4035_v0  ;;  %v7989_v56 = vpack.c.bf16 %v4258_v6, %v4257_v35  ;;  %v4480_v16 = vld [vmem:[#allocation3 + $0x108] sm:$0xff]  ;;  %v4260_v0 = vld [vmem:[#allocation3 + $0x112] sm:$0xff] }
 0x43e   : > { %v4503_v37 = vpack.c.bf16 %v4481_v42, %v4480_v16  ;;  %v4038_v42 = vld [vmem:[#allocation3 + $0x111] sm:$0xff]  ;;  %v4037_v16 = vld [vmem:[#allocation3 + $0x109] sm:$0xff] }
 0x43f   : > { %5861 = vmatmul.msk.bf16.gmra.mxu0 %vm3035_vm4, %v7833_v40 }
 0x442   : > { %v4351_v54 = vpop.f32.mrf.mxu2 }
 0x443   : > { %v4430_v19 = vadd.f32 %v4351_v54, %v4208_v57  ;;  %v4574_v51 = vpop.f32.mrf.mxu3  ;;  %v4132_v26 = vpop.f32.mrf.mxu1 }
 0x444   : > { %v4209_v22 = vadd.f32 %v4132_v26, %v7756_v28  ;;  %v3957_v18 = vpop.f32.mrf.mxu0  ;;  %v4259_v26 = vld [vmem:[#allocation3 + $0x10a] sm:$0xff] }
 0x445   : > { %v7984_v43 = vadd.f32 %v4574_v51, %v4430_v19  ;;  %v7992_v40 = vadd.f32 %v3957_v18, %v7831_v9 }
 0x446   : > { %5817 = vmatmul.msk.bf16.gmra.mxu1 %vm3035_vm4, %v7987_v8 }
 0x447   : > { %5834 = vmatmul.msk.bf16.gmra.mxu2 %vm3035_vm4, %v7989_v56 }
 0x448   : > { %5851 = vmatmul.msk.bf16.gmra.mxu3 %vm3035_vm4, %v4503_v37 }
 0x44a   : > { %v4354_v57 = vpop.f32.mrf.mxu2 }
 0x44b   : > { %v4431_v28 = vadd.f32 %v4354_v57, %v4209_v22  ;;  %v4577_v54 = vpop.f32.mrf.mxu3  ;;  %v4134_v33 = vpop.f32.mrf.mxu1 }
 0x44c   : > { %v4210_v35 = vadd.f32 %v4134_v33, %v7764_v34  ;;  %v3960_v6 = vpop.f32.mrf.mxu0 }
 0x44d   : > { %v7999_v19 = vadd.f32 %v4577_v54, %v4431_v28  ;;  %v8003_v9 = vadd.f32 %v3960_v6, %v7859_v1  ;;  %v8010_v54 = vpack.c.bf16 %v4038_v42, %v4037_v16  ;;  %v8012_v1 = vpack.c.bf16 %v4260_v0, %v4259_v26 }
 0x44f   : > { %5862 = vmatmul.msk.bf16.gmra.mxu0 %vm3035_vm4, %v7869_v17 }
 0x452   : > { %v4356_v51 = vpop.f32.mrf.mxu2 }
 0x453   : > { %v4432_v37 = vadd.f32 %v4356_v51, %v4210_v35  ;;  %v4579_v18 = vpop.f32.mrf.mxu3  ;;  %v4137_v22 = vpop.f32.mrf.mxu1 }
 0x454   : > { %v4211_v28 = vadd.f32 %v4137_v22, %v7773_v41  ;;  %v3962_v34 = vpop.f32.mrf.mxu0  ;;  %v4262_v22 = vld [vmem:[#allocation3 + $0x12a] sm:$0xff] }
 0x455   : > { %v8007_v57 = vadd.f32 %v4579_v18, %v4432_v37  ;;  %v8015_v33 = vadd.f32 %v3962_v34, %v7867_v12  ;;  %v4040_v37 = vld [vmem:[#allocation3 + $0x129] sm:$0xff]  ;;  %v4039_v34 = vld [vmem:[#allocation3 + $0x121] sm:$0xff] }
 0x456   : > { %5818 = vmatmul.msk.bf16.gmra.mxu1 %vm3035_vm4, %v8010_v54  ;;  %v4261_v18 = vld [vmem:[#allocation3 + $0x122] sm:$0xff] }
 0x457   : > { %5835 = vmatmul.msk.bf16.gmra.mxu2 %vm3035_vm4, %v8012_v1 }
 0x458   : > { %5852 = vmatmul.msk.bf16.gmra.mxu3 %vm3035_vm4, %v7642_v21 }
 0x45a   : > { %v4359_v17 = vpop.f32.mrf.mxu2 }
 0x45b   : > { %v4433_v35 = vadd.f32 %v4359_v17, %v4211_v28  ;;  %v4582_v41 = vpop.f32.mrf.mxu3  ;;  %v4139_v6 = vpop.f32.mrf.mxu1 }
 0x45c   : > { %v4212_v42 = vadd.f32 %v4139_v6, %v7785_v13  ;;  %v3965_v26 = vpop.f32.mrf.mxu0 }
 0x45d   : > { %v8023_v51 = vadd.f32 %v4582_v41, %v4433_v35  ;;  %v8027_v12 = vadd.f32 %v3965_v26, %v7882_v4  ;;  %v8034_v41 = vpack.c.bf16 %v4040_v37, %v4039_v34  ;;  %v8036_v4 = vpack.c.bf16 %v4262_v22, %v4261_v18 }
 0x45f   : > { %5863 = vmatmul.msk.bf16.gmra.mxu0 %vm3035_vm4, %v7892_v50 }
 0x462   : > { %v4361_v0 = vpop.f32.mrf.mxu2 }
 0x463   : > { %v4434_v21 = vadd.f32 %v4361_v0, %v4212_v42  ;;  %v4584_v16 = vpop.f32.mrf.mxu3  ;;  %v4142_v28 = vpop.f32.mrf.mxu1 }
 0x464   : > { %v4213_v35 = vadd.f32 %v4142_v28, %v7796_v31  ;;  %v3967_v13 = vpop.f32.mrf.mxu0 }
 0x465   : > { %v8031_v17 = vadd.f32 %v4584_v16, %v4434_v21  ;;  %v8039_v6 = vadd.f32 %v3967_v13, %v7890_v24 }
 0x466   : > { %5819 = vmatmul.msk.bf16.gmra.mxu1 %vm3035_vm4, %v8034_v41 }
 0x467   : > { %5836 = vmatmul.msk.bf16.gmra.mxu2 %vm3035_vm4, %v8036_v4 }
 0x468   : > { %5853 = vmatmul.msk.bf16.gmra.mxu3 %vm3035_vm4, %v7671_v15 }
 0x46a   : > { %v4364_v50 = vpop.f32.mrf.mxu2 }
 0x46b   : > { %v4435_v42 = vadd.f32 %v4364_v50, %v4213_v35  ;;  %v4587_v31 = vpop.f32.mrf.mxu3  ;;  %v4144_v26 = vpop.f32.mrf.mxu1 }
 0x46c   : > { %v4214_v37 = vadd.f32 %v4144_v26, %v7808_v14  ;;  %v3970_v18 = vpop.f32.mrf.mxu0 }
 0x46d   : > { %v8047_v0 = vadd.f32 %v4587_v31, %v4435_v42  ;;  %v8051_v24 = vadd.f32 %v3970_v18, %v7905_v29 }
 0x46f   : > { %5864 = vmatmul.msk.bf16.gmra.mxu0 %vm3035_vm4, %v7917_v60 }
 0x472   : > { %v4366_v22 = vpop.f32.mrf.mxu2 }
 0x473   : > { %v4436_v21 = vadd.f32 %v4366_v22, %v4214_v37  ;;  %v4589_v16 = vpop.f32.mrf.mxu3  ;;  %v4147_v28 = vpop.f32.mrf.mxu1 }
 0x474   : > { %v4215_v34 = vadd.f32 %v4147_v28, %v7819_v58  ;;  %v3972_v35 = vpop.f32.mrf.mxu0 }
 0x475   : > { %v8055_v15 = vadd.f32 %v4589_v16, %v4436_v21  ;;  %v8059_v13 = vadd.f32 %v3972_v35, %v7915_v62 }
 0x476   : > { %5820 = vmatmul.msk.bf16.gmra.mxu1 %vm3035_vm4, %v7673_v10 }
 0x477   : > { %5837 = vmatmul.msk.bf16.gmra.mxu2 %vm3035_vm4, %v7677_v25 }
 0x478   : > { %5854 = vmatmul.msk.bf16.gmra.mxu3 %vm3035_vm4, %v7706_v5 }
 0x47a   : > { %v4369_v14 = vpop.f32.mrf.mxu2 }
 0x47b   : > { %v8067_v29 = vadd.f32 %v4369_v14, %v4215_v34  ;;  %v8069_v60 = vpop.f32.mrf.mxu3  ;;  %v4149_v50 = vpop.f32.mrf.mxu1 }
 0x47c   : > { %v4216_v58 = vadd.f32 %v4149_v50, %v7841_v23  ;;  %v3975_v42 = vpop.f32.mrf.mxu0 }
 0x47d   : > { %v8073_v62 = vadd.f32 %v3975_v42, %v7930_v3  ;;  %v4048_v42 = vld [vmem:[#allocation3 + $0x189] sm:$0xff] }
 0x47f   : > { %5865 = vmatmul.msk.bf16.gmra.mxu0 %vm3035_vm4, %v7940_v63 }
 0x482   : > { %v4371_v10 = vpop.f32.mrf.mxu2 }
 0x483   : > { %v8077_v25 = vadd.f32 %v4371_v10, %v4216_v58  ;;  %v8079_v31 = vpop.f32.mrf.mxu3  ;;  %v4152_v5 = vpop.f32.mrf.mxu1  ;;  %v4270_v10 = vld [vmem:[#allocation3 + $0x18a] sm:$0xff] }
 0x484   : > { %v4217_v26 = vadd.f32 %v4152_v5, %v7862_v27  ;;  %v3977_v37 = vpop.f32.mrf.mxu0 }
 0x485   : > { %v8083_v18 = vadd.f32 %v3977_v37, %v7938_v53 }
 0x486   : > { %5821 = vmatmul.msk.bf16.gmra.mxu1 %vm3035_vm4, %v7708_v47 }
 0x487   : > { %5838 = vmatmul.msk.bf16.gmra.mxu2 %vm3035_vm4, %v7713_v48 }
 0x488   : > { %5855 = vmatmul.msk.bf16.gmra.mxu3 %vm3035_vm4, %v7736_v52 }
 0x48a   : > { %v4374_v63 = vpop.f32.mrf.mxu2 }
 0x48b   : > { %v8091_v23 = vadd.f32 %v4374_v63, %v4217_v26  ;;  %v8093_v3 = vpop.f32.mrf.mxu3  ;;  %v4154_v22 = vpop.f32.mrf.mxu1  ;;  %v4047_v63 = vld [vmem:[#allocation3 + $0x181] sm:$0xff] }
 0x48c   : > { %v4218_v27 = vadd.f32 %v4154_v22, %v7874_v49  ;;  %v3980_v21 = vpop.f32.mrf.mxu0 }
 0x48d   : > { %v8097_v53 = vadd.f32 %v3980_v21, %v7953_v46 }
 0x48f   : > { %5866 = vmatmul.msk.bf16.gmra.mxu0 %vm3035_vm4, %v7964_v7 }
 0x492   : > { %v4376_v47 = vpop.f32.mrf.mxu2 }
 0x493   : > { %v8101_v48 = vadd.f32 %v4376_v47, %v4218_v27  ;;  %v8103_v16 = vpop.f32.mrf.mxu3  ;;  %v4157_v52 = vpop.f32.mrf.mxu1  ;;  %v8130_v27 = vpack.c.bf16 %v4048_v42, %v4047_v63 }
 0x494   : > { %v4219_v28 = vadd.f32 %v4157_v52, %v7885_v2  ;;  %v3982_v34 = vpop.f32.mrf.mxu0 }
 0x495   : > { %v8107_v35 = vadd.f32 %v3982_v34, %v7961_v11 }
 0x496   : > { %5822 = vmatmul.msk.bf16.gmra.mxu1 %vm3035_vm4, %v7738_v44  ;;  %v4492_v44 = vld [vmem:[#allocation3 + $0x198] sm:$0xff] }
 0x497   : > { %5839 = vmatmul.msk.bf16.gmra.mxu2 %vm3035_vm4, %v7743_v45  ;;  %v4493_v45 = vld [vmem:[#allocation3 + $0x1a0] sm:$0xff] }
 0x498   : > { %5856 = vmatmul.msk.bf16.gmra.mxu3 %vm3035_vm4, %v7910_v38  ;;  %v4269_v38 = vld [vmem:[#allocation3 + $0x182] sm:$0xff] }
 0x499   : > { %v8132_v21 = vpack.c.bf16 %v4270_v10, %v4269_v38 }
 0x49a   : > { %v4379_v49 = vpop.f32.mrf.mxu2 }
 0x49b   : > { %v8115_v46 = vadd.f32 %v4379_v49, %v4219_v28  ;;  %v8117_v7 = vpop.f32.mrf.mxu3  ;;  %v4159_v14 = vpop.f32.mrf.mxu1 }
 0x49c   : > { %v4220_v2 = vadd.f32 %v4159_v14, %v7897_v55  ;;  %v4794_v50 = vpop.f32.mrf.mxu0  ;;  %v4509_v55 = vpack.c.bf16 %v4493_v45, %v4492_v44  ;;  %v6106_v44 = vld [vmem:[%s6247_s18] sm:$0xff]  ;;  %v6107_v45 = vld [vmem:[%s6247_s18 + $0x8] sm:$0xff] }
 0x49d   : > { %v8121_v11 = vadd.f32 %v4794_v50, %v7976_v61 }
 0x49f   : > { %5867 = vmatmul.msk.bf16.gmra.mxu0 %vm3035_vm4, %v7987_v8 }
 0x4a2   : > { %v4381_v58 = vpop.f32.mrf.mxu2 }
 0x4a3   : > { %v8125_v5 = vadd.f32 %v4381_v58, %v4220_v2  ;;  %v8127_v26 = vpop.f32.mrf.mxu3  ;;  %v4162_v37 = vpop.f32.mrf.mxu1  ;;  %v5128_v58 = vpack.c.bf16 %v6107_v45, %v6106_v44 }
 0x4a4   : > { %v4221_v22 = vadd.f32 %v4162_v37, %v7908_v39  ;;  %v4796_v61 = vpop.f32.mrf.mxu0 }
 0x4a5   : > { %v8135_v8 = vadd.f32 %v4796_v61, %v7984_v43 }
 0x4a6   : > { %5823 = vmatmul.msk.bf16.gmra.mxu1 %vm3035_vm4, %v8130_v27 }
 0x4a7   : > { %5840 = vmatmul.msk.bf16.gmra.mxu2 %vm3035_vm4, %v8132_v21 }
 0x4a8   : > { %5857 = vmatmul.msk.bf16.gmra.mxu3 %vm3035_vm4, %v4509_v55 }
 0x4aa   : > { %v4384_v47 = vpop.f32.mrf.mxu2 }
 0x4ab   : > { %v8142_v39 = vadd.f32 %v4384_v47, %v4221_v22  ;;  %v8144_v52 = vpop.f32.mrf.mxu3  ;;  %v4164_v28 = vpop.f32.mrf.mxu1  ;;  %v8648_v22 = vld [vmem:[#allocation6_spill] sm:$0xff] }
 0x4ac   : > { %v4222_v34 = vadd.f32 %v4164_v28, %v7922_v36  ;;  %v4799_v49 = vpop.f32.mrf.mxu0 }
 0x4ad   : > { %v8148_v43 = vadd.f32 %v4799_v49, %v7999_v19  ;;  %v6109_v49 = vld [vmem:[%s6247_s18 + $0x18] sm:$0xff] }
 0x4af   : > { %5868 = vmatmul.msk.bf16.gmra.mxu0 %vm3035_vm4, %v8010_v54 }
 0x4b2   : > { %v4386_v14 = vpop.f32.mrf.mxu2 }
 0x4b3   : > { %v8152_v2 = vadd.f32 %v4386_v14, %v4222_v34  ;;  %v8154_v50 = vpop.f32.mrf.mxu3  ;;  %v4167_v42 = vpop.f32.mrf.mxu1  ;;  %v6108_v34 = vld [vmem:[%s6247_s18 + $0x10] sm:$0xff] }
 0x4b4   : > { %v4223_v38 = vadd.f32 %v4167_v42, %v7933_v32  ;;  %v4801_v10 = vpop.f32.mrf.mxu0  ;;  %v5129_v14 = vpack.c.bf16 %v6109_v49, %v6108_v34 }
 0x4b5   : > { %v8160_v36 = vadd.f32 %v4801_v10, %v8007_v57 }
 0x4b6   : > { %5876 = vmatmul.msk.bf16.vlgmr.msra.gmra.mxu1 %vm3035_vm4, %v7782_v30 }
 0x4b7   : > { %5896 = vmatmul.msk.bf16.vlgmr.msra.gmra.mxu2 %vm600_vm1, %v5128_v58  ;;  %v8649_v58 = vld [vmem:[#allocation8_spill] sm:$0xff] }
 0x4ba   : > { %v4389_v19 = vpop.f32.mrf.mxu2 }
 0x4bb   : > { %v4445_v54 = vadd.f32 %v4389_v19, %v4223_v38  ;;  %v4612_v37 = vpop.f32.mrf.mxu3  ;;  %v4169_v63 = vpop.f32.mrf.mxu1 }
 0x4bc   : > { %v4224_v61 = vadd.f32 %v4169_v63, %v8648_v22  ;;  %v4804_v32 = vpop.f32.mrf.mxu0 }
 0x4bd   : > { %v8165_v55 = vadd.f32 %v4612_v37, %v4445_v54  ;;  %v8169_v47 = vadd.f32 %v4804_v32, %v8023_v51  ;;  %v8650_v51 = vld [vmem:[#allocation4_spill] sm:$0xff]  ;;  %v4707_v37 = vld [vmem:[#allocation3 + $0x141] sm:$0xff] }
 0x4bf   : > { %5869 = vmatmul.msk.bf16.gmra.mxu0 %vm3035_vm4, %v8034_v41 }
 0x4c2   : > { %v4391_v57 = vpop.f32.mrf.mxu2 }
 0x4c3   : > { %v4446_v28 = vadd.f32 %v4391_v57, %v4224_v61  ;;  %v4614_v30 = vpop.f32.mrf.mxu3  ;;  %v4172_v44 = vpop.f32.mrf.mxu1  ;;  %v4706_v57 = vld [vmem:[#allocation3 + $0x139] sm:$0xff] }
 0x4c4   : > { %v4225_v42 = vadd.f32 %v4172_v44, %v8649_v58  ;;  %v4806_v38 = vpop.f32.mrf.mxu0  ;;  %v6111_v44 = vld [vmem:[%s6247_s18 + $0x28] sm:$0xff] }
 0x4c5   : > { %v8175_v45 = vadd.f32 %v4614_v30, %v4446_v28  ;;  %v8179_v10 = vadd.f32 %v4806_v38, %v8031_v17  ;;  %v4727_v28 = vpack.c.bf16 %v4707_v37, %v4706_v57 }
 0x4c6   : > { %5877 = vmatmul.msk.bf16.gmra.mxu1 %vm3035_vm4, %v8650_v51 }
 0x4c7   : > { %5897 = vmatmul.msk.bf16.gmra.mxu2 %vm600_vm1, %v5129_v14  ;;  %v6110_v14 = vld [vmem:[%s6247_s18 + $0x20] sm:$0xff] }
 0x4c8   : > { %v5130_v58 = vpack.c.bf16 %v6111_v44, %v6110_v14 }
 0x4ca   : > { %v4394_v41 = vpop.f32.mrf.mxu2 }
 0x4cb   : > { %v4447_v19 = vadd.f32 %v4394_v41, %v4225_v42  ;;  %v4617_v54 = vpop.f32.mrf.mxu3  ;;  %v4174_v63 = vpop.f32.mrf.mxu1 }
 0x4cc   : > { %v4226_v61 = vadd.f32 %v4174_v63, %v7969_v20  ;;  %v4809_v32 = vpop.f32.mrf.mxu0  ;;  %v4709_v63 = vld [vmem:[#allocation3 + $0x159] sm:$0xff] }
 0x4cd   : > { %v8184_v22 = vadd.f32 %v4617_v54, %v4447_v19  ;;  %v8188_v17 = vadd.f32 %v4809_v32, %v8047_v0  ;;  %v8651_v0 = vld [vmem:[#allocation12_spill] sm:$0xff] }
 0x4cf   : > { %5870 = vmatmul.msk.bf16.gmra.mxu0 %vm3035_vm4, %v4727_v28  ;;  %v4708_v28 = vld [vmem:[#allocation3 + $0x151] sm:$0xff] }
 0x4d2   : > { %v4396_v30 = vpop.f32.mrf.mxu2 }
 0x4d3   : > { %v4448_v34 = vadd.f32 %v4396_v30, %v4226_v61  ;;  %v4619_v49 = vpop.f32.mrf.mxu3  ;;  %v4177_v42 = vpop.f32.mrf.mxu1  ;;  %v4660_v61 = vadd.f32 %v8069_v60, %v8067_v29  ;;  %v4661_v29 = vadd.f32 %v8079_v31, %v8077_v25 }
 0x4d4   : > { %v4227_v51 = vadd.f32 %v4177_v42, %v7980_v59  ;;  %v4811_v20 = vpop.f32.mrf.mxu0  ;;  %v6113_v42 = vld [vmem:[%s6247_s18 + $0x38] sm:$0xff] }
 0x4d5   : > { %v8193_v38 = vadd.f32 %v4619_v49, %v4448_v34  ;;  %v8197_v41 = vadd.f32 %v4811_v20, %v8055_v15  ;;  %v4728_v34 = vpack.c.bf16 %v4709_v63, %v4708_v28 }
 0x4d6   : > { %5878 = vmatmul.msk.bf16.gmra.mxu1 %vm3035_vm4, %v8651_v0 }
 0x4d7   : > { %5898 = vmatmul.msk.bf16.gmra.mxu2 %vm600_vm1, %v5130_v58  ;;  %v6112_v58 = vld [vmem:[%s6247_s18 + $0x30] sm:$0xff] }
 0x4da   : > { %v4399_v19 = vpop.f32.mrf.mxu2 }
 0x4db   : > { %v4449_v54 = vadd.f32 %v4399_v19, %v4227_v51  ;;  %v4622_v37 = vpop.f32.mrf.mxu3  ;;  %v4179_v32 = vpop.f32.mrf.mxu1  ;;  %v5131_v51 = vpack.c.bf16 %v6113_v42, %v6112_v58  ;;  %v6115_v58 = vld [vmem:[%s6247_s18 + $0x48] sm:$0xff] }
 0x4dc   : > { %v4228_v15 = vadd.f32 %v4179_v32, %v7992_v40  ;;  %v4814_v57 = vpop.f32.mrf.mxu0  ;;  %v4711_v32 = vld [vmem:[#allocation3 + $0x171] sm:$0xff] }
 0x4dd   : > { %v8204_v59 = vadd.f32 %v4622_v37, %v4449_v54  ;;  %v8207_v30 = vadd.f32 %v4814_v57, %v4660_v61  ;;  %v8652_v54 = vld [vmem:[#allocation15_spill] sm:$0xff] }
 0x4de   : > { %v4710_v57 = vld [vmem:[#allocation3 + $0x169] sm:$0xff] }
 0x4df   : > { %5871 = vmatmul.msk.bf16.gmra.mxu0 %vm3035_vm4, %v4728_v34  ;;  %v4729_v28 = vpack.c.bf16 %v4711_v32, %v4710_v57  ;;  %v6116_v57 = vld [vmem:[%s6247_s18 + $0x50] sm:$0xff] }
 0x4e2   : > { %v4401_v49 = vpop.f32.mrf.mxu2 }
 0x4e3   : > { %v4450_v14 = vadd.f32 %v4401_v49, %v4228_v15  ;;  %v4624_v44 = vpop.f32.mrf.mxu3  ;;  %v4182_v60 = vpop.f32.mrf.mxu1 }
 0x4e4   : > { %v4229_v40 = vadd.f32 %v4182_v60, %v8003_v9  ;;  %v4816_v0 = vpop.f32.mrf.mxu0 }
 0x4e5   : > { %v8214_v20 = vadd.f32 %v4624_v44, %v4450_v14  ;;  %v8217_v19 = vadd.f32 %v4816_v0, %v4661_v29  ;;  %v6114_v44 = vld [vmem:[%s6247_s18 + $0x40] sm:$0xff] }
 0x4e6   : > { %5879 = vmatmul.msk.bf16.gmra.mxu1 %vm3035_vm4, %v8652_v54  ;;  %v5132_v42 = vpack.c.bf16 %v6115_v58, %v6114_v44 }
 0x4e7   : > { %5899 = vmatmul.msk.bf16.gmra.mxu2 %vm600_vm1, %v5131_v51 }
 0x4ea   : > { %v4404_v37 = vpop.f32.mrf.mxu2 }
 0x4eb   : > { %v4451_v63 = vadd.f32 %v4404_v37, %v4229_v40  ;;  %v4627_v61 = vpop.f32.mrf.mxu3  ;;  %v4184_v25 = vpop.f32.mrf.mxu1  ;;  %v8653_v40 = vld [vmem:[#allocation19_spill] sm:$0xff] }
 0x4ec   : > { %v4230_v15 = vadd.f32 %v4184_v25, %v8015_v33  ;;  %v8225_v9 = vpop.f32.mrf.mxu0 }
 0x4ed   : > { %v8222_v31 = vadd.f32 %v4627_v61, %v4451_v63 }
 0x4ef   : > { %5872 = vmatmul.msk.bf16.gmra.mxu0 %vm3035_vm4, %v4729_v28  ;;  %v6117_v28 = vld [vmem:[%s6247_s18 + $0x58] sm:$0xff] }
 0x4f2   : > { %v4406_v34 = vpop.f32.mrf.mxu2 }
 0x4f3   : > { %v4452_v49 = vadd.f32 %v4406_v34, %v4230_v15  ;;  %v4629_v14 = vpop.f32.mrf.mxu3  ;;  %v4187_v51 = vpop.f32.mrf.mxu1  ;;  %v5133_v34 = vpack.c.bf16 %v6117_v28, %v6116_v57 }
 0x4f4   : > { %v4231_v60 = vadd.f32 %v4187_v51, %v8027_v12  ;;  %v8233_v33 = vpop.f32.mrf.mxu0  ;;  %v4715_v51 = vld [vmem:[#allocation3 + $0x1a1] sm:$0xff] }
 0x4f5   : > { %v8230_v29 = vadd.f32 %v4629_v14, %v4452_v49 }
 0x4f6   : > { %5880 = vmatmul.msk.bf16.gmra.mxu1 %vm3035_vm4, %v8653_v40 }
 0x4f7   : > { %5900 = vmatmul.msk.bf16.gmra.mxu2 %vm600_vm1, %v5132_v42 }
 0x4fa   : > { %v4409_v0 = vpop.f32.mrf.mxu2 }
 0x4fb   : > { %v4453_v54 = vadd.f32 %v4409_v0, %v4231_v60  ;;  %v4632_v37 = vpop.f32.mrf.mxu3  ;;  %v4189_v63 = vpop.f32.mrf.mxu1 }
 0x4fc   : > { %v4232_v32 = vadd.f32 %v4189_v63, %v8039_v6  ;;  %v8241_v25 = vpop.f32.mrf.mxu0  ;;  %v8654_v6 = vld [vmem:[#allocation17_spill] sm:$0xff] }
 0x4fd   : > { %v8238_v61 = vadd.f32 %v4632_v37, %v4453_v54 }
 0x4ff   : > { %5873 = vmatmul.msk.bf16.gmra.mxu0 %vm3035_vm4, %v8130_v27  ;;  %v4714_v27 = vld [vmem:[#allocation3 + $0x199] sm:$0xff] }
 0x500   : > { %v4731_v54 = vpack.c.bf16 %v4715_v51, %v4714_v27 }
 0x502   : > { %v4411_v12 = vpop.f32.mrf.mxu2 }
 0x503   : > { %v4454_v15 = vadd.f32 %v4411_v12, %v4232_v32  ;;  %v4634_v49 = vpop.f32.mrf.mxu3  ;;  %v4192_v14 = vpop.f32.mrf.mxu1  ;;  %v6118_v12 = vld [vmem:[%s6247_s18 + $0x60] sm:$0xff] }
 0x504   : > { %v4233_v58 = vadd.f32 %v4192_v14, %v8051_v24  ;;  %v8250_v42 = vpop.f32.mrf.mxu0  ;;  %v8657_v14 = vld [vmem:[#allocation5_spill] sm:$0xff] }
 0x505   : > { %v8247_v44 = vadd.f32 %v4634_v49, %v4454_v15  ;;  %v6119_v15 = vld [vmem:[%s6247_s18 + $0x68] sm:$0xff] }
 0x506   : > { %5881 = vmatmul.msk.bf16.gmra.mxu1 %vm3035_vm4, %v8654_v6  ;;  %v5134_v57 = vpack.c.bf16 %v6119_v15, %v6118_v12 }
 0x507   : > { %5901 = vmatmul.msk.bf16.gmra.mxu2 %vm600_vm1, %v5133_v34 }
 0x50a   : > { %v4414_v60 = vpop.f32.mrf.mxu2 }
 0x50b   : > { %v8255_v40 = vadd.f32 %v4414_v60, %v4233_v58  ;;  %v4194_v0 = vpop.f32.mrf.mxu1 }
 0x50c   : > { %v4234_v37 = vadd.f32 %v4194_v0, %v8059_v13  ;;  %v8258_v63 = vpop.f32.mrf.mxu0 }
 0x50d   : > { %8655 = vst [vmem:[#allocation9_spill] sm:$0xff] %v8255_v40 }
 0x50f   : > { %5874 = vmatmul.msk.bf16.gmra.mxu0 %vm3035_vm4, %v4731_v54 }
 0x512   : > { %v4416_v24 = vpop.f32.mrf.mxu2 }
 0x513   : > { %v8261_v32 = vadd.f32 %v4416_v24, %v4234_v37  ;;  %v4197_v28 = vpop.f32.mrf.mxu1  ;;  %v6121_v37 = vld [vmem:[%s6247_s18 + $0x78] sm:$0xff] }
 0x514   : > { %v4235_v34 = vadd.f32 %v4197_v28, %v8073_v62  ;;  %v8266_v49 = vpop.f32.mrf.mxu0  ;;  %v6120_v62 = vld [vmem:[%s6247_s18 + $0x70] sm:$0xff] }
 0x515   : > { %8656 = vst [vmem:[#allocation10_spill] sm:$0xff] %v8261_v32  ;;  %v5135_v24 = vpack.c.bf16 %v6121_v37, %v6120_v62  ;;  %v4666_v32 = vadd.f32 %v8144_v52, %v8142_v39 }
 0x516   : > { %5882 = vmatmul.msk.bf16.gmra.mxu1 %vm3035_vm4, %v8657_v14 }
 0x517   : > { %5902 = vmatmul.msk.bf16.gmra.mxu2 %vm600_vm1, %v5134_v57 }
 0x51a   : > { %v4419_v13 = vpop.f32.mrf.mxu2 }
 0x51b   : > { %v8271_v58 = vadd.f32 %v4419_v13, %v4235_v34  ;;  %v4199_v6 = vpop.f32.mrf.mxu1 }
 0x51c   : > { %v4236_v27 = vadd.f32 %v4199_v6, %v8083_v18  ;;  %v4834_v51 = vpop.f32.mrf.mxu0  ;;  %v8659_v18 = vld [vmem:[#allocation7_spill] sm:$0xff] }
 0x51d   : > { %8658 = vst [vmem:[#allocation11_spill] sm:$0xff] %v8271_v58  ;;  %v8275_v60 = vadd.f32 %v4834_v51, %v8165_v55 }
 0x522   : > { %v4421_v0 = vpop.f32.mrf.mxu2 }
 0x523   : > { %v8277_v54 = vadd.f32 %v4421_v0, %v4236_v27  ;;  %v4202_v12 = vpop.f32.mrf.mxu1  ;;  %v6123_v0 = vld [vmem:[%s6247_s18 + $0x88] sm:$0xff] }
 0x524   : > { %v4237_v15 = vadd.f32 %v4202_v12, %v8097_v53  ;;  %v4836_v57 = vpop.f32.mrf.mxu0 }
 0x525   : > { %v8283_v28 = vadd.f32 %v4836_v57, %v8175_v45  ;;  %v6122_v45 = vld [vmem:[%s6247_s18 + $0x80] sm:$0xff] }
 0x526   : > { %5883 = vmatmul.msk.bf16.gmra.mxu1 %vm3035_vm4, %v8659_v18  ;;  %v5136_v62 = vpack.c.bf16 %v6123_v0, %v6122_v45 }
 0x527   : > { %5903 = vmatmul.msk.bf16.gmra.mxu2 %vm600_vm1, %v5135_v24 }
 0x52a   : > { %v4424_v55 = vpop.f32.mrf.mxu2 }
 0x52b   : > { %v8288_v34 = vadd.f32 %v4424_v55, %v4237_v15  ;;  %v4204_v14 = vpop.f32.mrf.mxu1 }
 0x52c   : > { %v4238_v13 = vadd.f32 %v4204_v14, %v8107_v35  ;;  %v4839_v6 = vpop.f32.mrf.mxu0  ;;  %v8308_v35 = vld [vmem:[%s8545_s6] ss:$0 sm:$0xff] }
 0x52d   : > { %v8292_v27 = vadd.f32 %v4839_v6, %v8184_v22  ;;  %v6124_v6 = vld [vmem:[%s6247_s18 + $0x90] sm:$0xff] }
 0x532   : > { %v4426_v53 = vpop.f32.mrf.mxu2 }
 0x533   : > { %v8294_v51 = vadd.f32 %v4426_v53, %v4238_v13  ;;  %v5016_v37 = vpop.f32.mrf.mxu1  ;;  %v6125_v53 = vld [vmem:[%s6247_s18 + $0x98] sm:$0xff] }
 0x534   : > { %v5096_v24 = vadd.f32 %v5016_v37, %v8121_v11  ;;  %v4841_v12 = vpop.f32.mrf.mxu0  ;;  %v5137_v45 = vpack.c.bf16 %v6125_v53, %v6124_v6 }
 0x535   : > { %v8300_v15 = vadd.f32 %v4841_v12, %v8193_v38 }
 0x536   : > { %5884 = vmatmul.msk.bf16.gmra.mxu1 %vm3035_vm4, %v7989_v56 }
 0x537   : > { %5904 = vmatmul.msk.bf16.gmra.mxu2 %vm600_vm1, %v5136_v62 }
 0x53a   : > { %v5215_v22 = vpop.f32.mrf.mxu2 }
 0x53b   : > { %v5216_v57 = vadd.f32 %v8308_v35, %v5215_v22  ;;  %v5018_v18 = vpop.f32.mrf.mxu1 }
 0x53c   : > { %v5097_v55 = vadd.f32 %v5018_v18, %v8135_v8  ;;  %v4844_v38 = vpop.f32.mrf.mxu0 }
 0x53d   : > { %v8311_v11 = vadd.f32 %v5216_v57, %v5096_v24  ;;  %v8315_v14 = vadd.f32 %v4844_v38, %v8204_v59 }
 0x542   : > { %v5217_v56 = vpop.f32.mrf.mxu2 }
 0x543   : > { %v5218_v13 = vadd.f32 %v8308_v35, %v5217_v56  ;;  %v5021_v0 = vpop.f32.mrf.mxu1  ;;  %v6126_v56 = vld [vmem:[%s6247_s18 + $0xa0] sm:$0xff] }
 0x544   : > { %v5098_v37 = vadd.f32 %v5021_v0, %v8148_v43  ;;  %v4846_v24 = vpop.f32.mrf.mxu0 }
 0x545   : > { %v8320_v62 = vadd.f32 %v5218_v13, %v5097_v55  ;;  %v8324_v8 = vadd.f32 %v4846_v24, %v8214_v20  ;;  %v6127_v13 = vld [vmem:[%s6247_s18 + $0xa8] sm:$0xff] }
 0x546   : > { %5885 = vmatmul.msk.bf16.gmra.mxu1 %vm3035_vm4, %v8012_v1  ;;  %v5138_v1 = vpack.c.bf16 %v6127_v13, %v6126_v56 }
 0x547   : > { %5905 = vmatmul.msk.bf16.gmra.mxu2 %vm600_vm1, %v5137_v45 }
 0x54a   : > { %v5220_v59 = vpop.f32.mrf.mxu2 }
 0x54b   : > { %v5221_v12 = vadd.f32 %v8308_v35, %v5220_v59  ;;  %v5023_v22 = vpop.f32.mrf.mxu1 }
 0x54c   : > { %v5099_v18 = vadd.f32 %v5023_v22, %v8160_v36  ;;  %v4849_v55 = vpop.f32.mrf.mxu0 }
 0x54d   : > { %v8330_v57 = vadd.f32 %v5221_v12, %v5098_v37  ;;  %v8334_v43 = vadd.f32 %v4849_v55, %v8222_v31  ;;  %v4929_v55 = vld [vmem:[#allocation3 + $0x142] sm:$0xff] }
 0x552   : > { %v5222_v38 = vpop.f32.mrf.mxu2 }
 0x553   : > { %v5223_v20 = vadd.f32 %v8308_v35, %v5222_v38  ;;  %v5026_v6 = vpop.f32.mrf.mxu1 }
 0x554   : > { %v5100_v45 = vadd.f32 %v5026_v6, %v8169_v47  ;;  %v4851_v0 = vpop.f32.mrf.mxu0 }
 0x555   : > { %v8339_v53 = vadd.f32 %v5223_v20, %v5099_v18  ;;  %v8343_v36 = vadd.f32 %v4851_v0, %v8230_v29  ;;  %v4928_v29 = vld [vmem:[#allocation3 + $0x13a] sm:$0xff]  ;;  %v6129_v20 = vld [vmem:[%s6247_s18 + $0xb8] sm:$0xff] }
 0x556   : > { %5886 = vmatmul.msk.bf16.gmra.mxu1 %vm3035_vm4, %v8036_v4  ;;  %v6128_v4 = vld [vmem:[%s6247_s18 + $0xb0] sm:$0xff] }
 0x557   : > { %5906 = vmatmul.msk.bf16.gmra.mxu2 %vm600_vm1, %v5138_v1  ;;  %v5139_v56 = vpack.c.bf16 %v6129_v20, %v6128_v4 }
 0x55a   : > { %v5225_v31 = vpop.f32.mrf.mxu2 }
 0x55b   : > { %v5226_v37 = vadd.f32 %v8308_v35, %v5225_v31  ;;  %v5028_v24 = vpop.f32.mrf.mxu1 }
 0x55c   : > { %v5101_v12 = vadd.f32 %v5028_v24, %v8179_v10  ;;  %v4854_v47 = vpop.f32.mrf.mxu0 }
 0x55d   : > { %v8349_v59 = vadd.f32 %v5226_v37, %v5100_v45  ;;  %v8353_v22 = vadd.f32 %v4854_v47, %v8238_v61  ;;  %v4949_v45 = vpack.c.bf16 %v4929_v55, %v4928_v29  ;;  %v6130_v55 = vld [vmem:[%s6247_s18 + $0xc0] sm:$0xff] }
 0x562   : > { %v5227_v18 = vpop.f32.mrf.mxu2 }
 0x563   : > { %v5228_v38 = vadd.f32 %v8308_v35, %v5227_v18  ;;  %v5031_v13 = vpop.f32.mrf.mxu1  ;;  %v4931_v18 = vld [vmem:[#allocation3 + $0x15a] sm:$0xff] }
 0x564   : > { %v5102_v6 = vadd.f32 %v5031_v13, %v8188_v17  ;;  %v4856_v10 = vpop.f32.mrf.mxu0  ;;  %v4930_v17 = vld [vmem:[#allocation3 + $0x152] sm:$0xff] }
 0x565   : > { %v8358_v1 = vadd.f32 %v5228_v38, %v5101_v12  ;;  %v8362_v61 = vadd.f32 %v4856_v10, %v8247_v44  ;;  %v6131_v44 = vld [vmem:[%s6247_s18 + $0xc8] sm:$0xff]  ;;  %v4950_v13 = vpack.c.bf16 %v4931_v18, %v4930_v17  ;;  %v6133_v17 = vld [vmem:[%s6247_s18 + $0xd8] sm:$0xff] }
 0x566   : > { %5887 = vmatmul.msk.bf16.gmra.mxu1 %vm3035_vm4, %v4949_v45  ;;  %v5140_v38 = vpack.c.bf16 %v6131_v44, %v6130_v55 }
 0x567   : > { %5907 = vmatmul.msk.bf16.gmra.mxu2 %vm600_vm1, %v5139_v56 }
 0x56a   : > { %v5230_v0 = vpop.f32.mrf.mxu2 }
 0x56b   : > { %v5231_v31 = vadd.f32 %v8308_v35, %v5230_v0  ;;  %v5033_v37 = vpop.f32.mrf.mxu1 }
 0x56c   : > { %v5103_v12 = vadd.f32 %v5033_v37, %v8197_v41  ;;  %v4932_v37 = vld [vmem:[#allocation3 + $0x16a] sm:$0xff] }
 0x56d   : > { %v8367_v24 = vadd.f32 %v5231_v31, %v5102_v6 }
 0x572   : > { %v5232_v47 = vpop.f32.mrf.mxu2 }
 0x573   : > { %v5233_v29 = vadd.f32 %v8308_v35, %v5232_v47  ;;  %v5036_v4 = vpop.f32.mrf.mxu1  ;;  %v6132_v47 = vld [vmem:[%s6247_s18 + $0xd0] sm:$0xff] }
 0x574   : > { %v5104_v56 = vadd.f32 %v5036_v4, %v8207_v30  ;;  %v5141_v18 = vpack.c.bf16 %v6133_v17, %v6132_v47  ;;  %v6136_v47 = vld [vmem:[%s6247_s18 + $0xf0] sm:$0xff]  ;;  %v6137_v17 = vld [vmem:[%s6247_s18 + $0xf8] sm:$0xff] }
 0x575   : > { %v8373_v20 = vadd.f32 %v5233_v29, %v5103_v12  ;;  %v4933_v12 = vld [vmem:[#allocation3 + $0x172] sm:$0xff] }
 0x576   : > { %5888 = vmatmul.msk.bf16.gmra.mxu1 %vm3035_vm4, %v4950_v13  ;;  %v4951_v44 = vpack.c.bf16 %v4933_v12, %v4932_v37  ;;  %v6135_v13 = vld [vmem:[%s6247_s18 + $0xe8] sm:$0xff]  ;;  %v4937_v37 = vld [vmem:[#allocation3 + $0x1a2] sm:$0xff] }
 0x577   : > { %5908 = vmatmul.msk.bf16.gmra.mxu2 %vm600_vm1, %v5140_v38 }
 0x57a   : > { %v5235_v41 = vpop.f32.mrf.mxu2 }
 0x57b   : > { %v5236_v6 = vadd.f32 %v8308_v35, %v5235_v41  ;;  %v5038_v10 = vpop.f32.mrf.mxu1 }
 0x57c   : > { %v5105_v0 = vadd.f32 %v5038_v10, %v8217_v19 }
 0x57d   : > { %v8379_v45 = vadd.f32 %v5236_v6, %v5104_v56  ;;  %v6134_v56 = vld [vmem:[%s6247_s18 + $0xe0] sm:$0xff]  ;;  %s5950_s18 = sshll.u32 %s8665_s25, 3 }
 0x57e   : > { %v5142_v41 = vpack.c.bf16 %v6135_v13, %v6134_v56  ;;  %s278_s16 = scalar_lea.vmem %s8546_s7, %s5950_s18 }
 0x582   : > { %v5237_v31 = vpop.f32.mrf.mxu2 }
 0x583   : > { %v5238_v30 = vadd.f32 %v8308_v35, %v5237_v31  ;;  %v8385_v29 = vpop.f32.mrf.mxu1  ;;  %v4936_v31 = vld [vmem:[#allocation3 + $0x19a] sm:$0xff] }
 0x585   : > { %v8387_v55 = vadd.f32 %v5238_v30, %v5105_v0  ;;  %v4953_v30 = vpack.c.bf16 %v4937_v37, %v4936_v31 }
 0x586   : > { %5889 = vmatmul.msk.bf16.gmra.mxu1 %vm3035_vm4, %v4951_v44 }
 0x587   : > { %5909 = vmatmul.msk.bf16.gmra.mxu2 %vm600_vm1, %v5141_v18  ;;  %v5143_v18 = vpack.c.bf16 %v6137_v17, %v6136_v47  ;;  %v4888_v17 = vadd.f32 %v8258_v63, %v4666_v32 }
 0x58a   : > { %v8391_v19 = vpop.f32.mrf.mxu2 }
 0x58b   : > { %v5043_v38 = vpop.f32.mrf.mxu1 }
 0x592   : > { %v5242_v4 = vpop.f32.mrf.mxu2 }
 0x593   : > { %v5046_v6 = vpop.f32.mrf.mxu1 }
 0x596   : > { %5890 = vmatmul.msk.bf16.gmra.mxu1 %vm3035_vm4, %v8132_v21  ;;  %v4667_v21 = vadd.f32 %v8154_v50, %v8152_v2  ;;  %v4665_v2 = vadd.f32 %v8127_v26, %v8125_v5 }
 0x597   : > { %5910 = vmatmul.msk.bf16.gmra.mxu2 %vm600_vm1, %v5142_v41 }
 0x598   : > { %v4889_v41 = vadd.f32 %v8266_v49, %v4667_v21  ;;  %v4887_v49 = vadd.f32 %v8250_v42, %v4665_v2 }
 0x59a   : > { %v5245_v10 = vpop.f32.mrf.mxu2 }
 0x59b   : > { %v5048_v0 = vpop.f32.mrf.mxu1  ;;  %v5246_v26 = vadd.f32 %v8308_v35, %v5245_v10 }
 0x59c   : > { %v5109_v32 = vadd.f32 %v5048_v0, %v4887_v49  ;;  %v5243_v0 = vadd.f32 %v8308_v35, %v5242_v4 }
 0x5a2   : > { %v5247_v12 = vpop.f32.mrf.mxu2 }
 0x5a3   : > { %v5051_v44 = vpop.f32.mrf.mxu1  ;;  %v5248_v39 = vadd.f32 %v8308_v35, %v5247_v12  ;;  %v4663_v12 = vadd.f32 %v8103_v16, %v8101_v48  ;;  %v5241_v16 = vadd.f32 %v8308_v35, %v8391_v19 }
 0x5a4   : > { %v5110_v50 = vadd.f32 %v5051_v44, %v4888_v17 }
 0x5a5   : > { %v5308_v44 = vadd.f32 %v5248_v39, %v5109_v32 }
 0x5a6   : > { %5891 = vmatmul.msk.bf16.gmra.mxu1 %vm3035_vm4, %v4953_v30 }
 0x5a7   : > { %5911 = vmatmul.msk.bf16.gmra.mxu2 %vm600_vm1, %v5143_v18 }
 0x5aa   : > { %v5250_v56 = vpop.f32.mrf.mxu2 }
 0x5ab   : > { %v5053_v13 = vpop.f32.mrf.mxu1  ;;  %v5251_v30 = vadd.f32 %v8308_v35, %v5250_v56 }
 0x5ac   : > { %v5111_v31 = vadd.f32 %v5053_v13, %v4889_v41 }
 0x5ad   : > { %v5309_v52 = vadd.f32 %v5251_v30, %v5110_v50 }
 0x5b2   : > { %v5252_v40 = vpop.f32.mrf.mxu2 }
 0x5b3   : > { %v5253_v37 = vadd.f32 %v8308_v35, %v5252_v40  ;;  %v5056_v47 = vpop.f32.mrf.mxu1  ;;  %v4664_v40 = vadd.f32 %v8117_v7, %v8115_v46  ;;  %v4885_v7 = vadd.f32 %v8233_v33, %v4663_v12 }
 0x5b4   : > { %v5112_v58 = vadd.f32 %v5056_v47, %v8275_v60 }
 0x5b5   : > { %v5310_v18 = vadd.f32 %v5253_v37, %v5111_v31  ;;  %v4886_v60 = vadd.f32 %v8241_v25, %v4664_v40  ;;  %v4662_v25 = vadd.f32 %v8093_v3, %v8091_v23  ;;  %v5107_v41 = vadd.f32 %v5043_v38, %v4885_v7 }
 0x5b7   : > { %5913 = vmatpush.xpose.msk.msrb.mxu3 %vm3035_vm4, %v5310_v18  ;;  %v5108_v46 = vadd.f32 %v5046_v6, %v4886_v60  ;;  %v5306_v6 = vadd.f32 %v5243_v0, %v5107_v41 }
 0x5b9   : > { %v5307_v21 = vadd.f32 %v5246_v26, %v5108_v46 }
 0x5ba   : > { %v5255_v63 = vpop.f32.mrf.mxu2 }
 0x5bb   : > { %v5256_v56 = vadd.f32 %v8308_v35, %v5255_v63  ;;  %5914 = vmatpush.xpose.msk.msrb.mxu3 %vm3035_vm4, %v5309_v52  ;;  %v5058_v5 = vpop.f32.mrf.mxu1 }
 0x5bc   : > { %v5113_v42 = vadd.f32 %v5058_v5, %v8283_v28  ;;  %v4884_v28 = vadd.f32 %v8225_v9, %v4662_v25  ;;  %v4859_v5 = vpop.f32.mrf.mxu0 }
 0x5bd   : > { %v8422_v13 = vadd.f32 %v5256_v56, %v5112_v58  ;;  %v4637_v56 = vpop.f32.mrf.mxu3 }
 0x5be   : > { %v5106_v31 = vadd.f32 %v8385_v29, %v4884_v28 }
 0x5bf   : > { %5915 = vmatpush.xpose.msk.msrb.mxu3 %vm3035_vm4, %v5308_v44 }
 0x5c0   : > { %v5305_v23 = vadd.f32 %v5241_v16, %v5106_v31 }
 0x5c2   : > { %v5257_v10 = vpop.f32.mrf.mxu2 }
 0x5c3   : > { %v5258_v58 = vadd.f32 %v8308_v35, %v5257_v10  ;;  %5916 = vmatpush.xpose.msk.msrb.mxu3 %vm3035_vm4, %v5307_v21  ;;  %v5061_v48 = vpop.f32.mrf.mxu1 }
 0x5c4   : > { %v5114_v4 = vadd.f32 %v5061_v48, %v8292_v27  ;;  %v4861_v7 = vpop.f32.mrf.mxu0 }
 0x5c5   : > { %v8437_v33 = vadd.f32 %v5258_v58, %v5113_v42 }
 0x5c7   : > { %5917 = vmatpush.xpose.msk.msrb.mxu3 %vm3035_vm4, %v5306_v6 }
 0x5ca   : > { %v5260_v3 = vpop.f32.mrf.mxu2 }
 0x5cb   : > { %v5261_v38 = vadd.f32 %v8308_v35, %v5260_v3  ;;  %5918 = vmatpush.xpose.msk.msrb.mxu3 %vm3035_vm4, %v5305_v23  ;;  %v5063_v9 = vpop.f32.mrf.mxu1 }
 0x5cc   : > { %v5115_v19 = vadd.f32 %v5063_v9, %v8300_v15  ;;  %v4864_v25 = vpop.f32.mrf.mxu0 }
 0x5cd   : > { %v8444_v37 = vadd.f32 %v5261_v38, %v5114_v4 }
 0x5cf   : > { %5919 = vmatpush.xpose.msk.msrb.mxu3 %vm3035_vm4, %v8387_v55 }
 0x5d2   : > { %v5262_v47 = vpop.f32.mrf.mxu2 }
 0x5d3   : > { %v5263_v27 = vadd.f32 %v8308_v35, %v5262_v47  ;;  %5920 = vmatpush.xpose.msk.msrb.mxu3 %vm3035_vm4, %v8379_v45  ;;  %v5066_v29 = vpop.f32.mrf.mxu1 }
 0x5d4   : > { %v5116_v30 = vadd.f32 %v5066_v29, %v8315_v14  ;;  %v4866_v28 = vpop.f32.mrf.mxu0 }
 0x5d5   : > { %v8452_v17 = vadd.f32 %v5263_v27, %v5115_v19 }
 0x5d7   : > { %5921 = vmatpush.xpose.msk.msrb.mxu3 %vm3035_vm4, %v8373_v20 }
 0x5da   : > { %v5265_v18 = vpop.f32.mrf.mxu2 }
 0x5db   : > { %v5266_v15 = vadd.f32 %v8308_v35, %v5265_v18  ;;  %5922 = vmatpush.xpose.msk.msrb.mxu3 %vm3035_vm4, %v8367_v24  ;;  %v5068_v55 = vpop.f32.mrf.mxu1 }
 0x5dc   : > { %v5117_v50 = vadd.f32 %v5068_v55, %v8324_v8 }
 0x5dd   : > { %v8460_v2 = vadd.f32 %v5266_v15, %v5116_v30 }
 0x5df   : > { %5923 = vmatpush.xpose.msk.msrb.mxu3 %vm3035_vm4, %v8358_v1 }
 0x5e2   : > { %v5267_v45 = vpop.f32.mrf.mxu2 }
 0x5e3   : > { %v5268_v14 = vadd.f32 %v8308_v35, %v5267_v45  ;;  %5924 = vmatpush.xpose.msk.msrb.mxu3 %vm3035_vm4, %v8349_v59  ;;  %v5071_v20 = vpop.f32.mrf.mxu1 }
 0x5e4   : > { %v5118_v39 = vadd.f32 %v5071_v20, %v8334_v43 }
 0x5e5   : > { %v8468_v49 = vadd.f32 %v5268_v14, %v5117_v50 }
 0x5e7   : > { %5925 = vmatpush.xpose.msk.msrb.mxu3 %vm3035_vm4, %v8339_v53 }
 0x5ea   : > { %v5270_v24 = vpop.f32.mrf.mxu2 }
 0x5eb   : > { %v5271_v8 = vadd.f32 %v8308_v35, %v5270_v24  ;;  %5926 = vmatpush.xpose.msk.msrb.mxu3 %vm3035_vm4, %v8330_v57  ;;  %v5073_v1 = vpop.f32.mrf.mxu1  ;;  %v8660_v24 = vld [vmem:[#allocation11_spill] sm:$0xff] }
 0x5ec   : > { %v5119_v40 = vadd.f32 %v5073_v1, %v8343_v36 }
 0x5ed   : > { %v8476_v52 = vadd.f32 %v5271_v8, %v5118_v39 }
 0x5ef   : > { %5927 = vmatpush.xpose.msk.msrb.mxu3 %vm3035_vm4, %v8320_v62 }
 0x5f2   : > { %v5272_v59 = vpop.f32.mrf.mxu2 }
 0x5f3   : > { %v5273_v43 = vadd.f32 %v8308_v35, %v5272_v59  ;;  %5928 = vmatpush.xpose.msk.msrb.mxu3 %vm3035_vm4, %v8311_v11  ;;  %v5076_v53 = vpop.f32.mrf.mxu1  ;;  %v4639_v11 = vpop.f32.mrf.mxu3 }
 0x5f4   : > { %v5120_v32 = vadd.f32 %v5076_v53, %v8353_v22 }
 0x5f5   : > { %v8484_v63 = vadd.f32 %v5273_v43, %v5119_v40  ;;  %v8661_v43 = vld [vmem:[#allocation10_spill] sm:$0xff] }
 0x5f6   : > { %v4679_v53 = vadd.f32 %v4639_v11, %v8661_v43 }
 0x5fa   : > { %v5275_v57 = vpop.f32.mrf.mxu2 }
 0x5fb   : > { %v5276_v60 = vadd.f32 %v8308_v35, %v5275_v57  ;;  %v5078_v36 = vpop.f32.mrf.mxu1  ;;  %v4642_v22 = vpop.f32.mrf.mxu3 }
 0x5fc   : > { %v5121_v62 = vadd.f32 %v5078_v36, %v8362_v61  ;;  %v4869_v61 = vpop.f32.mrf.mxu0  ;;  %v4680_v8 = vadd.f32 %v4642_v22, %v8660_v24  ;;  %v8662_v36 = vld [vmem:[#allocation9_spill] sm:$0xff] }
 0x5fd   : > { %v8488_v26 = vadd.f32 %v5276_v60, %v5120_v32 }
 0x602   : > { %v5277_v44 = vpop.f32.mrf.mxu2 }
 0x603   : > { %v5278_v42 = vadd.f32 %v8308_v35, %v5277_v44  ;;  %v5081_v12 = vpop.f32.mrf.mxu1  ;;  %v4644_v58 = vpop.f32.mrf.mxu3 }
 0x604   : > { %v4871_v38 = vpop.f32.mrf.mxu0  ;;  %v4681_v45 = vadd.f32 %v4644_v58, %v8277_v54  ;;  %v4901_v54 = vadd.f32 %v4861_v7, %v4679_v53  ;;  %v5327_v7 = vlaneseq }
 0x605   : > { %v5320_v46 = vadd.f32 %v5278_v42, %v5121_v62  ;;  %v4678_v62 = vadd.f32 %v4637_v56, %v8662_v36  ;;  %v8663_v56 = vmov 0.0  }
 0x606   : > { %v4903_v20 = vadd.f32 %v4866_v28, %v4681_v45 }
 0x607   : > { %v4900_v42 = vadd.f32 %v4859_v5, %v4678_v62 }
 0x609   : > { %v5122_v58 = vadd.f32 %v5081_v12, %v4900_v42 }
 0x60a   : > { %v5280_v0 = vpop.f32.mrf.mxu2 }
 0x60b   : > { %v5083_v21 = vpop.f32.mrf.mxu1  ;;  %v4647_v6 = vpop.f32.mrf.mxu3  ;;  %v5281_v22 = vadd.f32 %v8308_v35, %v5280_v0 }
 0x60c   : > { %v4682_v29 = vadd.f32 %v4647_v6, %v8288_v34  ;;  %v4902_v34 = vadd.f32 %v4864_v25, %v4680_v8  ;;  %v5123_v44 = vadd.f32 %v5083_v21, %v4901_v54 }
 0x60d   : > { %v5321_v11 = vadd.f32 %v5281_v22, %v5122_v58 }
 0x60e   : > { %v4904_v15 = vadd.f32 %v4869_v61, %v4682_v29 }
 0x612   : > { %v5282_v10 = vpop.f32.mrf.mxu2 }
 0x613   : > { %v5086_v41 = vpop.f32.mrf.mxu1  ;;  %v4649_v3 = vpop.f32.mrf.mxu3  ;;  %v5283_v57 = vadd.f32 %v8308_v35, %v5282_v10  ;;  %v5328_v10 = vshrl.u32 %v5327_v7, 7 }
 0x614   : > { %v4683_v9 = vadd.f32 %v4649_v3, %v8294_v51  ;;  %v5124_v32 = vadd.f32 %v5086_v41, %v4902_v34  ;;  %v5330_v41 = vand.u32 127, %v5327_v7 }
 0x615   : > { %v5322_v25 = vadd.f32 %v5283_v57, %v5123_v44 }
 0x616   : > { %v4905_v47 = vadd.f32 %v4871_v38, %v4683_v9  ;;  %vm5331_vm6 = vcmp.eq.s32.totalorder %v5328_v10, %v5330_v41 }
 0x617   : > { %v5912_v5 = vsel %vm5331_vm6, 1.0, %v8663_v56 }
 0x618   : > { %5929 = vmatmul.msk.f32.vlgmr.msrb.gmra.mxu3 %vm3035_vm4, %v5912_v5 }
 0x61a   : > { %v5285_v48 = vpop.f32.mrf.mxu2 }
 0x61b   : > { %v5088_v16 = vpop.f32.mrf.mxu1  ;;  %v5286_v40 = vadd.f32 %v8308_v35, %v5285_v48 }
 0x61c   : > { %v5125_v1 = vadd.f32 %v5088_v16, %v4903_v20 }
 0x61d   : > { %v5323_v60 = vadd.f32 %v5286_v40, %v5124_v32 }
 0x622   : > { %v5287_v4 = vpop.f32.mrf.mxu2 }
 0x623   : > { %v5091_v31 = vpop.f32.mrf.mxu1  ;;  %v5288_v51 = vadd.f32 %v8308_v35, %v5287_v4 }
 0x624   : > { %v5126_v14 = vadd.f32 %v5091_v31, %v4904_v15 }
 0x625   : > { %v5324_v59 = vadd.f32 %v5288_v51, %v5125_v1 }
 0x62a   : > { %v5290_v23 = vpop.f32.mrf.mxu2 }
 0x62b   : > { %v5093_v19 = vpop.f32.mrf.mxu1  ;;  %v5291_v55 = vadd.f32 %v8308_v35, %v5290_v23 }
 0x62c   : > { %v5127_v30 = vadd.f32 %v5093_v19, %v4905_v47 }
 0x62d   : > { %v5325_v39 = vadd.f32 %v5291_v55, %v5126_v14 }
 0x632   : > { %v5292_v27 = vpop.f32.mrf.mxu2 }
 0x633   : > { %v5293_v18 = vadd.f32 %v8308_v35, %v5292_v27 }
 0x635   : > { %v5326_v50 = vadd.f32 %v5293_v18, %v5127_v30 }
 0x637   : > { %5930 = vmatpush.xpose.msk.msra.mxu3 %vm3035_vm4, %v5326_v50 }
 0x63b   : > { %5931 = vmatpush.xpose.msk.msra.mxu3 %vm3035_vm4, %v5325_v39 }
 0x63f   : > { %5932 = vmatpush.xpose.msk.msra.mxu3 %vm3035_vm4, %v5324_v59 }
 0x643   : > { %5933 = vmatpush.xpose.msk.msra.mxu3 %vm3035_vm4, %v5323_v60 }
 0x647   : > { %5934 = vmatpush.xpose.msk.msra.mxu3 %vm3035_vm4, %v5322_v25 }
 0x64b   : > { %5935 = vmatpush.xpose.msk.msra.mxu3 %vm3035_vm4, %v5321_v11 }
 0x64f   : > { %5936 = vmatpush.xpose.msk.msra.mxu3 %vm3035_vm4, %v5320_v46 }
 0x653   : > { %5937 = vmatpush.xpose.msk.msra.mxu3 %vm3035_vm4, %v8488_v26 }
 0x657   : > { %5938 = vmatpush.xpose.msk.msra.mxu3 %vm3035_vm4, %v8484_v63 }
 0x65b   : > { %5939 = vmatpush.xpose.msk.msra.mxu3 %vm3035_vm4, %v8476_v52 }
 0x65f   : > { %5940 = vmatpush.xpose.msk.msra.mxu3 %vm3035_vm4, %v8468_v49 }
 0x663   : > { %5941 = vmatpush.xpose.msk.msra.mxu3 %vm3035_vm4, %v8460_v2 }
 0x667   : > { %5942 = vmatpush.xpose.msk.msra.mxu3 %vm3035_vm4, %v8452_v17 }
 0x66b   : > { %5943 = vmatpush.xpose.msk.msra.mxu3 %vm3035_vm4, %v8444_v37 }
 0x66f   : > { %5944 = vmatpush.xpose.msk.msra.mxu3 %vm3035_vm4, %v8437_v33 }
 0x673   : > { %5945 = vmatpush.xpose.msk.msra.mxu3 %vm3035_vm4, %v8422_v13 }
 0x676   : > { %5946 = vmatmul.msk.f32.vlgmr.msra.gmra.mxu3 %vm3035_vm4, %v5912_v5 }
 0x69b   : > { %v5450_v35 = vpop.f32.mrf.mxu3 }
 0x6f9   : > { %v5470_v49 = vpop.f32.mrf.mxu3 }
 0x6fa   : > { %v5475_v17 = vrot.slane %v5470_v49, 4 }
 0x6fc   : > { %v5477_v2 = vsel %vm5476_vm7, %v5450_v35, %v5475_v17 }
 0x6fd   : > { %5479 = vst [vmem:[%s278_s16] sm:$0xff] %v5477_v2 }
 0x6fe PF: > { %s17_s24 = sadd.s32 1, %s6144_s24  }
 0x6ff   : > { %p14_p4 = scmp.ge.s32.totalorder %s17_s24, 4  }
 0x701   :  { %16 = sbr.rel (!%p14_p4) target bundleno = 1 (0x1), region = 98 }

</bundles_post_ra>
